<compile_context>
chip_gen: v7x
topology: tpu7x:2x2x1
jax: 0.10.0
libtpu: 0.0.40
codegen_flags: <defaults>
</compile_context>

<pallas_src>
import numpy as np
import jax
import jax.numpy as jnp
from jax.experimental import pallas as pl
from jax.experimental.pallas import tpu as pltpu


# -----------------------------------------------------------------------------
# Fused decoder kernel factory
# -----------------------------------------------------------------------------
def _make_decoder_kernel(sp0, sp_out, K, C0p, Cm, C1p, B):
    D0, H0, W0 = sp0
    D1, H1, W1 = 2 * D0, 2 * H0, 2 * W0
    Do, Ho, Wo = sp_out
    q = (K - 1) // 2
    T = K * K * K
    P0, P1 = D0 * H0 * W0, D1 * H1 * W1
    BP0, BP1 = B * P0, B * P1
    BDo = B * Do

    def build_im2col(x, mask_ref, im_ref, dhw, Cp):
        # x: (Cp, Ptot) f32, flat spatial (batch-folded) on lanes.
        # Writes the 27 shifted+masked windows into im_ref (T*Cp, Ptot) f32.
        D, H, W = dhw
        Ptot = x.shape[1]
        t = 0
        for kd in range(K):
            for kh in range(K):
                for kw in range(K):
                    off = (kd - q) * H * W + (kh - q) * W + (kw - q)
                    xs = x if off == 0 else pltpu.roll(
                        x, shift=(-off) % Ptot, axis=1)
                    # precomputed 0/1 validity mask zeroes every position whose
                    # shifted (d,h,w) is out of range (this also kills any
                    # cross-batch-element lane wrap).
                    im_ref[t * Cp:(t + 1) * Cp, :] = xs * mask_ref[t:t + 1, :]
                    t += 1

    def kernel(x0_ref, w0_ref, b0_ref, m0_ref, up1_ref, w1_ref, b1_ref,
               m1_ref, rmask_ref, rfold_ref, o_ref, im0_ref, im1_ref):
        # ---- layer 0: ConvT3d(C0->Cm) as ONE matmul over a VMEM im2col ------
        build_im2col(x0_ref[0], m0_ref, im0_ref, (D0, H0, W0), C0p)
        y0 = jnp.dot(w0_ref[...], im0_ref[...].astype(jnp.bfloat16),
                     preferred_element_type=jnp.float32)          # (Cm, BP0)
        y0 = jnp.maximum(y0 + b0_ref[...], 0.0)   # bias once; ReLU commutes with NN upsample
        # ---- nearest x2 upsample: block-diagonal 0/1 selection matmul -------
        x1 = jnp.dot(y0.astype(jnp.bfloat16), up1_ref[...],
                     preferred_element_type=jnp.float32)          # (Cm, BP1)
        # ---- layer 1: ConvT3d(Cm->1) (padded to C1p rows, only row 0 real) --
        build_im2col(x1, m1_ref, im1_ref, (D1, H1, W1), Cm)
        y1 = jnp.dot(w1_ref[...], im1_ref[...].astype(jnp.bfloat16),
                     preferred_element_type=jnp.float32)          # (C1p, BP1)
        t1 = jnp.tanh(y1[0:1, :] + b1_ref[0:1, :])                # (1, BP1)
        # ---- final nearest upsample to (Do,Ho,Wo) ----------------------------
        # sublane-broadcast the single row, select each output row's 0/1 depth
        # window, then one 0/1 fold + H/W-upsample matmul -> lane-dense rows.
        m3 = jnp.broadcast_to(t1, (BDo, BP1)) * rmask_ref[...]    # (BDo, BP1)
        out = jnp.dot(m3.astype(jnp.bfloat16), rfold_ref[...],
                      preferred_element_type=jnp.float32)         # (BDo, Ho*Wo)
        o_ref[0] = out.astype(o_ref.dtype)                        # lane-dense store

    return kernel


# -----------------------------------------------------------------------------
# Wrapper-side constant preparation (tiny, one-time / trace-time)
# -----------------------------------------------------------------------------
def _convT_weight_fused(wt, cin_pad):
    """PyTorch ConvTranspose3d weight (Cin,Cout,K,K,K) -> fused im2col weight
    (Cout, K^3*cin_pad) of the equivalent stride-1 'same' conv (spatially
    flipped); column t*cin_pad + c pairs with im2col row t*cin_pad + c."""
    Cin, Cout, K = wt.shape[0], wt.shape[1], wt.shape[2]
    wf = wt[:, :, ::-1, ::-1, ::-1]
    taps = jnp.transpose(wf, (2, 3, 4, 1, 0)).reshape(K * K * K, Cout, Cin)
    taps = jnp.pad(taps, ((0, 0), (0, 0), (0, cin_pad - Cin)))
    return jnp.transpose(taps, (1, 0, 2)).reshape(Cout, K * K * K * cin_pad)


def _tap_masks(dhw, K, B):
    """Static per-tap validity masks, batch-tiled along lanes: (K^3, B*P)."""
    D, H, W = dhw
    q = (K - 1) // 2
    P = D * H * W
    p = np.arange(P)
    d, h, w = p // (H * W), (p // W) % H, p % W
    rows = []
    for kd in range(K):
        for kh in range(K):
            for kw in range(K):
                dd, dh, dw = kd - q, kh - q, kw - q
                v = ((d + dd >= 0) & (d + dd < D) & (h + dh >= 0) &
                     (h + dh < H) & (w + dw >= 0) & (w + dw < W))
                rows.append(np.tile(v.astype(np.float32), B))
    return np.stack(rows, axis=0)


def _nearest_up_matrix_3d(in_dhw, out_dhw):
    Di, Hi, Wi = in_dhw
    Do, Ho, Wo = out_dhw
    di = (np.arange(Do) * Di) // Do
    hi = (np.arange(Ho) * Hi) // Ho
    wi = (np.arange(Wo) * Wi) // Wo
    src = (di[:, None, None] * (Hi * Wi) + hi[None, :, None] * Wi
           + wi[None, None, :]).reshape(-1)
    m = np.zeros((Di * Hi * Wi, Do * Ho * Wo), np.float32)
    m[src, np.arange(src.size)] = 1.0
    return m


def _nearest_up3d_blockdiag(in_dhw, out_dhw, B):
    """Block-diagonal (per batch element) nearest x2 selection: (B*P0, B*P1)."""
    single = _nearest_up_matrix_3d(in_dhw, out_dhw)
    P0, P1 = single.shape
    m = np.zeros((B * P0, B * P1), np.float32)
    for b in range(B):
        m[b * P0:(b + 1) * P0, b * P1:(b + 1) * P1] = single
    return m


def _final_upsample_mats(in_dhw, out_dhw, B):
    """Row-window mask (B*Do, B*P1) + fold/HW-upsample matrix (B*P1, Ho*Wo)
    implementing nearest 3-D upsample of a single (1, B*P1) row."""
    D1, H1, W1 = in_dhw
    Do, Ho, Wo = out_dhw
    P1, HW1 = D1 * H1 * W1, H1 * W1
    sd = (np.arange(Do) * D1) // Do
    rowmask = np.zeros((B * Do, B * P1), np.float32)
    for b in range(B):
        for do in range(Do):
            s = b * P1 + sd[do] * HW1
            rowmask[b * Do + do, s:s + HW1] = 1.0
    hi = (np.arange(Ho) * H1) // Ho
    wi = (np.arange(Wo) * W1) // Wo
    src_hw = (hi[:, None] * W1 + wi[None, :]).reshape(-1)          # (Ho*Wo,)
    cmod = np.arange(B * P1) % HW1
    rfold = (cmod[:, None] == src_hw[None, :]).astype(np.float32)  # (B*P1, Ho*Wo)
    return rowmask, rfold


def decoder_forward(z_ncdhw, params, x_hat_spatial_shape, batch_block=None):
    """AE_CNN_3D_Decoder.forward for the configuration documented above."""
    N, Cz, D0, H0, W0 = z_ncdhw.shape
    wt1, bb1 = params["wt1"], params["b1"]     # (Cz, Cm, K,K,K), (Cm,)
    wt2, bb2 = params["wt2"], params["b2"]     # (Cm, 1,  K,K,K), (1,)
    Cm, K = wt1.shape[1], wt1.shape[2]
    Cf = wt2.shape[1]
    assert Cf == 1, "final decoder layer is expected to have 1 output channel"
    D1, H1, W1 = 2 * D0, 2 * H0, 2 * W0
    Do, Ho, Wo = x_hat_spatial_shape
    P0, P1 = D0 * H0 * W0, D1 * H1 * W1
    T = K * K * K

    # ---- batch folding onto the lane axis (>=128 lanes in layer 0) ----------
    if batch_block is None:
        B = max(1, min(N, -(-128 // P0)))       # ceil(128 / P0), capped at N
    else:
        B = max(1, min(N, batch_block))
    G = -(-N // B)                              # grid steps (>=2 when N allows)
    Npad = G * B

    # latent: channels-major, batch folded onto flat-spatial lanes; pad channels
    C0p = max(Cz, 8)
    x0 = z_ncdhw.reshape(N, Cz, P0).astype(jnp.float32)
    if Npad > N:
        x0 = jnp.pad(x0, ((0, Npad - N), (0, 0), (0, 0)))
    if C0p > Cz:
        x0 = jnp.pad(x0, ((0, 0), (0, C0p - Cz), (0, 0)))
    x0 = x0.reshape(G, B, C0p, P0).transpose(0, 2, 1, 3).reshape(G, C0p, B * P0)

    # fused im2col weights (bf16 MXU operands), zero-padded channel dims
    C1p = max(Cf, 8)
    w0 = _convT_weight_fused(wt1, C0p).astype(jnp.bfloat16)        # (Cm, T*C0p)
    w1 = jnp.pad(_convT_weight_fused(wt2, Cm),
                 ((0, C1p - Cf), (0, 0))).astype(jnp.bfloat16)     # (C1p, T*Cm)
    b0 = bb1.reshape(Cm, 1).astype(jnp.float32)
    b1 = jnp.pad(bb2.reshape(Cf, 1), ((0, C1p - Cf), (0, 0))).astype(jnp.float32)

    # static constants: per-tap validity masks, 0/1 upsample matrices
    m0 = jnp.asarray(_tap_masks((D0, H0, W0), K, B), jnp.float32)  # (T, B*P0)
    m1 = jnp.asarray(_tap_masks((D1, H1, W1), K, B), jnp.float32)  # (T, B*P1)
    up1 = jnp.asarray(_nearest_up3d_blockdiag((D0, H0, W0), (D1, H1, W1), B),
                      jnp.bfloat16)                                # (B*P0, B*P1)
    rmask_np, rfold_np = _final_upsample_mats((D1, H1, W1), (Do, Ho, Wo), B)
    rmask = jnp.asarray(rmask_np, jnp.float32)                     # (B*Do, B*P1)
    rfold = jnp.asarray(rfold_np, jnp.bfloat16)                    # (B*P1, Ho*Wo)

    kernel = _make_decoder_kernel((D0, H0, W0), (Do, Ho, Wo), K, C0p, Cm, C1p, B)

    out = pl.pallas_call(
        kernel,
        out_shape=jax.ShapeDtypeStruct((G, B * Do, Ho * Wo), z_ncdhw.dtype),
        grid=(G,),
        in_specs=[
            pl.BlockSpec((1, C0p, B * P0), lambda g: (g, 0, 0)),
            pl.BlockSpec((Cm, T * C0p), lambda g: (0, 0)),
            pl.BlockSpec((Cm, 1), lambda g: (0, 0)),
            pl.BlockSpec((T, B * P0), lambda g: (0, 0)),
            pl.BlockSpec((B * P0, B * P1), lambda g: (0, 0)),
            pl.BlockSpec((C1p, T * Cm), lambda g: (0, 0)),
            pl.BlockSpec((C1p, 1), lambda g: (0, 0)),
            pl.BlockSpec((T, B * P1), lambda g: (0, 0)),
            pl.BlockSpec((B * Do, B * P1), lambda g: (0, 0)),
            pl.BlockSpec((B * P1, Ho * Wo), lambda g: (0, 0)),
        ],
        out_specs=pl.BlockSpec((1, B * Do, Ho * Wo), lambda g: (g, 0, 0)),
        scratch_shapes=[
            pltpu.VMEM((T * C0p, B * P0), jnp.float32),   # layer-0 im2col
            pltpu.VMEM((T * Cm, B * P1), jnp.float32),    # layer-1 im2col
        ],
        compiler_params=pltpu.CompilerParams(
            dimension_semantics=("parallel",)),
    )(x0, w0, b0, m0, up1, w1, b1, m1, rmask, rfold)

    # (G, B*Do, Ho*Wo) -> (N, 1, Do, Ho, Wo): pure row-major reshape + slice
    return out.reshape(Npad, Do, Ho, Wo)[:N].reshape(N, 1, Do, Ho, Wo)


# -----------------------------------------------------------------------------
# Pure-numpy (float64) reference, following the PyTorch module order exactly
# -----------------------------------------------------------------------------
def _np_conv_t3d_s1(x, wt, b):
    N, Cin, D, H, W = x.shape
    Cout, K = wt.shape[1], wt.shape[2]
    q = (K - 1) // 2
    wf = wt[:, :, ::-1, ::-1, ::-1]
    xp = np.pad(x, ((0, 0), (0, 0), (q, q), (q, q), (q, q)))
    y = np.zeros((N, Cout, D, H, W), np.float64)
    for kd in range(K):
        for kh in range(K):
            for kw in range(K):
                y += np.einsum(
                    "ncdhw,co->nodhw",
                    xp[:, :, kd:kd + D, kh:kh + H, kw:kw + W],
                    wf[:, :, kd, kh, kw],
                )
    return y + b.reshape(1, Cout, 1, 1, 1)


def _np_upsample_nearest(x, size):
    N, C, D, H, W = x.shape
    oD, oH, oW = size
    di = (np.arange(oD) * D) // oD
    hi = (np.arange(oH) * H) // oH
    wi = (np.arange(oW) * W) // oW
    return x[:, :, di][:, :, :, hi][:, :, :, :, wi]


def _np_reference(z, params, x_hat_shape):
    wt1, b1 = np.float64(params["wt1"]), np.float64(params["b1"])
    wt2, b2 = np.float64(params["wt2"]), np.float64(params["b2"])
    h = _np_conv_t3d_s1(np.float64(z), wt1, b1)
    h = _np_upsample_nearest(h, tuple(2 * s for s in h.shape[2:]))
    h = np.maximum(h, 0.0)
    h = _np_conv_t3d_s1(h, wt2, b2)
    h = _np_upsample_nearest(h, x_hat_shape)
    return np.tanh(h)


# -----------------------------------------------------------------------------
if __name__ == "__main__":
    key = jax.random.PRNGKey(0)
    k1, k2, k3, k4, k5 = jax.random.split(key, 5)

    # ConvTranspose3d parameter shapes: weight (Cin, Cout, K, K, K), bias (Cout,)
    params = {
        "wt1": 0.05 * jax.random.normal(k1, (4, 8, 3, 3, 3), jnp.float32),
        "b1": 0.05 * jax.random.normal(k2, (8,), jnp.float32),
        "wt2": 0.05 * jax.random.normal(k3, (8, 1, 3, 3, 3), jnp.float32),
        "b2": 0.05 * jax.random.normal(k4, (1,), jnp.float32),
    }

    # latent z in PyTorch NCDHW layout; target spatial shape 16^3.
    # N=4 -> batch_block B=2 (128-lane layer 0) and grid=(2,) (both v7x TCs busy)
    z = jax.random.normal(k5, (4, 4, 4, 4, 4), jnp.float32)
    x_hat_spatial_shape = (16, 16, 16)

    fwd = jax.jit(decoder_forward, static_argnums=(2,))
    out = jax.block_until_ready(fwd(z, params, x_hat_spatial_shape))
    assert out.shape == (4, 1, 16, 16, 16), out.shape

    ref = _np_reference(np.asarray(z),
                        {k: np.asarray(v) for k, v in params.items()},
                        x_hat_spatial_shape)
    # bf16 MXU operands with f32 accumulation: expect ~1e-2 relative error.
    np.testing.assert_allclose(np.asarray(out, np.float64), ref,
                               atol=5e-2, rtol=5e-2)

    print("KERNEL_OK")
</pallas_src>

<mosaic_0001>
module attributes {stable_mosaic.version = 11 : i64} {
  func.func @kernel(%arg0: i32, %arg1: memref<1x8x128xf32, #tpu.memory_space<vmem>>, %arg2: memref<8x216xbf16, #tpu.memory_space<vmem>>, %arg3: memref<8x1xf32, #tpu.memory_space<vmem>>, %arg4: memref<27x128xf32, #tpu.memory_space<vmem>>, %arg5: memref<128x1024xbf16, #tpu.memory_space<vmem>>, %arg6: memref<8x216xbf16, #tpu.memory_space<vmem>>, %arg7: memref<8x1xf32, #tpu.memory_space<vmem>>, %arg8: memref<27x1024xf32, #tpu.memory_space<vmem>>, %arg9: memref<32x1024xf32, #tpu.memory_space<vmem>>, %arg10: memref<1024x256xbf16, #tpu.memory_space<vmem>>, %arg11: memref<1x32x256xf32, #tpu.memory_space<vmem>>, %arg12: memref<216x128xf32, #tpu.memory_space<vmem>>, %arg13: memref<216x1024xf32, #tpu.memory_space<vmem>>) attributes {dimension_semantics = [#tpu.dimension_semantics<parallel>], iteration_bounds = array<i64: 2>, scalar_prefetch = 0 : i64, scratch_operands = 2 : i64, tpu.core_type = #tpu.core_type<tc>, window_params = [{transform_indices = @transform_0, window_bounds = array<i64: 1, 8, 128>}, {pipeline_mode = #tpu.pipeline_mode<synchronous>, transform_indices = @transform_1, window_bounds = array<i64: 8, 216>}, {pipeline_mode = #tpu.pipeline_mode<synchronous>, transform_indices = @transform_2, window_bounds = array<i64: 8, 1>}, {pipeline_mode = #tpu.pipeline_mode<synchronous>, transform_indices = @transform_3, window_bounds = array<i64: 27, 128>}, {pipeline_mode = #tpu.pipeline_mode<synchronous>, transform_indices = @transform_4, window_bounds = array<i64: 128, 1024>}, {pipeline_mode = #tpu.pipeline_mode<synchronous>, transform_indices = @transform_5, window_bounds = array<i64: 8, 216>}, {pipeline_mode = #tpu.pipeline_mode<synchronous>, transform_indices = @transform_6, window_bounds = array<i64: 8, 1>}, {pipeline_mode = #tpu.pipeline_mode<synchronous>, transform_indices = @transform_7, window_bounds = array<i64: 27, 1024>}, {pipeline_mode = #tpu.pipeline_mode<synchronous>, transform_indices = @transform_8, window_bounds = array<i64: 32, 1024>}, {pipeline_mode = #tpu.pipeline_mode<synchronous>, transform_indices = @transform_9, window_bounds = array<i64: 1024, 256>}, {transform_indices = @transform_10, window_bounds = array<i64: 1, 32, 256>}]} {
    %c0 = arith.constant 0 : index
    %c0_0 = arith.constant 0 : index
    %c0_1 = arith.constant 0 : index
    %0 = vector.load %arg1[%c0, %c0_0, %c0_1] : memref<1x8x128xf32, #tpu.memory_space<vmem>>, vector<1x8x128xf32>
    %1 = vector.shape_cast %0 : vector<1x8x128xf32> to vector<8x128xf32>
    %c21_i32 = arith.constant 21 : i32
    %2 = tpu.dynamic_rotate %1 by %c21_i32 dim 1 : vector<8x128xf32>, i32 -> vector<8x128xf32>
    %c0_2 = arith.constant 0 : index
    %c0_3 = arith.constant 0 : index
    %3 = vector.load %arg4[%c0_2, %c0_3] : memref<27x128xf32, #tpu.memory_space<vmem>>, vector<1x128xf32>
    %4 = vector.broadcast %3 : vector<1x128xf32> to vector<8x128xf32>
    %5 = arith.mulf %2, %4 : vector<8x128xf32>
    %c0_4 = arith.constant 0 : index
    %c0_5 = arith.constant 0 : index
    %6 = vector.load %arg12[%c0_4, %c0_5] : memref<216x128xf32, #tpu.memory_space<vmem>>, vector<8x128xf32>
    tpu.vector_store %arg12[%c0_4, %c0_5], %5 {strides = array<i32>} : memref<216x128xf32, #tpu.memory_space<vmem>>, vector<8x128xf32>,
    %c20_i32 = arith.constant 20 : i32
    %7 = tpu.dynamic_rotate %1 by %c20_i32 dim 1 : vector<8x128xf32>, i32 -> vector<8x128xf32>
    %c1 = arith.constant 1 : index
    %c0_6 = arith.constant 0 : index
    %8 = vector.load %arg4[%c1, %c0_6] : memref<27x128xf32, #tpu.memory_space<vmem>>, vector<1x128xf32>
    %9 = vector.broadcast %8 : vector<1x128xf32> to vector<8x128xf32>
    %10 = arith.mulf %7, %9 : vector<8x128xf32>
    %c8 = arith.constant 8 : index
    %c0_7 = arith.constant 0 : index
    %11 = vector.load %arg12[%c8, %c0_7] : memref<216x128xf32, #tpu.memory_space<vmem>>, vector<8x128xf32>
    tpu.vector_store %arg12[%c8, %c0_7], %10 {strides = array<i32>} : memref<216x128xf32, #tpu.memory_space<vmem>>, vector<8x128xf32>,
    %c19_i32 = arith.constant 19 : i32
    %12 = tpu.dynamic_rotate %1 by %c19_i32 dim 1 : vector<8x128xf32>, i32 -> vector<8x128xf32>
    %c2 = arith.constant 2 : index
    %c0_8 = arith.constant 0 : index
    %13 = vector.load %arg4[%c2, %c0_8] : memref<27x128xf32, #tpu.memory_space<vmem>>, vector<1x128xf32>
    %14 = vector.broadcast %13 : vector<1x128xf32> to vector<8x128xf32>
    %15 = arith.mulf %12, %14 : vector<8x128xf32>
    %c16 = arith.constant 16 : index
    %c0_9 = arith.constant 0 : index
    %16 = vector.load %arg12[%c16, %c0_9] : memref<216x128xf32, #tpu.memory_space<vmem>>, vector<8x128xf32>
    tpu.vector_store %arg12[%c16, %c0_9], %15 {strides = array<i32>} : memref<216x128xf32, #tpu.memory_space<vmem>>, vector<8x128xf32>,
    %c17_i32 = arith.constant 17 : i32
    %17 = tpu.dynamic_rotate %1 by %c17_i32 dim 1 : vector<8x128xf32>, i32 -> vector<8x128xf32>
    %c3 = arith.constant 3 : index
    %c0_10 = arith.constant 0 : index
    %18 = vector.load %arg4[%c3, %c0_10] : memref<27x128xf32, #tpu.memory_space<vmem>>, vector<1x128xf32>
    %19 = vector.broadcast %18 : vector<1x128xf32> to vector<8x128xf32>
    %20 = arith.mulf %17, %19 : vector<8x128xf32>
    %c24 = arith.constant 24 : index
    %c0_11 = arith.constant 0 : index
    %21 = vector.load %arg12[%c24, %c0_11] : memref<216x128xf32, #tpu.memory_space<vmem>>, vector<8x128xf32>
    tpu.vector_store %arg12[%c24, %c0_11], %20 {strides = array<i32>} : memref<216x128xf32, #tpu.memory_space<vmem>>, vector<8x128xf32>,
    %c16_i32 = arith.constant 16 : i32
    %22 = tpu.dynamic_rotate %1 by %c16_i32 dim 1 : vector<8x128xf32>, i32 -> vector<8x128xf32>
    %c4 = arith.constant 4 : index
    %c0_12 = arith.constant 0 : index
    %23 = vector.load %arg4[%c4, %c0_12] : memref<27x128xf32, #tpu.memory_space<vmem>>, vector<1x128xf32>
    %24 = vector.broadcast %23 : vector<1x128xf32> to vector<8x128xf32>
    %25 = arith.mulf %22, %24 : vector<8x128xf32>
    %c32 = arith.constant 32 : index
    %c0_13 = arith.constant 0 : index
    %26 = vector.load %arg12[%c32, %c0_13] : memref<216x128xf32, #tpu.memory_space<vmem>>, vector<8x128xf32>
    tpu.vector_store %arg12[%c32, %c0_13], %25 {strides = array<i32>} : memref<216x128xf32, #tpu.memory_space<vmem>>, vector<8x128xf32>,
    %c15_i32 = arith.constant 15 : i32
    %27 = tpu.dynamic_rotate %1 by %c15_i32 dim 1 : vector<8x128xf32>, i32 -> vector<8x128xf32>
    %c5 = arith.constant 5 : index
    %c0_14 = arith.constant 0 : index
    %28 = vector.load %arg4[%c5, %c0_14] : memref<27x128xf32, #tpu.memory_space<vmem>>, vector<1x128xf32>
    %29 = vector.broadcast %28 : vector<1x128xf32> to vector<8x128xf32>
    %30 = arith.mulf %27, %29 : vector<8x128xf32>
    %c40 = arith.constant 40 : index
    %c0_15 = arith.constant 0 : index
    %31 = vector.load %arg12[%c40, %c0_15] : memref<216x128xf32, #tpu.memory_space<vmem>>, vector<8x128xf32>
    tpu.vector_store %arg12[%c40, %c0_15], %30 {strides = array<i32>} : memref<216x128xf32, #tpu.memory_space<vmem>>, vector<8x128xf32>,
    %c13_i32 = arith.constant 13 : i32
    %32 = tpu.dynamic_rotate %1 by %c13_i32 dim 1 : vector<8x128xf32>, i32 -> vector<8x128xf32>
    %c6 = arith.constant 6 : index
    %c0_16 = arith.constant 0 : index
    %33 = vector.load %arg4[%c6, %c0_16] : memref<27x128xf32, #tpu.memory_space<vmem>>, vector<1x128xf32>
    %34 = vector.broadcast %33 : vector<1x128xf32> to vector<8x128xf32>
    %35 = arith.mulf %32, %34 : vector<8x128xf32>
    %c48 = arith.constant 48 : index
    %c0_17 = arith.constant 0 : index
    %36 = vector.load %arg12[%c48, %c0_17] : memref<216x128xf32, #tpu.memory_space<vmem>>, vector<8x128xf32>
    tpu.vector_store %arg12[%c48, %c0_17], %35 {strides = array<i32>} : memref<216x128xf32, #tpu.memory_space<vmem>>, vector<8x128xf32>,
    %c12_i32 = arith.constant 12 : i32
    %37 = tpu.dynamic_rotate %1 by %c12_i32 dim 1 : vector<8x128xf32>, i32 -> vector<8x128xf32>
    %c7 = arith.constant 7 : index
    %c0_18 = arith.constant 0 : index
    %38 = vector.load %arg4[%c7, %c0_18] : memref<27x128xf32, #tpu.memory_space<vmem>>, vector<1x128xf32>
    %39 = vector.broadcast %38 : vector<1x128xf32> to vector<8x128xf32>
    %40 = arith.mulf %37, %39 : vector<8x128xf32>
    %c56 = arith.constant 56 : index
    %c0_19 = arith.constant 0 : index
    %41 = vector.load %arg12[%c56, %c0_19] : memref<216x128xf32, #tpu.memory_space<vmem>>, vector<8x128xf32>
    tpu.vector_store %arg12[%c56, %c0_19], %40 {strides = array<i32>} : memref<216x128xf32, #tpu.memory_space<vmem>>, vector<8x128xf32>,
    %c11_i32 = arith.constant 11 : i32
    %42 = tpu.dynamic_rotate %1 by %c11_i32 dim 1 : vector<8x128xf32>, i32 -> vector<8x128xf32>
    %c8_20 = arith.constant 8 : index
    %c0_21 = arith.constant 0 : index
    %43 = vector.load %arg4[%c8_20, %c0_21] : memref<27x128xf32, #tpu.memory_space<vmem>>, vector<1x128xf32>
    %44 = vector.broadcast %43 : vector<1x128xf32> to vector<8x128xf32>
    %45 = arith.mulf %42, %44 : vector<8x128xf32>
    %c64 = arith.constant 64 : index
    %c0_22 = arith.constant 0 : index
    %46 = vector.load %arg12[%c64, %c0_22] : memref<216x128xf32, #tpu.memory_space<vmem>>, vector<8x128xf32>
    tpu.vector_store %arg12[%c64, %c0_22], %45 {strides = array<i32>} : memref<216x128xf32, #tpu.memory_space<vmem>>, vector<8x128xf32>,
    %c5_i32 = arith.constant 5 : i32
    %47 = tpu.dynamic_rotate %1 by %c5_i32 dim 1 : vector<8x128xf32>, i32 -> vector<8x128xf32>
    %c9 = arith.constant 9 : index
    %c0_23 = arith.constant 0 : index
    %48 = vector.load %arg4[%c9, %c0_23] : memref<27x128xf32, #tpu.memory_space<vmem>>, vector<1x128xf32>
    %49 = vector.broadcast %48 : vector<1x128xf32> to vector<8x128xf32>
    %50 = arith.mulf %47, %49 : vector<8x128xf32>
    %c72 = arith.constant 72 : index
    %c0_24 = arith.constant 0 : index
    %51 = vector.load %arg12[%c72, %c0_24] : memref<216x128xf32, #tpu.memory_space<vmem>>, vector<8x128xf32>
    tpu.vector_store %arg12[%c72, %c0_24], %50 {strides = array<i32>} : memref<216x128xf32, #tpu.memory_space<vmem>>, vector<8x128xf32>,
    %c4_i32 = arith.constant 4 : i32
    %52 = tpu.dynamic_rotate %1 by %c4_i32 dim 1 : vector<8x128xf32>, i32 -> vector<8x128xf32>
    %c10 = arith.constant 10 : index
    %c0_25 = arith.constant 0 : index
    %53 = vector.load %arg4[%c10, %c0_25] : memref<27x128xf32, #tpu.memory_space<vmem>>, vector<1x128xf32>
    %54 = vector.broadcast %53 : vector<1x128xf32> to vector<8x128xf32>
    %55 = arith.mulf %52, %54 : vector<8x128xf32>
    %c80 = arith.constant 80 : index
    %c0_26 = arith.constant 0 : index
    %56 = vector.load %arg12[%c80, %c0_26] : memref<216x128xf32, #tpu.memory_space<vmem>>, vector<8x128xf32>
    tpu.vector_store %arg12[%c80, %c0_26], %55 {strides = array<i32>} : memref<216x128xf32, #tpu.memory_space<vmem>>, vector<8x128xf32>,
    %c3_i32 = arith.constant 3 : i32
    %57 = tpu.dynamic_rotate %1 by %c3_i32 dim 1 : vector<8x128xf32>, i32 -> vector<8x128xf32>
    %c11 = arith.constant 11 : index
    %c0_27 = arith.constant 0 : index
    %58 = vector.load %arg4[%c11, %c0_27] : memref<27x128xf32, #tpu.memory_space<vmem>>, vector<1x128xf32>
    %59 = vector.broadcast %58 : vector<1x128xf32> to vector<8x128xf32>
    %60 = arith.mulf %57, %59 : vector<8x128xf32>
    %c88 = arith.constant 88 : index
    %c0_28 = arith.constant 0 : index
    %61 = vector.load %arg12[%c88, %c0_28] : memref<216x128xf32, #tpu.memory_space<vmem>>, vector<8x128xf32>
    tpu.vector_store %arg12[%c88, %c0_28], %60 {strides = array<i32>} : memref<216x128xf32, #tpu.memory_space<vmem>>, vector<8x128xf32>,
    %c1_i32 = arith.constant 1 : i32
    %62 = tpu.dynamic_rotate %1 by %c1_i32 dim 1 : vector<8x128xf32>, i32 -> vector<8x128xf32>
    %c12 = arith.constant 12 : index
    %c0_29 = arith.constant 0 : index
    %63 = vector.load %arg4[%c12, %c0_29] : memref<27x128xf32, #tpu.memory_space<vmem>>, vector<1x128xf32>
    %64 = vector.broadcast %63 : vector<1x128xf32> to vector<8x128xf32>
    %65 = arith.mulf %62, %64 : vector<8x128xf32>
    %c96 = arith.constant 96 : index
    %c0_30 = arith.constant 0 : index
    %66 = vector.load %arg12[%c96, %c0_30] : memref<216x128xf32, #tpu.memory_space<vmem>>, vector<8x128xf32>
    tpu.vector_store %arg12[%c96, %c0_30], %65 {strides = array<i32>} : memref<216x128xf32, #tpu.memory_space<vmem>>, vector<8x128xf32>,
    %c13 = arith.constant 13 : index
    %c0_31 = arith.constant 0 : index
    %67 = vector.load %arg4[%c13, %c0_31] : memref<27x128xf32, #tpu.memory_space<vmem>>, vector<1x128xf32>
    %68 = vector.broadcast %67 : vector<1x128xf32> to vector<8x128xf32>
    %69 = arith.mulf %1, %68 : vector<8x128xf32>
    %c104 = arith.constant 104 : index
    %c0_32 = arith.constant 0 : index
    %70 = vector.load %arg12[%c104, %c0_32] : memref<216x128xf32, #tpu.memory_space<vmem>>, vector<8x128xf32>
    tpu.vector_store %arg12[%c104, %c0_32], %69 {strides = array<i32>} : memref<216x128xf32, #tpu.memory_space<vmem>>, vector<8x128xf32>,
    %c127_i32 = arith.constant 127 : i32
    %71 = tpu.dynamic_rotate %1 by %c127_i32 dim 1 : vector<8x128xf32>, i32 -> vector<8x128xf32>
    %c14 = arith.constant 14 : index
    %c0_33 = arith.constant 0 : index
    %72 = vector.load %arg4[%c14, %c0_33] : memref<27x128xf32, #tpu.memory_space<vmem>>, vector<1x128xf32>
    %73 = vector.broadcast %72 : vector<1x128xf32> to vector<8x128xf32>
    %74 = arith.mulf %71, %73 : vector<8x128xf32>
    %c112 = arith.constant 112 : index
    %c0_34 = arith.constant 0 : index
    %75 = vector.load %arg12[%c112, %c0_34] : memref<216x128xf32, #tpu.memory_space<vmem>>, vector<8x128xf32>
    tpu.vector_store %arg12[%c112, %c0_34], %74 {strides = array<i32>} : memref<216x128xf32, #tpu.memory_space<vmem>>, vector<8x128xf32>,
    %c125_i32 = arith.constant 125 : i32
    %76 = tpu.dynamic_rotate %1 by %c125_i32 dim 1 : vector<8x128xf32>, i32 -> vector<8x128xf32>
    %c15 = arith.constant 15 : index
    %c0_35 = arith.constant 0 : index
    %77 = vector.load %arg4[%c15, %c0_35] : memref<27x128xf32, #tpu.memory_space<vmem>>, vector<1x128xf32>
    %78 = vector.broadcast %77 : vector<1x128xf32> to vector<8x128xf32>
    %79 = arith.mulf %76, %78 : vector<8x128xf32>
    %c120 = arith.constant 120 : index
    %c0_36 = arith.constant 0 : index
    %80 = vector.load %arg12[%c120, %c0_36] : memref<216x128xf32, #tpu.memory_space<vmem>>, vector<8x128xf32>
    tpu.vector_store %arg12[%c120, %c0_36], %79 {strides = array<i32>} : memref<216x128xf32, #tpu.memory_space<vmem>>, vector<8x128xf32>,
    %c124_i32 = arith.constant 124 : i32
    %81 = tpu.dynamic_rotate %1 by %c124_i32 dim 1 : vector<8x128xf32>, i32 -> vector<8x128xf32>
    %c16_37 = arith.constant 16 : index
    %c0_38 = arith.constant 0 : index
    %82 = vector.load %arg4[%c16_37, %c0_38] : memref<27x128xf32, #tpu.memory_space<vmem>>, vector<1x128xf32>
    %83 = vector.broadcast %82 : vector<1x128xf32> to vector<8x128xf32>
    %84 = arith.mulf %81, %83 : vector<8x128xf32>
    %c128 = arith.constant 128 : index
    %c0_39 = arith.constant 0 : index
    %85 = vector.load %arg12[%c128, %c0_39] : memref<216x128xf32, #tpu.memory_space<vmem>>, vector<8x128xf32>
    tpu.vector_store %arg12[%c128, %c0_39], %84 {strides = array<i32>} : memref<216x128xf32, #tpu.memory_space<vmem>>, vector<8x128xf32>,
    %c123_i32 = arith.constant 123 : i32
    %86 = tpu.dynamic_rotate %1 by %c123_i32 dim 1 : vector<8x128xf32>, i32 -> vector<8x128xf32>
    %c17 = arith.constant 17 : index
    %c0_40 = arith.constant 0 : index
    %87 = vector.load %arg4[%c17, %c0_40] : memref<27x128xf32, #tpu.memory_space<vmem>>, vector<1x128xf32>
    %88 = vector.broadcast %87 : vector<1x128xf32> to vector<8x128xf32>
    %89 = arith.mulf %86, %88 : vector<8x128xf32>
    %c136 = arith.constant 136 : index
    %c0_41 = arith.constant 0 : index
    %90 = vector.load %arg12[%c136, %c0_41] : memref<216x128xf32, #tpu.memory_space<vmem>>, vector<8x128xf32>
    tpu.vector_store %arg12[%c136, %c0_41], %89 {strides = array<i32>} : memref<216x128xf32, #tpu.memory_space<vmem>>, vector<8x128xf32>,
    %c117_i32 = arith.constant 117 : i32
    %91 = tpu.dynamic_rotate %1 by %c117_i32 dim 1 : vector<8x128xf32>, i32 -> vector<8x128xf32>
    %c18 = arith.constant 18 : index
    %c0_42 = arith.constant 0 : index
    %92 = vector.load %arg4[%c18, %c0_42] : memref<27x128xf32, #tpu.memory_space<vmem>>, vector<1x128xf32>
    %93 = vector.broadcast %92 : vector<1x128xf32> to vector<8x128xf32>
    %94 = arith.mulf %91, %93 : vector<8x128xf32>
    %c144 = arith.constant 144 : index
    %c0_43 = arith.constant 0 : index
    %95 = vector.load %arg12[%c144, %c0_43] : memref<216x128xf32, #tpu.memory_space<vmem>>, vector<8x128xf32>
    tpu.vector_store %arg12[%c144, %c0_43], %94 {strides = array<i32>} : memref<216x128xf32, #tpu.memory_space<vmem>>, vector<8x128xf32>,
    %c116_i32 = arith.constant 116 : i32
    %96 = tpu.dynamic_rotate %1 by %c116_i32 dim 1 : vector<8x128xf32>, i32 -> vector<8x128xf32>
    %c19 = arith.constant 19 : index
    %c0_44 = arith.constant 0 : index
    %97 = vector.load %arg4[%c19, %c0_44] : memref<27x128xf32, #tpu.memory_space<vmem>>, vector<1x128xf32>
    %98 = vector.broadcast %97 : vector<1x128xf32> to vector<8x128xf32>
    %99 = arith.mulf %96, %98 : vector<8x128xf32>
    %c152 = arith.constant 152 : index
    %c0_45 = arith.constant 0 : index
    %100 = vector.load %arg12[%c152, %c0_45] : memref<216x128xf32, #tpu.memory_space<vmem>>, vector<8x128xf32>
    tpu.vector_store %arg12[%c152, %c0_45], %99 {strides = array<i32>} : memref<216x128xf32, #tpu.memory_space<vmem>>, vector<8x128xf32>,
    %c115_i32 = arith.constant 115 : i32
    %101 = tpu.dynamic_rotate %1 by %c115_i32 dim 1 : vector<8x128xf32>, i32 -> vector<8x128xf32>
    %c20 = arith.constant 20 : index
    %c0_46 = arith.constant 0 : index
    %102 = vector.load %arg4[%c20, %c0_46] : memref<27x128xf32, #tpu.memory_space<vmem>>, vector<1x128xf32>
    %103 = vector.broadcast %102 : vector<1x128xf32> to vector<8x128xf32>
    %104 = arith.mulf %101, %103 : vector<8x128xf32>
    %c160 = arith.constant 160 : index
    %c0_47 = arith.constant 0 : index
    %105 = vector.load %arg12[%c160, %c0_47] : memref<216x128xf32, #tpu.memory_space<vmem>>, vector<8x128xf32>
    tpu.vector_store %arg12[%c160, %c0_47], %104 {strides = array<i32>} : memref<216x128xf32, #tpu.memory_space<vmem>>, vector<8x128xf32>,
    %c113_i32 = arith.constant 113 : i32
    %106 = tpu.dynamic_rotate %1 by %c113_i32 dim 1 : vector<8x128xf32>, i32 -> vector<8x128xf32>
    %c21 = arith.constant 21 : index
    %c0_48 = arith.constant 0 : index
    %107 = vector.load %arg4[%c21, %c0_48] : memref<27x128xf32, #tpu.memory_space<vmem>>, vector<1x128xf32>
    %108 = vector.broadcast %107 : vector<1x128xf32> to vector<8x128xf32>
    %109 = arith.mulf %106, %108 : vector<8x128xf32>
    %c168 = arith.constant 168 : index
    %c0_49 = arith.constant 0 : index
    %110 = vector.load %arg12[%c168, %c0_49] : memref<216x128xf32, #tpu.memory_space<vmem>>, vector<8x128xf32>
    tpu.vector_store %arg12[%c168, %c0_49], %109 {strides = array<i32>} : memref<216x128xf32, #tpu.memory_space<vmem>>, vector<8x128xf32>,
    %c112_i32 = arith.constant 112 : i32
    %111 = tpu.dynamic_rotate %1 by %c112_i32 dim 1 : vector<8x128xf32>, i32 -> vector<8x128xf32>
    %c22 = arith.constant 22 : index
    %c0_50 = arith.constant 0 : index
    %112 = vector.load %arg4[%c22, %c0_50] : memref<27x128xf32, #tpu.memory_space<vmem>>, vector<1x128xf32>
    %113 = vector.broadcast %112 : vector<1x128xf32> to vector<8x128xf32>
    %114 = arith.mulf %111, %113 : vector<8x128xf32>
    %c176 = arith.constant 176 : index
    %c0_51 = arith.constant 0 : index
    %115 = vector.load %arg12[%c176, %c0_51] : memref<216x128xf32, #tpu.memory_space<vmem>>, vector<8x128xf32>
    tpu.vector_store %arg12[%c176, %c0_51], %114 {strides = array<i32>} : memref<216x128xf32, #tpu.memory_space<vmem>>, vector<8x128xf32>,
    %c111_i32 = arith.constant 111 : i32
    %116 = tpu.dynamic_rotate %1 by %c111_i32 dim 1 : vector<8x128xf32>, i32 -> vector<8x128xf32>
    %c23 = arith.constant 23 : index
    %c0_52 = arith.constant 0 : index
    %117 = vector.load %arg4[%c23, %c0_52] : memref<27x128xf32, #tpu.memory_space<vmem>>, vector<1x128xf32>
    %118 = vector.broadcast %117 : vector<1x128xf32> to vector<8x128xf32>
    %119 = arith.mulf %116, %118 : vector<8x128xf32>
    %c184 = arith.constant 184 : index
    %c0_53 = arith.constant 0 : index
    %120 = vector.load %arg12[%c184, %c0_53] : memref<216x128xf32, #tpu.memory_space<vmem>>, vector<8x128xf32>
    tpu.vector_store %arg12[%c184, %c0_53], %119 {strides = array<i32>} : memref<216x128xf32, #tpu.memory_space<vmem>>, vector<8x128xf32>,
    %c109_i32 = arith.constant 109 : i32
    %121 = tpu.dynamic_rotate %1 by %c109_i32 dim 1 : vector<8x128xf32>, i32 -> vector<8x128xf32>
    %c24_54 = arith.constant 24 : index
    %c0_55 = arith.constant 0 : index
    %122 = vector.load %arg4[%c24_54, %c0_55] : memref<27x128xf32, #tpu.memory_space<vmem>>, vector<1x128xf32>
    %123 = vector.broadcast %122 : vector<1x128xf32> to vector<8x128xf32>
    %124 = arith.mulf %121, %123 : vector<8x128xf32>
    %c192 = arith.constant 192 : index
    %c0_56 = arith.constant 0 : index
    %125 = vector.load %arg12[%c192, %c0_56] : memref<216x128xf32, #tpu.memory_space<vmem>>, vector<8x128xf32>
    tpu.vector_store %arg12[%c192, %c0_56], %124 {strides = array<i32>} : memref<216x128xf32, #tpu.memory_space<vmem>>, vector<8x128xf32>,
    %c108_i32 = arith.constant 108 : i32
    %126 = tpu.dynamic_rotate %1 by %c108_i32 dim 1 : vector<8x128xf32>, i32 -> vector<8x128xf32>
    %c25 = arith.constant 25 : index
    %c0_57 = arith.constant 0 : index
    %127 = vector.load %arg4[%c25, %c0_57] : memref<27x128xf32, #tpu.memory_space<vmem>>, vector<1x128xf32>
    %128 = vector.broadcast %127 : vector<1x128xf32> to vector<8x128xf32>
    %129 = arith.mulf %126, %128 : vector<8x128xf32>
    %c200 = arith.constant 200 : index
    %c0_58 = arith.constant 0 : index
    %130 = vector.load %arg12[%c200, %c0_58] : memref<216x128xf32, #tpu.memory_space<vmem>>, vector<8x128xf32>
    tpu.vector_store %arg12[%c200, %c0_58], %129 {strides = array<i32>} : memref<216x128xf32, #tpu.memory_space<vmem>>, vector<8x128xf32>,
    %c107_i32 = arith.constant 107 : i32
    %131 = tpu.dynamic_rotate %1 by %c107_i32 dim 1 : vector<8x128xf32>, i32 -> vector<8x128xf32>
    %c26 = arith.constant 26 : index
    %c0_59 = arith.constant 0 : index
    %132 = vector.load %arg4[%c26, %c0_59] : memref<27x128xf32, #tpu.memory_space<vmem>>, vector<1x128xf32>
    %133 = vector.broadcast %132 : vector<1x128xf32> to vector<8x128xf32>
    %134 = arith.mulf %131, %133 : vector<8x128xf32>
    %c208 = arith.constant 208 : index
    %c0_60 = arith.constant 0 : index
    %135 = vector.load %arg12[%c208, %c0_60] : memref<216x128xf32, #tpu.memory_space<vmem>>, vector<8x128xf32>
    tpu.vector_store %arg12[%c208, %c0_60], %134 {strides = array<i32>} : memref<216x128xf32, #tpu.memory_space<vmem>>, vector<8x128xf32>,
    %c0_61 = arith.constant 0 : index
    %c0_62 = arith.constant 0 : index
    %136 = vector.load %arg2[%c0_61, %c0_62] : memref<8x216xbf16, #tpu.memory_space<vmem>>, vector<8x216xbf16>
    %c0_63 = arith.constant 0 : index
    %c0_64 = arith.constant 0 : index
    %137 = vector.load %arg12[%c0_63, %c0_64] : memref<216x128xf32, #tpu.memory_space<vmem>>, vector<216x128xf32>
    %138 = arith.truncf %137 : vector<216x128xf32> to vector<216x128xbf16>
    %cst = arith.constant dense<0.000000e+00> : vector<8x128xf32>
    %139 = tpu.matmul %136, %138, %cst {dimension_numbers = #tpu.dot_dimension_numbers<[1], [0], [0], [1], [0, 0, 1, 1], [], []>} : vector<8x216xbf16>, vector<216x128xbf16>, vector<8x128xf32> -> vector<8x128xf32>
    %c0_65 = arith.constant 0 : index
    %c0_66 = arith.constant 0 : index
    %140 = vector.load %arg3[%c0_65, %c0_66] : memref<8x1xf32, #tpu.memory_space<vmem>>, vector<8x1xf32>
    %141 = vector.broadcast %140 : vector<8x1xf32> to vector<8x128xf32>
    %142 = arith.addf %139, %141 : vector<8x128xf32>
    %cst_67 = arith.constant 0.000000e+00 : f32
    %143 = vector.broadcast %cst_67 : f32 to vector<8x128xf32>
    %144 = arith.maximumf %142, %143 : vector<8x128xf32>
    %145 = arith.truncf %144 : vector<8x128xf32> to vector<8x128xbf16>
    %c0_68 = arith.constant 0 : index
    %c0_69 = arith.constant 0 : index
    %146 = vector.load %arg5[%c0_68, %c0_69] : memref<128x1024xbf16, #tpu.memory_space<vmem>>, vector<128x1024xbf16>
    %cst_70 = arith.constant dense<0.000000e+00> : vector<8x1024xf32>
    %147 = tpu.matmul %145, %146, %cst_70 {dimension_numbers = #tpu.dot_dimension_numbers<[1], [0], [0], [1], [0, 0, 1, 1], [], []>} : vector<8x128xbf16>, vector<128x1024xbf16>, vector<8x1024xf32> -> vector<8x1024xf32>
    %c73_i32 = arith.constant 73 : i32
    %148 = tpu.dynamic_rotate %147 by %c73_i32 dim 1 : vector<8x1024xf32>, i32 -> vector<8x1024xf32>
    %c0_71 = arith.constant 0 : index
    %c0_72 = arith.constant 0 : index
    %149 = vector.load %arg8[%c0_71, %c0_72] : memref<27x1024xf32, #tpu.memory_space<vmem>>, vector<1x1024xf32>
    %150 = vector.broadcast %149 : vector<1x1024xf32> to vector<8x1024xf32>
    %151 = arith.mulf %148, %150 : vector<8x1024xf32>
    %c0_73 = arith.constant 0 : index
    %c0_74 = arith.constant 0 : index
    %152 = vector.load %arg13[%c0_73, %c0_74] : memref<216x1024xf32, #tpu.memory_space<vmem>>, vector<8x1024xf32>
    tpu.vector_store %arg13[%c0_73, %c0_74], %151 {strides = array<i32>} : memref<216x1024xf32, #tpu.memory_space<vmem>>, vector<8x1024xf32>,
    %c72_i32 = arith.constant 72 : i32
    %153 = tpu.dynamic_rotate %147 by %c72_i32 dim 1 : vector<8x1024xf32>, i32 -> vector<8x1024xf32>
    %c1_75 = arith.constant 1 : index
    %c0_76 = arith.constant 0 : index
    %154 = vector.load %arg8[%c1_75, %c0_76] : memref<27x1024xf32, #tpu.memory_space<vmem>>, vector<1x1024xf32>
    %155 = vector.broadcast %154 : vector<1x1024xf32> to vector<8x1024xf32>
    %156 = arith.mulf %153, %155 : vector<8x1024xf32>
    %c8_77 = arith.constant 8 : index
    %c0_78 = arith.constant 0 : index
    %157 = vector.load %arg13[%c8_77, %c0_78] : memref<216x1024xf32, #tpu.memory_space<vmem>>, vector<8x1024xf32>
    tpu.vector_store %arg13[%c8_77, %c0_78], %156 {strides = array<i32>} : memref<216x1024xf32, #tpu.memory_space<vmem>>, vector<8x1024xf32>,
    %c71_i32 = arith.constant 71 : i32
    %158 = tpu.dynamic_rotate %147 by %c71_i32 dim 1 : vector<8x1024xf32>, i32 -> vector<8x1024xf32>
    %c2_79 = arith.constant 2 : index
    %c0_80 = arith.constant 0 : index
    %159 = vector.load %arg8[%c2_79, %c0_80] : memref<27x1024xf32, #tpu.memory_space<vmem>>, vector<1x1024xf32>
    %160 = vector.broadcast %159 : vector<1x1024xf32> to vector<8x1024xf32>
    %161 = arith.mulf %158, %160 : vector<8x1024xf32>
    %c16_81 = arith.constant 16 : index
    %c0_82 = arith.constant 0 : index
    %162 = vector.load %arg13[%c16_81, %c0_82] : memref<216x1024xf32, #tpu.memory_space<vmem>>, vector<8x1024xf32>
    tpu.vector_store %arg13[%c16_81, %c0_82], %161 {strides = array<i32>} : memref<216x1024xf32, #tpu.memory_space<vmem>>, vector<8x1024xf32>,
    %c65_i32 = arith.constant 65 : i32
    %163 = tpu.dynamic_rotate %147 by %c65_i32 dim 1 : vector<8x1024xf32>, i32 -> vector<8x1024xf32>
    %c3_83 = arith.constant 3 : index
    %c0_84 = arith.constant 0 : index
    %164 = vector.load %arg8[%c3_83, %c0_84] : memref<27x1024xf32, #tpu.memory_space<vmem>>, vector<1x1024xf32>
    %165 = vector.broadcast %164 : vector<1x1024xf32> to vector<8x1024xf32>
    %166 = arith.mulf %163, %165 : vector<8x1024xf32>
    %c24_85 = arith.constant 24 : index
    %c0_86 = arith.constant 0 : index
    %167 = vector.load %arg13[%c24_85, %c0_86] : memref<216x1024xf32, #tpu.memory_space<vmem>>, vector<8x1024xf32>
    tpu.vector_store %arg13[%c24_85, %c0_86], %166 {strides = array<i32>} : memref<216x1024xf32, #tpu.memory_space<vmem>>, vector<8x1024xf32>,
    %c64_i32 = arith.constant 64 : i32
    %168 = tpu.dynamic_rotate %147 by %c64_i32 dim 1 : vector<8x1024xf32>, i32 -> vector<8x1024xf32>
    %c4_87 = arith.constant 4 : index
    %c0_88 = arith.constant 0 : index
    %169 = vector.load %arg8[%c4_87, %c0_88] : memref<27x1024xf32, #tpu.memory_space<vmem>>, vector<1x1024xf32>
    %170 = vector.broadcast %169 : vector<1x1024xf32> to vector<8x1024xf32>
    %171 = arith.mulf %168, %170 : vector<8x1024xf32>
    %c32_89 = arith.constant 32 : index
    %c0_90 = arith.constant 0 : index
    %172 = vector.load %arg13[%c32_89, %c0_90] : memref<216x1024xf32, #tpu.memory_space<vmem>>, vector<8x1024xf32>
    tpu.vector_store %arg13[%c32_89, %c0_90], %171 {strides = array<i32>} : memref<216x1024xf32, #tpu.memory_space<vmem>>, vector<8x1024xf32>,
    %c63_i32 = arith.constant 63 : i32
    %173 = tpu.dynamic_rotate %147 by %c63_i32 dim 1 : vector<8x1024xf32>, i32 -> vector<8x1024xf32>
    %c5_91 = arith.constant 5 : index
    %c0_92 = arith.constant 0 : index
    %174 = vector.load %arg8[%c5_91, %c0_92] : memref<27x1024xf32, #tpu.memory_space<vmem>>, vector<1x1024xf32>
    %175 = vector.broadcast %174 : vector<1x1024xf32> to vector<8x1024xf32>
    %176 = arith.mulf %173, %175 : vector<8x1024xf32>
    %c40_93 = arith.constant 40 : index
    %c0_94 = arith.constant 0 : index
    %177 = vector.load %arg13[%c40_93, %c0_94] : memref<216x1024xf32, #tpu.memory_space<vmem>>, vector<8x1024xf32>
    tpu.vector_store %arg13[%c40_93, %c0_94], %176 {strides = array<i32>} : memref<216x1024xf32, #tpu.memory_space<vmem>>, vector<8x1024xf32>,
    %c57_i32 = arith.constant 57 : i32
    %178 = tpu.dynamic_rotate %147 by %c57_i32 dim 1 : vector<8x1024xf32>, i32 -> vector<8x1024xf32>
    %c6_95 = arith.constant 6 : index
    %c0_96 = arith.constant 0 : index
    %179 = vector.load %arg8[%c6_95, %c0_96] : memref<27x1024xf32, #tpu.memory_space<vmem>>, vector<1x1024xf32>
    %180 = vector.broadcast %179 : vector<1x1024xf32> to vector<8x1024xf32>
    %181 = arith.mulf %178, %180 : vector<8x1024xf32>
    %c48_97 = arith.constant 48 : index
    %c0_98 = arith.constant 0 : index
    %182 = vector.load %arg13[%c48_97, %c0_98] : memref<216x1024xf32, #tpu.memory_space<vmem>>, vector<8x1024xf32>
    tpu.vector_store %arg13[%c48_97, %c0_98], %181 {strides = array<i32>} : memref<216x1024xf32, #tpu.memory_space<vmem>>, vector<8x1024xf32>,
    %c56_i32 = arith.constant 56 : i32
    %183 = tpu.dynamic_rotate %147 by %c56_i32 dim 1 : vector<8x1024xf32>, i32 -> vector<8x1024xf32>
    %c7_99 = arith.constant 7 : index
    %c0_100 = arith.constant 0 : index
    %184 = vector.load %arg8[%c7_99, %c0_100] : memref<27x1024xf32, #tpu.memory_space<vmem>>, vector<1x1024xf32>
    %185 = vector.broadcast %184 : vector<1x1024xf32> to vector<8x1024xf32>
    %186 = arith.mulf %183, %185 : vector<8x1024xf32>
    %c56_101 = arith.constant 56 : index
    %c0_102 = arith.constant 0 : index
    %187 = vector.load %arg13[%c56_101, %c0_102] : memref<216x1024xf32, #tpu.memory_space<vmem>>, vector<8x1024xf32>
    tpu.vector_store %arg13[%c56_101, %c0_102], %186 {strides = array<i32>} : memref<216x1024xf32, #tpu.memory_space<vmem>>, vector<8x1024xf32>,
    %c55_i32 = arith.constant 55 : i32
    %188 = tpu.dynamic_rotate %147 by %c55_i32 dim 1 : vector<8x1024xf32>, i32 -> vector<8x1024xf32>
    %c8_103 = arith.constant 8 : index
    %c0_104 = arith.constant 0 : index
    %189 = vector.load %arg8[%c8_103, %c0_104] : memref<27x1024xf32, #tpu.memory_space<vmem>>, vector<1x1024xf32>
    %190 = vector.broadcast %189 : vector<1x1024xf32> to vector<8x1024xf32>
    %191 = arith.mulf %188, %190 : vector<8x1024xf32>
    %c64_105 = arith.constant 64 : index
    %c0_106 = arith.constant 0 : index
    %192 = vector.load %arg13[%c64_105, %c0_106] : memref<216x1024xf32, #tpu.memory_space<vmem>>, vector<8x1024xf32>
    tpu.vector_store %arg13[%c64_105, %c0_106], %191 {strides = array<i32>} : memref<216x1024xf32, #tpu.memory_space<vmem>>, vector<8x1024xf32>,
    %c9_i32 = arith.constant 9 : i32
    %193 = tpu.dynamic_rotate %147 by %c9_i32 dim 1 : vector<8x1024xf32>, i32 -> vector<8x1024xf32>
    %c9_107 = arith.constant 9 : index
    %c0_108 = arith.constant 0 : index
    %194 = vector.load %arg8[%c9_107, %c0_108] : memref<27x1024xf32, #tpu.memory_space<vmem>>, vector<1x1024xf32>
    %195 = vector.broadcast %194 : vector<1x1024xf32> to vector<8x1024xf32>
    %196 = arith.mulf %193, %195 : vector<8x1024xf32>
    %c72_109 = arith.constant 72 : index
    %c0_110 = arith.constant 0 : index
    %197 = vector.load %arg13[%c72_109, %c0_110] : memref<216x1024xf32, #tpu.memory_space<vmem>>, vector<8x1024xf32>
    tpu.vector_store %arg13[%c72_109, %c0_110], %196 {strides = array<i32>} : memref<216x1024xf32, #tpu.memory_space<vmem>>, vector<8x1024xf32>,
    %c8_i32 = arith.constant 8 : i32
    %198 = tpu.dynamic_rotate %147 by %c8_i32 dim 1 : vector<8x1024xf32>, i32 -> vector<8x1024xf32>
    %c10_111 = arith.constant 10 : index
    %c0_112 = arith.constant 0 : index
    %199 = vector.load %arg8[%c10_111, %c0_112] : memref<27x1024xf32, #tpu.memory_space<vmem>>, vector<1x1024xf32>
    %200 = vector.broadcast %199 : vector<1x1024xf32> to vector<8x1024xf32>
    %201 = arith.mulf %198, %200 : vector<8x1024xf32>
    %c80_113 = arith.constant 80 : index
    %c0_114 = arith.constant 0 : index
    %202 = vector.load %arg13[%c80_113, %c0_114] : memref<216x1024xf32, #tpu.memory_space<vmem>>, vector<8x1024xf32>
    tpu.vector_store %arg13[%c80_113, %c0_114], %201 {strides = array<i32>} : memref<216x1024xf32, #tpu.memory_space<vmem>>, vector<8x1024xf32>,
    %c7_i32 = arith.constant 7 : i32
    %203 = tpu.dynamic_rotate %147 by %c7_i32 dim 1 : vector<8x1024xf32>, i32 -> vector<8x1024xf32>
    %c11_115 = arith.constant 11 : index
    %c0_116 = arith.constant 0 : index
    %204 = vector.load %arg8[%c11_115, %c0_116] : memref<27x1024xf32, #tpu.memory_space<vmem>>, vector<1x1024xf32>
    %205 = vector.broadcast %204 : vector<1x1024xf32> to vector<8x1024xf32>
    %206 = arith.mulf %203, %205 : vector<8x1024xf32>
    %c88_117 = arith.constant 88 : index
    %c0_118 = arith.constant 0 : index
    %207 = vector.load %arg13[%c88_117, %c0_118] : memref<216x1024xf32, #tpu.memory_space<vmem>>, vector<8x1024xf32>
    tpu.vector_store %arg13[%c88_117, %c0_118], %206 {strides = array<i32>} : memref<216x1024xf32, #tpu.memory_space<vmem>>, vector<8x1024xf32>,
    %c1_i32_119 = arith.constant 1 : i32
    %208 = tpu.dynamic_rotate %147 by %c1_i32_119 dim 1 : vector<8x1024xf32>, i32 -> vector<8x1024xf32>
    %c12_120 = arith.constant 12 : index
    %c0_121 = arith.constant 0 : index
    %209 = vector.load %arg8[%c12_120, %c0_121] : memref<27x1024xf32, #tpu.memory_space<vmem>>, vector<1x1024xf32>
    %210 = vector.broadcast %209 : vector<1x1024xf32> to vector<8x1024xf32>
    %211 = arith.mulf %208, %210 : vector<8x1024xf32>
    %c96_122 = arith.constant 96 : index
    %c0_123 = arith.constant 0 : index
    %212 = vector.load %arg13[%c96_122, %c0_123] : memref<216x1024xf32, #tpu.memory_space<vmem>>, vector<8x1024xf32>
    tpu.vector_store %arg13[%c96_122, %c0_123], %211 {strides = array<i32>} : memref<216x1024xf32, #tpu.memory_space<vmem>>, vector<8x1024xf32>,
    %c13_124 = arith.constant 13 : index
    %c0_125 = arith.constant 0 : index
    %213 = vector.load %arg8[%c13_124, %c0_125] : memref<27x1024xf32, #tpu.memory_space<vmem>>, vector<1x1024xf32>
    %214 = vector.broadcast %213 : vector<1x1024xf32> to vector<8x1024xf32>
    %215 = arith.mulf %147, %214 : vector<8x1024xf32>
    %c104_126 = arith.constant 104 : index
    %c0_127 = arith.constant 0 : index
    %216 = vector.load %arg13[%c104_126, %c0_127] : memref<216x1024xf32, #tpu.memory_space<vmem>>, vector<8x1024xf32>
    tpu.vector_store %arg13[%c104_126, %c0_127], %215 {strides = array<i32>} : memref<216x1024xf32, #tpu.memory_space<vmem>>, vector<8x1024xf32>,
    %c1023_i32 = arith.constant 1023 : i32
    %217 = tpu.dynamic_rotate %147 by %c1023_i32 dim 1 : vector<8x1024xf32>, i32 -> vector<8x1024xf32>
    %c14_128 = arith.constant 14 : index
    %c0_129 = arith.constant 0 : index
    %218 = vector.load %arg8[%c14_128, %c0_129] : memref<27x1024xf32, #tpu.memory_space<vmem>>, vector<1x1024xf32>
    %219 = vector.broadcast %218 : vector<1x1024xf32> to vector<8x1024xf32>
    %220 = arith.mulf %217, %219 : vector<8x1024xf32>
    %c112_130 = arith.constant 112 : index
    %c0_131 = arith.constant 0 : index
    %221 = vector.load %arg13[%c112_130, %c0_131] : memref<216x1024xf32, #tpu.memory_space<vmem>>, vector<8x1024xf32>
    tpu.vector_store %arg13[%c112_130, %c0_131], %220 {strides = array<i32>} : memref<216x1024xf32, #tpu.memory_space<vmem>>, vector<8x1024xf32>,
    %c1017_i32 = arith.constant 1017 : i32
    %222 = tpu.dynamic_rotate %147 by %c1017_i32 dim 1 : vector<8x1024xf32>, i32 -> vector<8x1024xf32>
    %c15_132 = arith.constant 15 : index
    %c0_133 = arith.constant 0 : index
    %223 = vector.load %arg8[%c15_132, %c0_133] : memref<27x1024xf32, #tpu.memory_space<vmem>>, vector<1x1024xf32>
    %224 = vector.broadcast %223 : vector<1x1024xf32> to vector<8x1024xf32>
    %225 = arith.mulf %222, %224 : vector<8x1024xf32>
    %c120_134 = arith.constant 120 : index
    %c0_135 = arith.constant 0 : index
    %226 = vector.load %arg13[%c120_134, %c0_135] : memref<216x1024xf32, #tpu.memory_space<vmem>>, vector<8x1024xf32>
    tpu.vector_store %arg13[%c120_134, %c0_135], %225 {strides = array<i32>} : memref<216x1024xf32, #tpu.memory_space<vmem>>, vector<8x1024xf32>,
    %c1016_i32 = arith.constant 1016 : i32
    %227 = tpu.dynamic_rotate %147 by %c1016_i32 dim 1 : vector<8x1024xf32>, i32 -> vector<8x1024xf32>
    %c16_136 = arith.constant 16 : index
    %c0_137 = arith.constant 0 : index
    %228 = vector.load %arg8[%c16_136, %c0_137] : memref<27x1024xf32, #tpu.memory_space<vmem>>, vector<1x1024xf32>
    %229 = vector.broadcast %228 : vector<1x1024xf32> to vector<8x1024xf32>
    %230 = arith.mulf %227, %229 : vector<8x1024xf32>
    %c128_138 = arith.constant 128 : index
    %c0_139 = arith.constant 0 : index
    %231 = vector.load %arg13[%c128_138, %c0_139] : memref<216x1024xf32, #tpu.memory_space<vmem>>, vector<8x1024xf32>
    tpu.vector_store %arg13[%c128_138, %c0_139], %230 {strides = array<i32>} : memref<216x1024xf32, #tpu.memory_space<vmem>>, vector<8x1024xf32>,
    %c1015_i32 = arith.constant 1015 : i32
    %232 = tpu.dynamic_rotate %147 by %c1015_i32 dim 1 : vector<8x1024xf32>, i32 -> vector<8x1024xf32>
    %c17_140 = arith.constant 17 : index
    %c0_141 = arith.constant 0 : index
    %233 = vector.load %arg8[%c17_140, %c0_141] : memref<27x1024xf32, #tpu.memory_space<vmem>>, vector<1x1024xf32>
    %234 = vector.broadcast %233 : vector<1x1024xf32> to vector<8x1024xf32>
    %235 = arith.mulf %232, %234 : vector<8x1024xf32>
    %c136_142 = arith.constant 136 : index
    %c0_143 = arith.constant 0 : index
    %236 = vector.load %arg13[%c136_142, %c0_143] : memref<216x1024xf32, #tpu.memory_space<vmem>>, vector<8x1024xf32>
    tpu.vector_store %arg13[%c136_142, %c0_143], %235 {strides = array<i32>} : memref<216x1024xf32, #tpu.memory_space<vmem>>, vector<8x1024xf32>,
    %c969_i32 = arith.constant 969 : i32
    %237 = tpu.dynamic_rotate %147 by %c969_i32 dim 1 : vector<8x1024xf32>, i32 -> vector<8x1024xf32>
    %c18_144 = arith.constant 18 : index
    %c0_145 = arith.constant 0 : index
    %238 = vector.load %arg8[%c18_144, %c0_145] : memref<27x1024xf32, #tpu.memory_space<vmem>>, vector<1x1024xf32>
    %239 = vector.broadcast %238 : vector<1x1024xf32> to vector<8x1024xf32>
    %240 = arith.mulf %237, %239 : vector<8x1024xf32>
    %c144_146 = arith.constant 144 : index
    %c0_147 = arith.constant 0 : index
    %241 = vector.load %arg13[%c144_146, %c0_147] : memref<216x1024xf32, #tpu.memory_space<vmem>>, vector<8x1024xf32>
    tpu.vector_store %arg13[%c144_146, %c0_147], %240 {strides = array<i32>} : memref<216x1024xf32, #tpu.memory_space<vmem>>, vector<8x1024xf32>,
    %c968_i32 = arith.constant 968 : i32
    %242 = tpu.dynamic_rotate %147 by %c968_i32 dim 1 : vector<8x1024xf32>, i32 -> vector<8x1024xf32>
    %c19_148 = arith.constant 19 : index
    %c0_149 = arith.constant 0 : index
    %243 = vector.load %arg8[%c19_148, %c0_149] : memref<27x1024xf32, #tpu.memory_space<vmem>>, vector<1x1024xf32>
    %244 = vector.broadcast %243 : vector<1x1024xf32> to vector<8x1024xf32>
    %245 = arith.mulf %242, %244 : vector<8x1024xf32>
    %c152_150 = arith.constant 152 : index
    %c0_151 = arith.constant 0 : index
    %246 = vector.load %arg13[%c152_150, %c0_151] : memref<216x1024xf32, #tpu.memory_space<vmem>>, vector<8x1024xf32>
    tpu.vector_store %arg13[%c152_150, %c0_151], %245 {strides = array<i32>} : memref<216x1024xf32, #tpu.memory_space<vmem>>, vector<8x1024xf32>,
    %c967_i32 = arith.constant 967 : i32
    %247 = tpu.dynamic_rotate %147 by %c967_i32 dim 1 : vector<8x1024xf32>, i32 -> vector<8x1024xf32>
    %c20_152 = arith.constant 20 : index
    %c0_153 = arith.constant 0 : index
    %248 = vector.load %arg8[%c20_152, %c0_153] : memref<27x1024xf32, #tpu.memory_space<vmem>>, vector<1x1024xf32>
    %249 = vector.broadcast %248 : vector<1x1024xf32> to vector<8x1024xf32>
    %250 = arith.mulf %247, %249 : vector<8x1024xf32>
    %c160_154 = arith.constant 160 : index
    %c0_155 = arith.constant 0 : index
    %251 = vector.load %arg13[%c160_154, %c0_155] : memref<216x1024xf32, #tpu.memory_space<vmem>>, vector<8x1024xf32>
    tpu.vector_store %arg13[%c160_154, %c0_155], %250 {strides = array<i32>} : memref<216x1024xf32, #tpu.memory_space<vmem>>, vector<8x1024xf32>,
    %c961_i32 = arith.constant 961 : i32
    %252 = tpu.dynamic_rotate %147 by %c961_i32 dim 1 : vector<8x1024xf32>, i32 -> vector<8x1024xf32>
    %c21_156 = arith.constant 21 : index
    %c0_157 = arith.constant 0 : index
    %253 = vector.load %arg8[%c21_156, %c0_157] : memref<27x1024xf32, #tpu.memory_space<vmem>>, vector<1x1024xf32>
    %254 = vector.broadcast %253 : vector<1x1024xf32> to vector<8x1024xf32>
    %255 = arith.mulf %252, %254 : vector<8x1024xf32>
    %c168_158 = arith.constant 168 : index
    %c0_159 = arith.constant 0 : index
    %256 = vector.load %arg13[%c168_158, %c0_159] : memref<216x1024xf32, #tpu.memory_space<vmem>>, vector<8x1024xf32>
    tpu.vector_store %arg13[%c168_158, %c0_159], %255 {strides = array<i32>} : memref<216x1024xf32, #tpu.memory_space<vmem>>, vector<8x1024xf32>,
    %c960_i32 = arith.constant 960 : i32
    %257 = tpu.dynamic_rotate %147 by %c960_i32 dim 1 : vector<8x1024xf32>, i32 -> vector<8x1024xf32>
    %c22_160 = arith.constant 22 : index
    %c0_161 = arith.constant 0 : index
    %258 = vector.load %arg8[%c22_160, %c0_161] : memref<27x1024xf32, #tpu.memory_space<vmem>>, vector<1x1024xf32>
    %259 = vector.broadcast %258 : vector<1x1024xf32> to vector<8x1024xf32>
    %260 = arith.mulf %257, %259 : vector<8x1024xf32>
    %c176_162 = arith.constant 176 : index
    %c0_163 = arith.constant 0 : index
    %261 = vector.load %arg13[%c176_162, %c0_163] : memref<216x1024xf32, #tpu.memory_space<vmem>>, vector<8x1024xf32>
    tpu.vector_store %arg13[%c176_162, %c0_163], %260 {strides = array<i32>} : memref<216x1024xf32, #tpu.memory_space<vmem>>, vector<8x1024xf32>,
    %c959_i32 = arith.constant 959 : i32
    %262 = tpu.dynamic_rotate %147 by %c959_i32 dim 1 : vector<8x1024xf32>, i32 -> vector<8x1024xf32>
    %c23_164 = arith.constant 23 : index
    %c0_165 = arith.constant 0 : index
    %263 = vector.load %arg8[%c23_164, %c0_165] : memref<27x1024xf32, #tpu.memory_space<vmem>>, vector<1x1024xf32>
    %264 = vector.broadcast %263 : vector<1x1024xf32> to vector<8x1024xf32>
    %265 = arith.mulf %262, %264 : vector<8x1024xf32>
    %c184_166 = arith.constant 184 : index
    %c0_167 = arith.constant 0 : index
    %266 = vector.load %arg13[%c184_166, %c0_167] : memref<216x1024xf32, #tpu.memory_space<vmem>>, vector<8x1024xf32>
    tpu.vector_store %arg13[%c184_166, %c0_167], %265 {strides = array<i32>} : memref<216x1024xf32, #tpu.memory_space<vmem>>, vector<8x1024xf32>,
    %c953_i32 = arith.constant 953 : i32
    %267 = tpu.dynamic_rotate %147 by %c953_i32 dim 1 : vector<8x1024xf32>, i32 -> vector<8x1024xf32>
    %c24_168 = arith.constant 24 : index
    %c0_169 = arith.constant 0 : index
    %268 = vector.load %arg8[%c24_168, %c0_169] : memref<27x1024xf32, #tpu.memory_space<vmem>>, vector<1x1024xf32>
    %269 = vector.broadcast %268 : vector<1x1024xf32> to vector<8x1024xf32>
    %270 = arith.mulf %267, %269 : vector<8x1024xf32>
    %c192_170 = arith.constant 192 : index
    %c0_171 = arith.constant 0 : index
    %271 = vector.load %arg13[%c192_170, %c0_171] : memref<216x1024xf32, #tpu.memory_space<vmem>>, vector<8x1024xf32>
    tpu.vector_store %arg13[%c192_170, %c0_171], %270 {strides = array<i32>} : memref<216x1024xf32, #tpu.memory_space<vmem>>, vector<8x1024xf32>,
    %c952_i32 = arith.constant 952 : i32
    %272 = tpu.dynamic_rotate %147 by %c952_i32 dim 1 : vector<8x1024xf32>, i32 -> vector<8x1024xf32>
    %c25_172 = arith.constant 25 : index
    %c0_173 = arith.constant 0 : index
    %273 = vector.load %arg8[%c25_172, %c0_173] : memref<27x1024xf32, #tpu.memory_space<vmem>>, vector<1x1024xf32>
    %274 = vector.broadcast %273 : vector<1x1024xf32> to vector<8x1024xf32>
    %275 = arith.mulf %272, %274 : vector<8x1024xf32>
    %c200_174 = arith.constant 200 : index
    %c0_175 = arith.constant 0 : index
    %276 = vector.load %arg13[%c200_174, %c0_175] : memref<216x1024xf32, #tpu.memory_space<vmem>>, vector<8x1024xf32>
    tpu.vector_store %arg13[%c200_174, %c0_175], %275 {strides = array<i32>} : memref<216x1024xf32, #tpu.memory_space<vmem>>, vector<8x1024xf32>,
    %c951_i32 = arith.constant 951 : i32
    %277 = tpu.dynamic_rotate %147 by %c951_i32 dim 1 : vector<8x1024xf32>, i32 -> vector<8x1024xf32>
    %c26_176 = arith.constant 26 : index
    %c0_177 = arith.constant 0 : index
    %278 = vector.load %arg8[%c26_176, %c0_177] : memref<27x1024xf32, #tpu.memory_space<vmem>>, vector<1x1024xf32>
    %279 = vector.broadcast %278 : vector<1x1024xf32> to vector<8x1024xf32>
    %280 = arith.mulf %277, %279 : vector<8x1024xf32>
    %c208_178 = arith.constant 208 : index
    %c0_179 = arith.constant 0 : index
    %281 = vector.load %arg13[%c208_178, %c0_179] : memref<216x1024xf32, #tpu.memory_space<vmem>>, vector<8x1024xf32>
    tpu.vector_store %arg13[%c208_178, %c0_179], %280 {strides = array<i32>} : memref<216x1024xf32, #tpu.memory_space<vmem>>, vector<8x1024xf32>,
    %c0_180 = arith.constant 0 : index
    %c0_181 = arith.constant 0 : index
    %282 = vector.load %arg6[%c0_180, %c0_181] : memref<8x216xbf16, #tpu.memory_space<vmem>>, vector<8x216xbf16>
    %c0_182 = arith.constant 0 : index
    %c0_183 = arith.constant 0 : index
    %283 = vector.load %arg13[%c0_182, %c0_183] : memref<216x1024xf32, #tpu.memory_space<vmem>>, vector<216x1024xf32>
    %284 = arith.truncf %283 : vector<216x1024xf32> to vector<216x1024xbf16>
    %cst_184 = arith.constant dense<0.000000e+00> : vector<8x1024xf32>
    %285 = tpu.matmul %282, %284, %cst_184 {dimension_numbers = #tpu.dot_dimension_numbers<[1], [0], [0], [1], [0, 0, 1, 1], [], []>} : vector<8x216xbf16>, vector<216x1024xbf16>, vector<8x1024xf32> -> vector<8x1024xf32>
    %286 = vector.extract_strided_slice %285 {offsets = [0, 0], sizes = [1, 1024], strides = [1, 1]} : vector<8x1024xf32> to vector<1x1024xf32>
    %c0_185 = arith.constant 0 : index
    %c0_186 = arith.constant 0 : index
    %287 = vector.load %arg7[%c0_185, %c0_186] : memref<8x1xf32, #tpu.memory_space<vmem>>, vector<1x1xf32>
    %288 = vector.broadcast %287 : vector<1x1xf32> to vector<1x1024xf32>
    %289 = arith.addf %286, %288 : vector<1x1024xf32>
    %290 = math.tanh %289 : vector<1x1024xf32>
    %291 = vector.shape_cast %290 : vector<1x1024xf32> to vector<1x1024xf32>
    %292 = vector.broadcast %291 : vector<1x1024xf32> to vector<32x1024xf32>
    %c0_187 = arith.constant 0 : index
    %c0_188 = arith.constant 0 : index
    %293 = vector.load %arg9[%c0_187, %c0_188] : memref<32x1024xf32, #tpu.memory_space<vmem>>, vector<32x1024xf32>
    %294 = arith.mulf %292, %293 : vector<32x1024xf32>
    %295 = arith.truncf %294 : vector<32x1024xf32> to vector<32x1024xbf16>
    %c0_189 = arith.constant 0 : index
    %c0_190 = arith.constant 0 : index
    %296 = vector.load %arg10[%c0_189, %c0_190] : memref<1024x256xbf16, #tpu.memory_space<vmem>>, vector<1024x256xbf16>
    %cst_191 = arith.constant dense<0.000000e+00> : vector<32x256xf32>
    %297 = tpu.matmul %295, %296, %cst_191 {dimension_numbers = #tpu.dot_dimension_numbers<[1], [0], [0], [1], [0, 0, 1, 1], [], []>} : vector<32x1024xbf16>, vector<1024x256xbf16>, vector<32x256xf32> -> vector<32x256xf32>
    %c0_192 = arith.constant 0 : index
    %c0_193 = arith.constant 0 : index
    %c0_194 = arith.constant 0 : index
    %298 = vector.load %arg11[%c0_192, %c0_193, %c0_194] : memref<1x32x256xf32, #tpu.memory_space<vmem>>, vector<1x32x256xf32>
    %299 = vector.shape_cast %298 : vector<1x32x256xf32> to vector<32x256xf32>
    %300 = vector.shape_cast %297 : vector<32x256xf32> to vector<1x32x256xf32>
    tpu.vector_store %arg11[%c0_192, %c0_193, %c0_194], %300 {strides = array<i32>} : memref<1x32x256xf32, #tpu.memory_space<vmem>>, vector<1x32x256xf32>,
    return
  }
  func.func @transform_0(%arg0: i32) -> (i32, i32, i32) {
    %c0_i32 = arith.constant 0 : i32
    %c0_i32_0 = arith.constant 0 : i32
    %c0_i32_1 = arith.constant 0 : i32
    return %arg0, %c0_i32, %c0_i32_0 : i32, i32, i32
  }
  func.func @transform_1(%arg0: i32) -> (i32, i32) {
    %c0_i32 = arith.constant 0 : i32
    %c0_i32_0 = arith.constant 0 : i32
    %c0_i32_1 = arith.constant 0 : i32
    return %c0_i32, %c0_i32_0 : i32, i32
  }
  func.func @transform_2(%arg0: i32) -> (i32, i32) {
    %c0_i32 = arith.constant 0 : i32
    %c0_i32_0 = arith.constant 0 : i32
    %c0_i32_1 = arith.constant 0 : i32
    return %c0_i32, %c0_i32_0 : i32, i32
  }
  func.func @transform_3(%arg0: i32) -> (i32, i32) {
    %c0_i32 = arith.constant 0 : i32
    %c0_i32_0 = arith.constant 0 : i32
    %c0_i32_1 = arith.constant 0 : i32
    return %c0_i32, %c0_i32_0 : i32, i32
  }
  func.func @transform_4(%arg0: i32) -> (i32, i32) {
    %c0_i32 = arith.constant 0 : i32
    %c0_i32_0 = arith.constant 0 : i32
    %c0_i32_1 = arith.constant 0 : i32
    return %c0_i32, %c0_i32_0 : i32, i32
  }
  func.func @transform_5(%arg0: i32) -> (i32, i32) {
    %c0_i32 = arith.constant 0 : i32
    %c0_i32_0 = arith.constant 0 : i32
    %c0_i32_1 = arith.constant 0 : i32
    return %c0_i32, %c0_i32_0 : i32, i32
  }
  func.func @transform_6(%arg0: i32) -> (i32, i32) {
    %c0_i32 = arith.constant 0 : i32
    %c0_i32_0 = arith.constant 0 : i32
    %c0_i32_1 = arith.constant 0 : i32
    return %c0_i32, %c0_i32_0 : i32, i32
  }
  func.func @transform_7(%arg0: i32) -> (i32, i32) {
    %c0_i32 = arith.constant 0 : i32
    %c0_i32_0 = arith.constant 0 : i32
    %c0_i32_1 = arith.constant 0 : i32
    return %c0_i32, %c0_i32_0 : i32, i32
  }
  func.func @transform_8(%arg0: i32) -> (i32, i32) {
    %c0_i32 = arith.constant 0 : i32
    %c0_i32_0 = arith.constant 0 : i32
    %c0_i32_1 = arith.constant 0 : i32
    return %c0_i32, %c0_i32_0 : i32, i32
  }
  func.func @transform_9(%arg0: i32) -> (i32, i32) {
    %c0_i32 = arith.constant 0 : i32
    %c0_i32_0 = arith.constant 0 : i32
    %c0_i32_1 = arith.constant 0 : i32
    return %c0_i32, %c0_i32_0 : i32, i32
  }
  func.func @transform_10(%arg0: i32) -> (i32, i32, i32) {
    %c0_i32 = arith.constant 0 : i32
    %c0_i32_0 = arith.constant 0 : i32
    %c0_i32_1 = arith.constant 0 : i32
    return %arg0, %c0_i32, %c0_i32_0 : i32, i32, i32
  }
}

</mosaic_0001>

<bundles_post_ra>
// kernel: decoder_forward.1
= control target key start
LH: loop header
LB: loop body
LE: loop exit
PB: predicated region body
PF: predicated region fallthrough
CT: control target
= control target key end

     0   :  { %s5716_s13 = smov 0   ;;  %s8863_s0 = inlined_call_operand.vmem [shape: f32[2,8,128], index: 0, kind: input, shape index: {}]   ;;  %s8864_s1 = inlined_call_operand.vmem [shape: bf16[8,216], index: 1, kind: input, shape index: {}]   ;;  %s8865_s2 = inlined_call_operand.vmem [shape: f32[8,1], index: 2, kind: input, shape index: {}]   ;;  %s8866_s3 = inlined_call_operand.vmem [shape: f32[27,128], index: 3, kind: input, shape index: {}]   ;;  %s8867_s4 = inlined_call_operand.vmem [shape: bf16[128,1024], index: 4, kind: input, shape index: {}]   ;;  %s8868_s5 = inlined_call_operand.vmem [shape: bf16[8,216], index: 5, kind: input, shape index: {}]   ;;  %s8869_s6 = inlined_call_operand.vmem [shape: f32[8,1], index: 6, kind: input, shape index: {}]   ;;  %s8870_s7 = inlined_call_operand.vmem [shape: f32[27,1024], index: 7, kind: input, shape index: {}]   ;;  %s8871_s8 = inlined_call_operand.vmem [shape: f32[32,1024], index: 8, kind: input, shape index: {}]   ;;  %s8872_s9 = inlined_call_operand.vmem [shape: bf16[1024,256], index: 9, kind: input, shape index: {}]   ;;  %s8873_s10 = inlined_call_operand.vmem [shape: f32[2,32,256], index: 10, kind: output, shape index: {}]  }
   0x1 LB: > { %s5028_s14 = sadd.s32 4294967295, %s5617_s13   ;;  %p5032_p0 = scmp.ge.s32.totalorder %s5617_s13, 1  ;;  %s5617_s13 = sphi %s5716_s13, %s20_s13  }
   0x2   : > { %p311_p1 = scmp.lt.s32.totalorder %s5617_s13, 3 }
   0x4   : > { %p312_p2 = pnand %p5032_p0, %p311_p1 }
   0x6   : > { %315 = sbr.rel (%p312_p2) target bundleno = 1545 (0x609), region = 60 }
   0xd   : > { %p348_p3 = scmp.lt.s32.totalorder %s5028_s14, 1  ;;  %v5619_v0 = vmov 0   ;;  %s5620_s19 = smov 19   ;;  %v5764_v2 = vld [vmem:[%s8864_s1] sm:$0xff]  ;;  %vm8977_vm0 = vcmask 719872   ;;  %v706_v5 = vld [vmem:[%s8867_s4 + $0x10] sm:$0xff] }
   0xe   : > { %662 = vmatprep.subr.bf16.mxu1 %v5619_v0  ;;  %5397 = vset.pattern.permute.xlu0 %v5619_v0  ;;  %s5621_s20 = smov 21   ;;  %s5622_s21 = smov 17   ;;  %v5064_v3 = vcombine.high %v5764_v2, %v5764_v2  ;;  %v642_v4 = vld [vmem:[%s8865_s2] sm:$0xff]  ;;  %v710_v6 = vld [vmem:[%s8867_s4 + $0x30] sm:$0xff]  ;;  %v5044_v60 = vld [vmem:[%s8866_s3 + $0x8] ss:$0 sm:$0xff] }
   0xf   : > { %s9492_s14 = smov (!%p348_p3, %s5028_s14), 1  ;;  %1202 = vmatprep.mubr.bf16.mxu0 %v5619_v0  ;;  %s5623_s22 = smov 20   ;;  %v5071_v7 = vcombine.high %v706_v5, %v710_v6  ;;  %v5070_v8 = vcombine.low %v706_v5, %v710_v6  ;;  %v714_v9 = vld [vmem:[%s8867_s4 + $0x50] sm:$0xff]  ;;  %v5036_v35 = vld [vmem:[%s8866_s3] ss:$0 sm:$0xff]  ;;  %vm8984_vm1 = vcmask 1043456  }
  0x10   : > { %s5033_s15 = sshll.u32 %s9492_s14, 3  ;;  %s5624_s23 = smov 16   ;;  %5065 = vmatprep.mubr.msk.bf16.mxu1 %vm8977_vm0, %v5064_v3  ;;  %v718_v10 = vld [vmem:[%s8867_s4 + $0x70] sm:$0xff]  ;;  %v5037_v36 = vld [vmem:[%s8866_s3 + $0x1] ss:$0 sm:$0xff] }
  0x11   : > { %s351_s18 = scalar_lea.vmem %s8863_s0, %s5033_s15  ;;  %s5625_s24 = smov 15   ;;  %1170 = vmatprep.subr.bf16.mxu0 %v5071_v7  ;;  %v5079_v11 = vcombine.high %v714_v9, %v718_v10  ;;  %v5078_v12 = vcombine.low %v714_v9, %v718_v10  ;;  %v722_v13 = vld [vmem:[%s8867_s4 + $0x90] sm:$0xff]  ;;  %v5038_v37 = vld [vmem:[%s8866_s3 + $0x2] ss:$0 sm:$0xff]  ;;  %v5039_v38 = vld [vmem:[%s8866_s3 + $0x3] ss:$0 sm:$0xff] }
  0x12   : > { %v5733_v1 = vld [vmem:[%s351_s18] sm:$0xff]  ;;  %s5626_s25 = smov 13   ;;  %s5627_s26 = smov 12   ;;  %1171 = vmatpush1.bf16.msra.mxu0 %v5070_v8  ;;  %v726_v14 = vld [vmem:[%s8867_s4 + $0xb0] sm:$0xff]  ;;  %v5045_v61 = vld [vmem:[%s8866_s3 + $0x9] ss:$0 sm:$0xff] }
  0x13   : > { %377 = vrot.lane.b32.xlu1 %v5733_v1, %s5620_s19  ;;  %359 = vrot.lane.b32.xlu0 %v5733_v1, %s5621_s20  ;;  %s5628_s27 = smov 11   ;;  %s5629_s28 = smov 5   ;;  %v5087_v15 = vcombine.high %v722_v13, %v726_v14  ;;  %v5086_v16 = vcombine.low %v722_v13, %v726_v14  ;;  %v730_v17 = vld [vmem:[%s8867_s4 + $0xd0] sm:$0xff]  ;;  %v5040_v43 = vld [vmem:[%s8866_s3 + $0x4] ss:$0 sm:$0xff] }
  0x14   : > { %s5630_s29 = smov 4   ;;  %s5631_s30 = smov 3   ;;  %1172 = vmatprep.subr.bf16.mxu0 %v5079_v11  ;;  %v734_v18 = vld [vmem:[%s8867_s4 + $0xf0] sm:$0xff]  ;;  %v5041_v44 = vld [vmem:[%s8866_s3 + $0x5] ss:$0 sm:$0xff] }
  0x15   : > { %s8886_s11 = smov 1   ;;  %s8874_s12 = smov 127   ;;  %v5095_v19 = vcombine.high %v730_v17, %v734_v18  ;;  %v5094_v20 = vcombine.low %v730_v17, %v734_v18  ;;  %v738_v21 = vld [vmem:[%s8867_s4 + $0x110] sm:$0xff]  ;;  %v5042_v52 = vld [vmem:[%s8866_s3 + $0x6] ss:$0 sm:$0xff] }
  0x16   : > { %s5634_s15 = smov 125   ;;  %s5635_s16 = smov 124   ;;  %1173 = vmatpush1.bf16.msra.mxu0 %v5078_v12  ;;  %v742_v22 = vld [vmem:[%s8867_s4 + $0x130] sm:$0xff]  ;;  %v5043_v53 = vld [vmem:[%s8866_s3 + $0x7] ss:$0 sm:$0xff] }
  0x17   : > { %386 = vrot.lane.b32.xlu1 %v5733_v1, %s5622_s21  ;;  %368 = vrot.lane.b32.xlu0 %v5733_v1, %s5623_s22  ;;  %s5636_s17 = smov 123   ;;  %s5637_s18 = smov 117   ;;  %v5103_v23 = vcombine.high %v738_v21, %v742_v22  ;;  %v5102_v24 = vcombine.low %v738_v21, %v742_v22  ;;  %v746_v25 = vld [vmem:[%s8867_s4 + $0x150] sm:$0xff]  ;;  %v5046_v6 = vld [vmem:[%s8866_s3 + $0xa] ss:$0 sm:$0xff] }
  0x18   : > { %s5638_s19 = smov 116   ;;  %s5639_s20 = smov 115   ;;  %1174 = vmatprep.subr.bf16.mxu0 %v5087_v15  ;;  %v750_v26 = vld [vmem:[%s8867_s4 + $0x170] sm:$0xff]  ;;  %v5047_v7 = vld [vmem:[%s8866_s3 + $0xb] ss:$0 sm:$0xff] }
  0x19   : > { %s5640_s21 = smov 113   ;;  %s5641_s22 = smov 112   ;;  %v5111_v27 = vcombine.high %v746_v25, %v750_v26  ;;  %v5110_v28 = vcombine.low %v746_v25, %v750_v26  ;;  %v754_v29 = vld [vmem:[%s8867_s4 + $0x190] sm:$0xff]  ;;  %v5048_v13 = vld [vmem:[%s8866_s3 + $0xc] ss:$0 sm:$0xff] }
  0x1a   : > { %1175 = vmatpush1.bf16.msra.mxu0 %v5086_v16  ;;  %v758_v30 = vld [vmem:[%s8867_s4 + $0x1b0] sm:$0xff]  ;;  %v5049_v14 = vld [vmem:[%s8866_s3 + $0xd] ss:$0 sm:$0xff]  ;;  %v5051_v21 = vld [vmem:[%s8866_s3 + $0xf] ss:$0 sm:$0xff] }
  0x1b   : > { %395 = vrot.lane.b32.xlu0 %v5733_v1, %s5624_s23  ;;  %404 = vrot.lane.b32.xlu1 %v5733_v1, %s5625_s24  ;;  %s5642_s23 = smov 111   ;;  %s5643_s24 = smov 109   ;;  %v5119_v31 = vcombine.high %v754_v29, %v758_v30  ;;  %v5118_v32 = vcombine.low %v754_v29, %v758_v30 }
  0x1c   : > { %1176 = vmatprep.subr.bf16.mxu0 %v5095_v19  ;;  %v481_v19 = vmul.f32 %v5049_v14, %v5733_v1  ;;  %v724_v14 = vld [vmem:[%s8867_s4 + $0xa0] sm:$0xff] }
  0x1e   : > { %1177 = vmatpush1.bf16.msra.mxu0 %v5094_v20  ;;  %v5050_v20 = vld [vmem:[%s8866_s3 + $0xe] ss:$0 sm:$0xff] }
  0x1f   : > { %413 = vrot.lane.b32.xlu0 %v5733_v1, %s5626_s25  ;;  %422 = vrot.lane.b32.xlu1 %v5733_v1, %s5627_s26  ;;  %s8884_s25 = smov 72   ;;  %s8880_s26 = smov 73  }
  0x20   : > { %1178 = vmatprep.subr.bf16.mxu0 %v5103_v23 }
  0x22   : > { %1179 = vmatpush1.bf16.msra.mxu0 %v5102_v24 }
  0x23   : > { %431 = vrot.lane.b32.xlu0 %v5733_v1, %s5628_s27  ;;  %440 = vrot.lane.b32.xlu1 %v5733_v1, %s5629_s28  ;;  %s5644_s27 = smov 108   ;;  %s5645_s28 = smov 107  }
  0x24   : > { %1180 = vmatprep.subr.bf16.mxu0 %v5111_v27  ;;  %v5053_v27 = vld [vmem:[%s8866_s3 + $0x11] ss:$0 sm:$0xff] }
  0x26   : > { %1181 = vmatpush1.bf16.msra.mxu0 %v5110_v28 }
  0x27   : > { %449 = vrot.lane.b32.xlu0 %v5733_v1, %s5630_s29  ;;  %458 = vrot.lane.b32.xlu1 %v5733_v1, %s5631_s30  ;;  %s8961_s29 = smov 63   ;;  %s8914_s30 = smov 64  }
  0x28   : > { %1182 = vmatprep.subr.bf16.mxu0 %v5119_v31 }
  0x2a   : > { %1183 = vmatpush1.bf16.msra.mxu0 %v5118_v32 }
  0x2b   : > { %467 = vrot.lane.b32.xlu0 %v5733_v1, %s8886_s11  ;;  %483 = vrot.lane.b32.xlu1 %v5733_v1, %s8874_s12 }
  0x2f   : > { %492 = vrot.lane.b32.xlu0 %v5733_v1, %s5634_s15  ;;  %501 = vrot.lane.b32.xlu1 %v5733_v1, %s5635_s16  ;;  %s8960_s15 = smov 56   ;;  %s8959_s16 = smov 57  }
  0x33   : > { %510 = vrot.lane.b32.xlu0 %v5733_v1, %s5636_s17  ;;  %519 = vrot.lane.b32.xlu1 %v5733_v1, %s5637_s18  ;;  %s8903_s17 = smov 9   ;;  %s8935_s18 = smov 55  }
  0x37   : > { %528 = vrot.lane.b32.xlu0 %v5733_v1, %s5638_s19  ;;  %537 = vrot.lane.b32.xlu1 %v5733_v1, %s5639_s20  ;;  %s8901_s19 = smov 8   ;;  %s8898_s20 = smov 7  }
  0x3b   : > { %546 = vrot.lane.b32.xlu0 %v5733_v1, %s5640_s21  ;;  %555 = vrot.lane.b32.xlu1 %v5733_v1, %s5641_s22  ;;  %s8882_s21 = smov 120   ;;  %s8876_s22 = smov 121  }
  0x3f   : > { %564 = vrot.lane.b32.xlu0 %v5733_v1, %s5642_s23  ;;  %573 = vrot.lane.b32.xlu1 %v5733_v1, %s5643_s24  ;;  %s8896_s23 = smov 119   ;;  %s9109_s24 = smov 120  }
  0x43   : > { %582 = vrot.lane.b32.xlu0 %v5733_v1, %s5644_s27  ;;  %591 = vrot.lane.b32.xlu1 %v5733_v1, %s5645_s28  ;;  %v5052_v1 = vld [vmem:[%s8866_s3 + $0x10] ss:$0 sm:$0xff]  ;;  %s8965_s27 = smov 65   ;;  %s8878_s28 = smov 71  }
  0x47   : > { %645 = vperm.xlu0 %5397, %v642_v4  }
  0x85   : > { %v378_v33 = vpop.permute.xlu1 %377  ;;  %v360_v34 = vpop.permute.xlu0 %359 }
  0x86   : > { %v366_v41 = vmul.f32 %v5036_v35, %v360_v34  ;;  %v384_v45 = vmul.f32 %v5038_v37, %v378_v33  ;;  %v5054_v33 = vld [vmem:[%s8866_s3 + $0x12] ss:$0 sm:$0xff]  ;;  %v5055_v34 = vld [vmem:[%s8866_s3 + $0x13] ss:$0 sm:$0xff] }
  0x89   : > { %v387_v39 = vpop.permute.xlu1 %386  ;;  %v369_v40 = vpop.permute.xlu0 %368 }
  0x8a   : > { %v375_v42 = vmul.f32 %v5037_v36, %v369_v40  ;;  %v393_v46 = vmul.f32 %v5039_v38, %v387_v39  ;;  %v5056_v40 = vld [vmem:[%s8866_s3 + $0x14] ss:$0 sm:$0xff] }
  0x8c   : > { %v628_v47 = vpack.c.bf16 %v375_v42, %v366_v41  ;;  %v629_v54 = vpack.c.bf16 %v393_v46, %v384_v45  ;;  %v5057_v41 = vld [vmem:[%s8866_s3 + $0x15] ss:$0 sm:$0xff] }
  0x8d   : > { %v396_v48 = vpop.permute.xlu0 %395  ;;  %v405_v49 = vpop.permute.xlu1 %404 }
  0x8e   : > { %663 = vmatpush1.bf16.msra.mxu1 %v628_v47  ;;  %v402_v50 = vmul.f32 %v5040_v43, %v396_v48  ;;  %v411_v51 = vmul.f32 %v5041_v44, %v405_v49  ;;  %v5058_v47 = vld [vmem:[%s8866_s3 + $0x16] ss:$0 sm:$0xff]  ;;  %v5059_v48 = vld [vmem:[%s8866_s3 + $0x17] ss:$0 sm:$0xff] }
  0x8f   : > { %664 = vmatprep.subr.bf16.mxu1 %v5619_v0 }
  0x90   : > { %v630_v57 = vpack.c.bf16 %v411_v51, %v402_v50 }
  0x91   : > { %v414_v55 = vpop.permute.xlu0 %413  ;;  %v423_v56 = vpop.permute.xlu1 %422 }
  0x92   : > { %665 = vmatpush1.bf16.msra.mxu1 %v629_v54  ;;  %v420_v58 = vmul.f32 %v5042_v52, %v414_v55  ;;  %v429_v59 = vmul.f32 %v5043_v53, %v423_v56  ;;  %v5060_v54 = vld [vmem:[%s8866_s3 + $0x18] ss:$0 sm:$0xff]  ;;  %v5061_v55 = vld [vmem:[%s8866_s3 + $0x19] ss:$0 sm:$0xff]  ;;  %v5062_v56 = vld [vmem:[%s8866_s3 + $0x1a] ss:$0 sm:$0xff] }
  0x93   : > { %666 = vmatprep.subr.bf16.mxu1 %v5619_v0 }
  0x94   : > { %v631_v3 = vpack.c.bf16 %v429_v59, %v420_v58 }
  0x95   : > { %v432_v62 = vpop.permute.xlu0 %431  ;;  %v441_v63 = vpop.permute.xlu1 %440 }
  0x96   : > { %667 = vmatpush1.bf16.msra.mxu1 %v630_v57  ;;  %v438_v4 = vmul.f32 %v5044_v60, %v432_v62  ;;  %v447_v5 = vmul.f32 %v5045_v61, %v441_v63 }
  0x97   : > { %668 = vmatprep.subr.bf16.mxu1 %v5619_v0 }
  0x98   : > { %v632_v10 = vpack.c.bf16 %v447_v5, %v438_v4  ;;  %v704_v4 = vld [vmem:[%s8867_s4] sm:$0xff] }
  0x99   : > { %v450_v8 = vpop.permute.xlu0 %449  ;;  %v459_v9 = vpop.permute.xlu1 %458  ;;  %v708_v5 = vld [vmem:[%s8867_s4 + $0x20] sm:$0xff] }
  0x9a   : > { %669 = vmatpush1.bf16.msra.mxu1 %v631_v3  ;;  %v456_v11 = vmul.f32 %v5046_v6, %v450_v8  ;;  %v465_v12 = vmul.f32 %v5047_v7, %v459_v9  ;;  %v5067_v7 = vcombine.high %v704_v4, %v708_v5  ;;  %v712_v8 = vld [vmem:[%s8867_s4 + $0x40] sm:$0xff] }
  0x9b   : > { %670 = vmatprep.subr.bf16.mxu1 %v5619_v0  ;;  %v716_v9 = vld [vmem:[%s8867_s4 + $0x60] sm:$0xff] }
  0x9c   : > { %v633_v17 = vpack.c.bf16 %v465_v12, %v456_v11  ;;  %v5066_v11 = vcombine.low %v704_v4, %v708_v5  ;;  %v5075_v12 = vcombine.high %v712_v8, %v716_v9 }
  0x9d   : > { %v468_v15 = vpop.permute.xlu0 %467  ;;  %v484_v16 = vpop.permute.xlu1 %483 }
  0x9e   : > { %671 = vmatpush1.bf16.msra.mxu1 %v632_v10  ;;  %v474_v18 = vmul.f32 %v5048_v13, %v468_v15  ;;  %v490_v25 = vmul.f32 %v5050_v20, %v484_v16  ;;  %v5063_v10 = vcombine.low %v5764_v2, %v5764_v2  ;;  %v720_v13 = vld [vmem:[%s8867_s4 + $0x80] sm:$0xff]  ;;  %v5074_v15 = vcombine.low %v712_v8, %v716_v9 }
  0x9f   : > { %672 = vmatprep.subr.bf16.mxu1 %v5619_v0  ;;  %v5083_v16 = vcombine.high %v720_v13, %v724_v14  ;;  %v728_v2 = vld [vmem:[%s8867_s4 + $0xc0] sm:$0xff] }
  0xa0   : > { %v634_v24 = vpack.c.bf16 %v481_v19, %v474_v18  ;;  %v5082_v18 = vcombine.low %v720_v13, %v724_v14  ;;  %v736_v20 = vld [vmem:[%s8867_s4 + $0x100] sm:$0xff]  ;;  %v761_v14 = vld [vmem:[%s8867_s4 + $0x1c8] sm:$0xff] }
  0xa1   : > { %v493_v22 = vpop.permute.xlu0 %492  ;;  %v502_v23 = vpop.permute.xlu1 %501 }
  0xa2   : > { %673 = vmatpush1.bf16.msra.mxu1 %v633_v17  ;;  %v499_v26 = vmul.f32 %v5051_v21, %v493_v22  ;;  %v508_v31 = vmul.f32 %v5052_v1, %v502_v23  ;;  %v732_v17 = vld [vmem:[%s8867_s4 + $0xe0] sm:$0xff] }
  0xa3   : > { %674 = vmatprep.subr.bf16.mxu1 %v5619_v0  ;;  %v5091_v19 = vcombine.high %v728_v2, %v732_v17  ;;  %v740_v21 = vld [vmem:[%s8867_s4 + $0x120] sm:$0xff]  ;;  %v5090_v22 = vcombine.low %v728_v2, %v732_v17  ;;  %v707_v17 = vld [vmem:[%s8867_s4 + $0x18] sm:$0xff] }
  0xa4   : > { %v635_v30 = vpack.c.bf16 %v499_v26, %v490_v25  ;;  %v5099_v23 = vcombine.high %v736_v20, %v740_v21  ;;  %v748_v25 = vld [vmem:[%s8867_s4 + $0x160] sm:$0xff]  ;;  %v5098_v26 = vcombine.low %v736_v20, %v740_v21  ;;  %v715_v21 = vld [vmem:[%s8867_s4 + $0x58] sm:$0xff] }
  0xa5   : > { %v511_v28 = vpop.permute.xlu0 %510  ;;  %v520_v29 = vpop.permute.xlu1 %519 }
  0xa6   : > { %675 = vmatpush1.bf16.msra.mxu1 %v634_v24  ;;  %v517_v32 = vmul.f32 %v5053_v27, %v511_v28  ;;  %v526_v38 = vmul.f32 %v5054_v33, %v520_v29  ;;  %v744_v24 = vld [vmem:[%s8867_s4 + $0x140] sm:$0xff] }
  0xa7   : > { %676 = vmatprep.subr.bf16.mxu1 %v5619_v0  ;;  %v5107_v1 = vcombine.high %v744_v24, %v748_v25  ;;  %v752_v27 = vld [vmem:[%s8867_s4 + $0x180] sm:$0xff]  ;;  %v5106_v29 = vcombine.low %v744_v24, %v748_v25  ;;  %v723_v25 = vld [vmem:[%s8867_s4 + $0x98] sm:$0xff] }
  0xa8   : > { %v636_v37 = vpack.c.bf16 %v517_v32, %v508_v31  ;;  %v756_v28 = vld [vmem:[%s8867_s4 + $0x1a0] sm:$0xff] }
  0xa9   : > { %v529_v35 = vpop.permute.xlu0 %528  ;;  %v538_v36 = vpop.permute.xlu1 %537  ;;  %v5114_v31 = vcombine.low %v752_v27, %v756_v28  ;;  %v760_v32 = vld [vmem:[%s8867_s4 + $0x1c0] sm:$0xff] }
  0xaa   : > { %677 = vmatpush1.bf16.msra.mxu1 %v635_v30  ;;  %v535_v39 = vmul.f32 %v5055_v34, %v529_v35  ;;  %v544_v45 = vmul.f32 %v5056_v40, %v538_v36  ;;  %v5115_v30 = vcombine.high %v752_v27, %v756_v28  ;;  %v764_v33 = vld [vmem:[%s8867_s4 + $0x1e0] sm:$0xff]  ;;  %v762_v35 = vld [vmem:[%s8867_s4 + $0x1d0] sm:$0xff]  ;;  %v705_v40 = vld [vmem:[%s8867_s4 + $0x8] sm:$0xff] }
  0xab   : > { %678 = vmatprep.subr.bf16.mxu1 %v5619_v0  ;;  %v5123_v34 = vcombine.high %v760_v32, %v764_v33  ;;  %v766_v36 = vld [vmem:[%s8867_s4 + $0x1f0] sm:$0xff]  ;;  %v731_v28 = vld [vmem:[%s8867_s4 + $0xd8] sm:$0xff] }
  0xac   : > { %v637_v44 = vpack.c.bf16 %v535_v39, %v526_v38  ;;  %v5127_v38 = vcombine.high %v762_v35, %v766_v36  ;;  %v5126_v39 = vcombine.low %v762_v35, %v766_v36  ;;  %v747_v35 = vld [vmem:[%s8867_s4 + $0x158] sm:$0xff] }
  0xad   : > { %v547_v42 = vpop.permute.xlu0 %546  ;;  %v556_v43 = vpop.permute.xlu1 %555  ;;  %v751_v36 = vld [vmem:[%s8867_s4 + $0x178] sm:$0xff] }
  0xae   : > { %679 = vmatpush1.bf16.msra.mxu1 %v636_v37  ;;  %v553_v46 = vmul.f32 %v5057_v41, %v547_v42  ;;  %v562_v52 = vmul.f32 %v5058_v47, %v556_v43  ;;  %v5122_v37 = vcombine.low %v760_v32, %v764_v33  ;;  %1184 = vmatprep.subr.bf16.mxu0 %v5127_v38  ;;  %v709_v41 = vld [vmem:[%s8867_s4 + $0x28] sm:$0xff]  ;;  %v739_v32 = vld [vmem:[%s8867_s4 + $0x118] sm:$0xff] }
  0xaf   : > { %680 = vmatprep.subr.bf16.mxu1 %v5619_v0  ;;  %1185 = vmatpush1.bf16.msra.mxu0 %v5126_v39  ;;  %v5069_v42 = vcombine.high %v705_v40, %v709_v41  ;;  %v5068_v43 = vcombine.low %v705_v40, %v709_v41  ;;  %v5113_v38 = vcombine.high %v747_v35, %v751_v36  ;;  %v755_v39 = vld [vmem:[%s8867_s4 + $0x198] sm:$0xff] }
  0xb0   : > { %v638_v51 = vpack.c.bf16 %v553_v46, %v544_v45  ;;  %v759_v40 = vld [vmem:[%s8867_s4 + $0x1b8] sm:$0xff]  ;;  %v5112_v41 = vcombine.low %v747_v35, %v751_v36 }
  0xb1   : > { %v565_v49 = vpop.permute.xlu0 %564  ;;  %v574_v50 = vpop.permute.xlu1 %573 }
  0xb2   : > { %681 = vmatpush1.bf16.msra.mxu1 %v637_v44  ;;  %v571_v53 = vmul.f32 %v5059_v48, %v565_v49  ;;  %v580_v60 = vmul.f32 %v5060_v54, %v574_v50  ;;  %v713_v49 = vld [vmem:[%s8867_s4 + $0x48] sm:$0xff] }
  0xb3   : > { %682 = vmatprep.subr.bf16.mxu1 %v5619_v0  ;;  %v717_v50 = vld [vmem:[%s8867_s4 + $0x68] sm:$0xff] }
  0xb4   : > { %v639_v59 = vpack.c.bf16 %v571_v53, %v562_v52  ;;  %v5077_v54 = vcombine.high %v713_v49, %v717_v50 }
  0xb5   : > { %v583_v57 = vpop.permute.xlu0 %582  ;;  %v592_v58 = vpop.permute.xlu1 %591 }
  0xb6   : > { %683 = vmatpush1.bf16.msra.mxu1 %v638_v51  ;;  %v589_v61 = vmul.f32 %v5061_v55, %v583_v57  ;;  %v598_v62 = vmul.f32 %v5062_v56, %v592_v58  ;;  %v721_v55 = vld [vmem:[%s8867_s4 + $0x88] sm:$0xff]  ;;  %v5076_v57 = vcombine.low %v713_v49, %v717_v50 }
  0xb7   : > { %684 = vmatprep.subr.bf16.mxu1 %v5619_v0  ;;  %v725_v56 = vld [vmem:[%s8867_s4 + $0xa8] sm:$0xff] }
  0xb8   : > { %v640_v63 = vpack.c.bf16 %v589_v61, %v580_v60  ;;  %v641_v3 = vpack.c.bf16 %v598_v62, %v598_v62  ;;  %v5085_v58 = vcombine.high %v721_v55, %v725_v56  ;;  %v733_v60 = vld [vmem:[%s8867_s4 + $0xe8] sm:$0xff]  ;;  %v5084_v61 = vcombine.low %v721_v55, %v725_v56 }
  0xb9   : > { %v5154_v50 = vld [vmem:[%s8870_s7 + $0x45] ss:$8 sm:$0xf] }
  0xba   : > { %685 = vmatpush1.bf16.msra.mxu1 %v639_v59  ;;  %v660_v6 = vsel %vm8984_vm1, %v641_v3, 0  ;;  %v729_v59 = vld [vmem:[%s8867_s4 + $0xc8] sm:$0xff] }
  0xbb   : > { %686 = vmatprep.subr.bf16.mxu1 %v5619_v0  ;;  %v5093_v62 = vcombine.high %v729_v59, %v733_v60  ;;  %v741_v3 = vld [vmem:[%s8867_s4 + $0x128] sm:$0xff]  ;;  %v5092_v4 = vcombine.low %v729_v59, %v733_v60 }
  0xbe   : > { %687 = vmatpush1.bf16.msra.mxu1 %v640_v63  ;;  %v737_v63 = vld [vmem:[%s8867_s4 + $0x108] sm:$0xff] }
  0xbf   : > { %688 = vmatprep.subr.bf16.mxu1 %v5619_v0  ;;  %v5101_v5 = vcombine.high %v737_v63, %v741_v3  ;;  %v5100_v8 = vcombine.low %v737_v63, %v741_v3 }
  0xc2   : > { %689 = vmatpush1.bf16.msra.mxu1 %v660_v6  ;;  %v745_v6 = vld [vmem:[%s8867_s4 + $0x148] sm:$0xff] }
  0xc3   : > { %1088 = vmatprep.subr.bf16.mxu1 %v5067_v7  ;;  %v749_v7 = vld [vmem:[%s8867_s4 + $0x168] sm:$0xff] }
  0xc4   : > { %v5109_v9 = vcombine.high %v745_v6, %v749_v7 }
  0xc5   : > { %695 = vmatmul.mubr.bf16.vlgmr.msra.gmra.mrb[0].mxu1 %v5063_v10  ;;  %v753_v10 = vld [vmem:[%s8867_s4 + $0x188] sm:$0xff] }
  0xc6   : > { %1089 = vmatpush1.bf16.msra.mxu1 %v5066_v11  ;;  %1120 = vmatprep.mubr.bf16.mxu1 %v5619_v0  ;;  %v646_v44 = vpop.permute.xlu0 %645  ;;  %v757_v11 = vld [vmem:[%s8867_s4 + $0x1a8] sm:$0xff] }
  0xc7   : > { %1090 = vmatprep.subr.bf16.mxu1 %v5075_v12  ;;  %v5108_v12 = vcombine.low %v745_v6, %v749_v7  ;;  %v5117_v13 = vcombine.high %v753_v10, %v757_v11 }
  0xca   : > { %1091 = vmatpush1.bf16.msra.mxu1 %v5074_v15  ;;  %v765_v15 = vld [vmem:[%s8867_s4 + $0x1e8] sm:$0xff] }
  0xcb   : > { %1092 = vmatprep.subr.bf16.mxu1 %v5083_v16  ;;  %v5116_v16 = vcombine.low %v753_v10, %v757_v11  ;;  %v5125_v2 = vcombine.high %v761_v14, %v765_v15 }
  0xce   : > { %1093 = vmatpush1.bf16.msra.mxu1 %v5082_v18  ;;  %v711_v18 = vld [vmem:[%s8867_s4 + $0x38] sm:$0xff] }
  0xcf   : > { %1094 = vmatprep.subr.bf16.mxu1 %v5091_v19  ;;  %v5124_v19 = vcombine.low %v761_v14, %v765_v15  ;;  %v5073_v20 = vcombine.high %v707_v17, %v711_v18 }
  0xd2   : > { %1095 = vmatpush1.bf16.msra.mxu1 %v5090_v22  ;;  %v719_v22 = vld [vmem:[%s8867_s4 + $0x78] sm:$0xff] }
  0xd3   : > { %1096 = vmatprep.subr.bf16.mxu1 %v5099_v23  ;;  %v5072_v23 = vcombine.low %v707_v17, %v711_v18  ;;  %v5081_v24 = vcombine.high %v715_v21, %v719_v22 }
  0xd6   : > { %1097 = vmatpush1.bf16.msra.mxu1 %v5098_v26  ;;  %v727_v26 = vld [vmem:[%s8867_s4 + $0xb8] sm:$0xff] }
  0xd7   : > { %1098 = vmatprep.subr.bf16.mxu1 %v5107_v1  ;;  %v5080_v1 = vcombine.low %v715_v21, %v719_v22  ;;  %v5089_v27 = vcombine.high %v723_v25, %v727_v26 }
  0xda   : > { %1099 = vmatpush1.bf16.msra.mxu1 %v5106_v29  ;;  %v735_v29 = vld [vmem:[%s8867_s4 + $0xf8] sm:$0xff] }
  0xdb   : > { %1100 = vmatprep.subr.bf16.mxu1 %v5115_v30  ;;  %v5088_v30 = vcombine.low %v723_v25, %v727_v26  ;;  %v5096_v33 = vcombine.low %v731_v28, %v735_v29 }
  0xde   : > { %1101 = vmatpush1.bf16.msra.mxu1 %v5114_v31  ;;  %v5097_v31 = vcombine.high %v731_v28, %v735_v29 }
  0xdf   : > { %1102 = vmatprep.subr.bf16.mxu1 %v5123_v34 }
  0xe2   : > { %1103 = vmatpush1.bf16.msra.mxu1 %v5122_v37 }
  0xe3   : > { %1129 = vmatprep.subr.bf16.mxu1 %v5069_v42  ;;  %v5121_v42 = vcombine.high %v755_v39, %v759_v40 }
 0x198   : > { %v696_v45 = vpop.f32.mrb[0].mxu1 }
 0x199   : > { %v697_v46 = vadd.f32 %v696_v45, %v646_v44  ;;  %v698_v47 = vpop.f32.mrb[1].mxu1  ;;  %v767_v44 = vld [vmem:[%s8867_s4 + $0x1f8] sm:$0xff]  ;;  %v5120_v45 = vcombine.low %v755_v39, %v759_v40 }
 0x19a   : > { %v699_v48 = vpop.f32.mrb[2].mxu1  ;;  %v5164_v39 = vld [vmem:[%s8870_s7 + $0x82] ss:$8 sm:$0xf] }
 0x19b   : > { %v702_v51 = vmax.f32 %v697_v46, 0.0  ;;  %v700_v52 = vpop.f32.mrb[3].mxu1  ;;  %v1268_v48 = vlaneseq  ;;  %v5165_v40 = vld [vmem:[%s8870_s7 + $0x82] ss:$8 sm:$0xf0] }
 0x19d   : > { %v5981_v53 = vpack.c.bf16 %v702_v51, %v702_v51  ;;  %v6074_v49 = vshrl.u32 %v1268_v48, 7  ;;  %v5155_v51 = vld [vmem:[%s8870_s7 + $0x45] ss:$8 sm:$0xf0] }
 0x19f   : > { %1121 = vmatmul.mubr.bf16.vlgmr.msra.gmra.mrb[4].mxu1 %v5981_v53  ;;  %1203 = vmatmul.mubr.bf16.vlgmr.msra.gmra.mrb[0].mxu0 %v5981_v53  ;;  %v6083_v52 = vsub.s32 4, %v6074_v49  ;;  %v6088_v55 = vsub.s32 5, %v6074_v49  ;;  %v6173_v10 = vsub.s32 6, %v6074_v49  ;;  %v6176_v11 = vsub.s32 7, %v6074_v49 }
 0x1a0   : > { %1130 = vmatpush1.bf16.msra.mxu1 %v5068_v43  ;;  %1161 = vmatprep.mubr.bf16.mxu1 %v5619_v0  ;;  %v763_v43 = vld [vmem:[%s8867_s4 + $0x1d8] sm:$0xff] }
 0x1a1   : > { %1131 = vmatprep.subr.bf16.mxu1 %v5077_v54  ;;  %v5129_v46 = vcombine.high %v763_v43, %v767_v44  ;;  %v5128_v47 = vcombine.low %v763_v43, %v767_v44  ;;  %9069 = vst [vmem:[#allocation4_spill] sm:$0xff] %v6083_v52  ;;  %v6085_v54 = vor.u32 %v5155_v51, %v5154_v50  ;;  %9071 = vst [vmem:[#allocation6_spill] sm:$0xff] %v6088_v55  ;;  %v5166_v43 = vld [vmem:[%s8870_s7 + $0x83] ss:$8 sm:$0xf] }
 0x1a2   : > { %9076 = vst [vmem:[#allocation11_spill] sm:$0xff] %v6173_v10  ;;  %9077 = vst [vmem:[#allocation12_spill] sm:$0xff] %v6176_v11  ;;  %v5167_v44 = vld [vmem:[%s8870_s7 + $0x83] ss:$8 sm:$0xf0]  ;;  %v6365_v51 = vor.u32 %v5165_v40, %v5164_v39 }
 0x1a3   : > { %9070 = vst [vmem:[#allocation5_spill] sm:$0xff] %v6085_v54  ;;  %v2399_v56 = vrot.slane %v6085_v54, %v6088_v55 }
 0x1a4   : > { %1132 = vmatpush1.bf16.msra.mxu1 %v5076_v57  ;;  %9101 = vst [vmem:[#allocation36_spill] sm:$0xff] %v6365_v51 }
 0x1a5   : > { %1133 = vmatprep.subr.bf16.mxu1 %v5085_v58 }
 0x1a8   : > { %1134 = vmatpush1.bf16.msra.mxu1 %v5084_v61 }
 0x1a9   : > { %1135 = vmatprep.subr.bf16.mxu1 %v5093_v62 }
 0x1ac   : > { %1136 = vmatpush1.bf16.msra.mxu1 %v5092_v4 }
 0x1ad   : > { %1137 = vmatprep.subr.bf16.mxu1 %v5101_v5 }
 0x1b0   : > { %1138 = vmatpush1.bf16.msra.mxu1 %v5100_v8 }
 0x1b1   : > { %1139 = vmatprep.subr.bf16.mxu1 %v5109_v9 }
 0x1b4   : > { %1140 = vmatpush1.bf16.msra.mxu1 %v5108_v12  ;;  %v2403_v12 = vrot.slane %v6085_v54, %v6173_v10 }
 0x1b5   : > { %1141 = vmatprep.subr.bf16.mxu1 %v5117_v13  ;;  %v2407_v13 = vrot.slane %v6085_v54, %v6176_v11 }
 0x1b8   : > { %1142 = vmatpush1.bf16.msra.mxu1 %v5116_v16 }
 0x1b9   : > { %1143 = vmatprep.subr.bf16.mxu1 %v5125_v2 }
 0x1bc   : > { %1144 = vmatpush1.bf16.msra.mxu1 %v5124_v19 }
 0x1bd   : > { %1211 = vmatprep.subr.bf16.mxu1 %v5073_v20 }
 0x1bf   : > { %1162 = vmatmul.mubr.bf16.vlgmr.msra.gmra.mrb[8].mxu1 %v5981_v53 }
 0x1c0   : > { %1212 = vmatpush1.bf16.msra.mxu1 %v5072_v23  ;;  %1243 = vmatprep.mubr.bf16.mxu1 %v5619_v0  ;;  %v743_v0 = vld [vmem:[%s8867_s4 + $0x138] sm:$0xff] }
 0x1c1   : > { %1213 = vmatprep.subr.bf16.mxu1 %v5081_v24  ;;  %v5105_v34 = vcombine.high %v739_v32, %v743_v0  ;;  %v5104_v37 = vcombine.low %v739_v32, %v743_v0 }
 0x1c4   : > { %1214 = vmatpush1.bf16.msra.mxu1 %v5080_v1 }
 0x1c5   : > { %1215 = vmatprep.subr.bf16.mxu1 %v5089_v27 }
 0x1c8   : > { %1216 = vmatpush1.bf16.msra.mxu1 %v5088_v30 }
 0x1c9   : > { %1217 = vmatprep.subr.bf16.mxu1 %v5097_v31 }
 0x1cc   : > { %1218 = vmatpush1.bf16.msra.mxu1 %v5096_v33 }
 0x1cd   : > { %1219 = vmatprep.subr.bf16.mxu1 %v5105_v34 }
 0x1d0   : > { %1220 = vmatpush1.bf16.msra.mxu1 %v5104_v37  ;;  %v1279_v37 = vld [vmem:[%s8870_s7] ss:$8 sm:$0xf] }
 0x1d1   : > { %1221 = vmatprep.subr.bf16.mxu1 %v5113_v38  ;;  %v1280_v38 = vld [vmem:[%s8870_s7] ss:$8 sm:$0xf0] }
 0x1d2   : > { %v6359_v50 = vor.u32 %v1280_v38, %v1279_v37 }
 0x1d4   : > { %1222 = vmatpush1.bf16.msra.mxu1 %v5112_v41  ;;  %v5130_v41 = vld [vmem:[%s8870_s7 + $0x1] ss:$8 sm:$0xf] }
 0x1d5   : > { %1223 = vmatprep.subr.bf16.mxu1 %v5121_v42  ;;  %v5131_v42 = vld [vmem:[%s8870_s7 + $0x1] ss:$8 sm:$0xf0] }
 0x1d8   : > { %1224 = vmatpush1.bf16.msra.mxu1 %v5120_v45 }
 0x1d9   : > { %1225 = vmatprep.subr.bf16.mxu1 %v5129_v46 }
 0x1dc   : > { %1226 = vmatpush1.bf16.msra.mxu1 %v5128_v47  ;;  %v6357_v47 = vand.u32 127, %v1268_v48  ;;  %v6378_v48 = vsub.s32 0, %v6074_v49 }
 0x1de   : > { %vm1270_vm2 = vcmp.lt.s32.totalorder %v6357_v47, 73  ;;  %9103 = vst [vmem:[#allocation38_spill] sm:$0xff] %v6378_v48  ;;  %vm1355_vm3 = vcmp.lt.s32.totalorder %v6357_v47, 72  ;;  %vm9026_vm4 = vcmp.lt.s32.totalorder %v6357_v47, 71  ;;  %vm1527_vm5 = vcmp.lt.s32.totalorder %v6357_v47, 65 }
 0x1df   : > { %1244 = vmatmul.mubr.bf16.vlgmr.msra.gmra.mrb[12].mxu1 %v5981_v53  ;;  %v2395_v53 = vrot.slane %v6085_v54, %v6083_v52  ;;  %vm1613_vm6 = vcmp.lt.s32.totalorder %v6357_v47, 64  ;;  %vm1699_vm7 = vcmp.lt.s32.totalorder %v6357_v47, 63  ;;  %vm1785_vm8 = vcmp.lt.s32.totalorder %v6357_v47, 57 }
 0x1e0   : > { %vm1871_vm9 = vcmp.lt.s32.totalorder %v6357_v47, 56  ;;  %vm1957_vm10 = vcmp.lt.s32.totalorder %v6357_v47, 55  ;;  %vm2043_vm11 = vcmp.lt.s32.totalorder %v6357_v47, 9  ;;  %vm2129_vm12 = vcmp.lt.s32.totalorder %v6357_v47, 8 }
 0x1e1   : > { %vm2215_vm13 = vcmp.lt.s32.totalorder %v6357_v47, 7  ;;  %vm8996_vm14 = vcmp.lt.s32.totalorder %v6357_v47, 1  ;;  %vm2448_vm15 = vcmp.lt.s32.totalorder %v6357_v47, 127  ;;  %vm9046_vm1 = vcmp.lt.s32.totalorder %v6357_v47, 119 }
 0x272   : > { %v6094_v57 = vpop.f32.mrb[4].mxu1  ;;  %v6096_v58 = vpop.f32.mrb[0].mxu0 }
 0x273   : > { %9072 = vst [vmem:[#allocation7_spill] sm:$0xff] %v6094_v57  ;;  %v6098_v59 = vpop.f32.mrb[1].mxu0  ;;  %1339 = vrot.lane.b32.xlu1 %v6094_v57, %s8884_s25  ;;  %1252 = vrot.lane.b32.xlu0 %v6094_v57, %s8880_s26  ;;  %v6104_v60 = vpop.f32.mrb[5].mxu1  ;;  %v6107_v61 = vmul.f32 %v2395_v53, %v6096_v58  ;;  %v6367_v53 = vor.u32 %v5131_v42, %v5130_v41 }
 0x274   : > { %9073 = vst [vmem:[#allocation8_spill] sm:$0xff] %v6104_v60  ;;  %v1126_v62 = vpop.f32.mrb[6].mxu1  ;;  %v1208_v63 = vpop.f32.mrb[2].mxu0  ;;  %v6110_v3 = vmul.f32 %v2399_v56, %v6098_v59  ;;  %v6369_v56 = vor.u32 %v5167_v44, %v5166_v43 }
 0x275   : > { %9074 = vst [vmem:[#allocation9_spill] sm:$0xff] %v6107_v61  ;;  %v1127_v4 = vpop.f32.mrb[7].mxu1  ;;  %v1209_v5 = vpop.f32.mrb[3].mxu0  ;;  %v6372_v62 = vsub.s32 1, %v6074_v49 }
 0x276   : > { %9075 = vst [vmem:[#allocation10_spill] sm:$0xff] %v6110_v3  ;;  %v5168_v61 = vld [vmem:[%s8870_s7 + $0x84] ss:$8 sm:$0xf] }
 0x277   : > { %1511 = vrot.lane.b32.xlu1 %v6094_v57, %s8965_s27  ;;  %1425 = vrot.lane.b32.xlu0 %v6094_v57, %s8878_s28  ;;  %v1290_v5 = vrot.slane %v6359_v50, %v6372_v62  ;;  %v2788_v3 = vrot.slane %v6365_v51, %v6372_v62 }
 0x27b   : > { %1683 = vrot.lane.b32.xlu1 %v6094_v57, %s8961_s29  ;;  %1597 = vrot.lane.b32.xlu0 %v6094_v57, %s8914_s30 }
 0x27f   : > { %1855 = vrot.lane.b32.xlu1 %v6094_v57, %s8960_s15  ;;  %1769 = vrot.lane.b32.xlu0 %v6094_v57, %s8959_s16 }
 0x283   : > { %2027 = vrot.lane.b32.xlu1 %v6094_v57, %s8903_s17  ;;  %1941 = vrot.lane.b32.xlu0 %v6094_v57, %s8935_s18 }
 0x287   : > { %2113 = vrot.lane.b32.xlu1 %v6094_v57, %s8901_s19  ;;  %2199 = vrot.lane.b32.xlu0 %v6094_v57, %s8898_s20 }
 0x28b   : > { %2285 = vrot.lane.b32.xlu1 %v6094_v57, %s8886_s11  ;;  %2440 = vrot.lane.b32.xlu0 %v6096_v58, %s8874_s12 }
 0x28f   : > { %2612 = vrot.lane.b32.xlu1 %v6096_v58, %s8882_s21  ;;  %2526 = vrot.lane.b32.xlu0 %v6096_v58, %s8876_s22 }
 0x292   : > { %v6140_v6 = vpop.f32.mrb[8].mxu1 }
 0x293   : > { %v6142_v7 = vpop.f32.mrb[9].mxu1  ;;  %2698 = vrot.lane.b32.xlu1 %v6096_v58, %s8896_s23  ;;  %1347 = vrot.lane.b32.xlu0 %v6096_v58, %s8884_s25 }
 0x294   : > { %v1167_v8 = vpop.f32.mrb[10].mxu1 }
 0x295   : > { %v1168_v9 = vpop.f32.mrb[11].mxu1  ;;  %v2784_v8 = vrot.slane %v6365_v51, %v6378_v48 }
 0x296   : > { %v1376_v9 = vrot.slane %v6367_v53, %v6372_v62 }
 0x297   : > { %1260 = vrot.lane.b32.xlu1 %v6096_v58, %s8880_s26  ;;  %2518 = vrot.lane.b32.xlu0 %v6094_v57, %s8876_s22 }
 0x29b   : > { %2432 = vrot.lane.b32.xlu1 %v6094_v57, %s8874_s12  ;;  %1519 = vrot.lane.b32.xlu0 %v6096_v58, %s8965_s27 }
 0x29f   : > { %1433 = vrot.lane.b32.xlu1 %v6096_v58, %s8878_s28  ;;  %1254 = vrot.lane.b32.xlu0 %v6104_v60, %s8880_s26 }
 0x2a3   : > { %1341 = vrot.lane.b32.xlu1 %v6104_v60, %s8884_s25  ;;  %1427 = vrot.lane.b32.xlu0 %v6104_v60, %s8878_s28 }
 0x2a7   : > { %1513 = vrot.lane.b32.xlu1 %v6104_v60, %s8965_s27  ;;  %1599 = vrot.lane.b32.xlu0 %v6104_v60, %s8914_s30 }
 0x2ab   : > { %1685 = vrot.lane.b32.xlu1 %v6104_v60, %s8961_s29  ;;  %1771 = vrot.lane.b32.xlu0 %v6104_v60, %s8959_s16 }
 0x2af   : > { %1857 = vrot.lane.b32.xlu1 %v6104_v60, %s8960_s15  ;;  %1943 = vrot.lane.b32.xlu0 %v6104_v60, %s8935_s18 }
 0x2b2   : > { %v6186_v14 = vpop.f32.mrb[12].mxu1 }
 0x2b3   : > { %v6188_v15 = vpop.f32.mrb[13].mxu1  ;;  %2029 = vrot.lane.b32.xlu1 %v6104_v60, %s8903_s17  ;;  %2115 = vrot.lane.b32.xlu0 %v6104_v60, %s8901_s19  ;;  %v6195_v16 = vmul.f32 %v2403_v12, %v6186_v14  ;;  %v2845_v12 = vrot.slane %v6369_v56, %v6378_v48 }
 0x2b4   : > { %9078 = vst [vmem:[#allocation13_spill] sm:$0xff] %v6188_v15  ;;  %v1249_v2 = vpop.f32.mrb[14].mxu1  ;;  %v6198_v17 = vmul.f32 %v2407_v13, %v6188_v15 }
 0x2b5   : > { %9079 = vst [vmem:[#allocation14_spill] sm:$0xff] %v6195_v16  ;;  %v1250_v18 = vpop.f32.mrb[15].mxu1 }
 0x2b6   : > { %9080 = vst [vmem:[#allocation15_spill] sm:$0xff] %v6198_v17 }
 0x2b7   : > { %2201 = vrot.lane.b32.xlu1 %v6104_v60, %s8898_s20  ;;  %2287 = vrot.lane.b32.xlu0 %v6104_v60, %s8886_s11 }
 0x2bb   : > { %2434 = vrot.lane.b32.xlu1 %v6104_v60, %s8874_s12  ;;  %2520 = vrot.lane.b32.xlu0 %v6104_v60, %s8876_s22 }
 0x2bf   : > { %1343 = vrot.lane.b32.xlu0 %v6140_v6, %s8884_s25  ;;  %1256 = vrot.lane.b32.xlu1 %v6140_v6, %s8880_s26 }
 0x2c3   : > { %1429 = vrot.lane.b32.xlu0 %v6140_v6, %s8878_s28  ;;  %2436 = vrot.lane.b32.xlu1 %v6140_v6, %s8874_s12 }
 0x2c7   : > { %1515 = vrot.lane.b32.xlu0 %v6140_v6, %s8965_s27  ;;  %2608 = vrot.lane.b32.xlu1 %v6140_v6, %s8882_s21 }
 0x2cb   : > { %1601 = vrot.lane.b32.xlu0 %v6140_v6, %s8914_s30  ;;  %1258 = vrot.lane.b32.xlu1 %v6142_v7, %s8880_s26 }
 0x2cf   : > { %1687 = vrot.lane.b32.xlu0 %v6140_v6, %s8961_s29  ;;  %1345 = vrot.lane.b32.xlu1 %v6142_v7, %s8884_s25 }
 0x2d3   : > { %1773 = vrot.lane.b32.xlu0 %v6140_v6, %s8959_s16  ;;  %1431 = vrot.lane.b32.xlu1 %v6142_v7, %s8878_s28 }
 0x2d7   : > { %1859 = vrot.lane.b32.xlu0 %v6140_v6, %s8960_s15  ;;  %1517 = vrot.lane.b32.xlu1 %v6142_v7, %s8965_s27 }
 0x2db   : > { %1945 = vrot.lane.b32.xlu0 %v6140_v6, %s8935_s18  ;;  %1603 = vrot.lane.b32.xlu1 %v6142_v7, %s8914_s30 }
 0x2df   : > { %2031 = vrot.lane.b32.xlu0 %v6140_v6, %s8903_s17  ;;  %1689 = vrot.lane.b32.xlu1 %v6142_v7, %s8961_s29 }
 0x2e3   : > { %2117 = vrot.lane.b32.xlu0 %v6140_v6, %s8901_s19  ;;  %1775 = vrot.lane.b32.xlu1 %v6142_v7, %s8959_s16 }
 0x2e5   : > { %v6248_v19 = vpop.permute.xlu1 %1339  ;;  %v6250_v20 = vpop.permute.xlu0 %1252 }
 0x2e6   : > { %9081 = vst [vmem:[#allocation16_spill] sm:$0xff] %v6248_v19  ;;  %9082 = vst [vmem:[#allocation17_spill] sm:$0xff] %v6250_v20 }
 0x2e7   : > { %2203 = vrot.lane.b32.xlu0 %v6140_v6, %s8898_s20  ;;  %1861 = vrot.lane.b32.xlu1 %v6142_v7, %s8960_s15 }
 0x2e9   : > { %v6256_v21 = vpop.permute.xlu1 %1511  ;;  %v6258_v22 = vpop.permute.xlu0 %1425 }
 0x2eb   : > { %2289 = vrot.lane.b32.xlu0 %v6140_v6, %s8886_s11  ;;  %1947 = vrot.lane.b32.xlu1 %v6142_v7, %s8935_s18 }
 0x2ed   : > { %v6264_v23 = vpop.permute.xlu1 %1683  ;;  %v6266_v24 = vpop.permute.xlu0 %1597 }
 0x2ee   : > { %9083 = vst [vmem:[#allocation18_spill] sm:$0xff] %v6264_v23  ;;  %9084 = vst [vmem:[#allocation19_spill] sm:$0xff] %v6266_v24 }
 0x2ef   : > { %2522 = vrot.lane.b32.xlu0 %v6140_v6, %s8876_s22  ;;  %2033 = vrot.lane.b32.xlu1 %v6142_v7, %s8903_s17 }
 0x2f1   : > { %v6272_v25 = vpop.permute.xlu1 %1855  ;;  %v6274_v26 = vpop.permute.xlu0 %1769 }
 0x2f2   : > { %9085 = vst [vmem:[#allocation20_spill] sm:$0xff] %v6272_v25  ;;  %9086 = vst [vmem:[#allocation21_spill] sm:$0xff] %v6274_v26 }
 0x2f3   : > { %2694 = vrot.lane.b32.xlu0 %v6140_v6, %s8896_s23  ;;  %2119 = vrot.lane.b32.xlu1 %v6142_v7, %s8901_s19 }
 0x2f5   : > { %v6280_v1 = vpop.permute.xlu1 %2027  ;;  %v6282_v27 = vpop.permute.xlu0 %1941 }
 0x2f6   : > { %9087 = vst [vmem:[#allocation22_spill] sm:$0xff] %v6280_v1  ;;  %9088 = vst [vmem:[#allocation23_spill] sm:$0xff] %v6282_v27  ;;  %v6554_v1 = vsub.s32 2, %v6074_v49 }
 0x2f7   : > { %2610 = vrot.lane.b32.xlu0 %v6142_v7, %s8882_s21  ;;  %2205 = vrot.lane.b32.xlu1 %v6142_v7, %s8898_s20  ;;  %s9117_s21 = smov 71  }
 0x2f9   : > { %v6288_v28 = vpop.permute.xlu1 %2113  ;;  %v6290_v29 = vpop.permute.xlu0 %2199 }
 0x2fa   : > { %9089 = vst [vmem:[#allocation24_spill] sm:$0xff] %v6288_v28  ;;  %9090 = vst [vmem:[#allocation25_spill] sm:$0xff] %v6290_v29 }
 0x2fb   : > { %2696 = vrot.lane.b32.xlu0 %v6142_v7, %s8896_s23  ;;  %2291 = vrot.lane.b32.xlu1 %v6142_v7, %s8886_s11  ;;  %s9120_s11 = smov 72  }
 0x2fd   : > { %v6296_v30 = vpop.permute.xlu1 %2285  ;;  %v6298_v31 = vpop.permute.xlu0 %2440 }
 0x2fe   : > { %9091 = vst [vmem:[#allocation26_spill] sm:$0xff] %v6296_v30  ;;  %9092 = vst [vmem:[#allocation27_spill] sm:$0xff] %v6298_v31 }
 0x2ff   : > { %2438 = vrot.lane.b32.xlu1 %v6142_v7, %s8874_s12  ;;  %1266 = vrot.lane.b32.xlu0 %v6188_v15, %s8880_s26  ;;  %s9107_s12 = smov 1   ;;  %s9114_s26 = smov 73  }
 0x301   : > { %v6304_v32 = vpop.permute.xlu1 %2612  ;;  %v6306_v0 = vpop.permute.xlu0 %2526 }
 0x302   : > { %9093 = vst [vmem:[#allocation28_spill] sm:$0xff] %v6304_v32  ;;  %9094 = vst [vmem:[#allocation29_spill] sm:$0xff] %v6306_v0  ;;  %v5176_v32 = vld [vmem:[%s8870_s7 + $0xc0] ss:$8 sm:$0xf] }
 0x303   : > { %2524 = vrot.lane.b32.xlu1 %v6142_v7, %s8876_s22  ;;  %1439 = vrot.lane.b32.xlu0 %v6188_v15, %s8878_s28  ;;  %s9137_s22 = smov 7  }
 0x305   : > { %v6312_v33 = vpop.permute.xlu1 %2698  ;;  %v6314_v34 = vpop.permute.xlu0 %1347 }
 0x306   : > { %9095 = vst [vmem:[#allocation30_spill] sm:$0xff] %v6312_v33  ;;  %9096 = vst [vmem:[#allocation31_spill] sm:$0xff] %v6314_v34  ;;  %v1380_v34 = vrot.slane %v6367_v53, %v6554_v1 }
 0x307   : > { %1353 = vrot.lane.b32.xlu1 %v6188_v15, %s8884_s25  ;;  %1611 = vrot.lane.b32.xlu0 %v6188_v15, %s8914_s30 }
 0x309   : > { %v6320_v35 = vpop.permute.xlu1 %1260  ;;  %v6322_v36 = vpop.permute.xlu0 %2518 }
 0x30a   : > { %9097 = vst [vmem:[#allocation32_spill] sm:$0xff] %v6320_v35  ;;  %9098 = vst [vmem:[#allocation33_spill] sm:$0xff] %v6322_v36  ;;  %v5177_v35 = vld [vmem:[%s8870_s7 + $0xc0] ss:$8 sm:$0xf0] }
 0x30b   : > { %1525 = vrot.lane.b32.xlu1 %v6188_v15, %s8965_s27  ;;  %1783 = vrot.lane.b32.xlu0 %v6188_v15, %s8959_s16 }
 0x30d   : > { %v6352_v45 = vpop.permute.xlu1 %2432  ;;  %v6354_v46 = vpop.permute.xlu0 %1519 }
 0x30e   : > { %9099 = vst [vmem:[#allocation34_spill] sm:$0xff] %v6352_v45  ;;  %9100 = vst [vmem:[#allocation35_spill] sm:$0xff] %v6354_v46  ;;  %v6563_v46 = vsub.s32 3, %v6074_v49  ;;  %v5134_v49 = vld [vmem:[%s8870_s7 + $0x3] ss:$8 sm:$0xf] }
 0x30f   : > { %1697 = vrot.lane.b32.xlu1 %v6188_v15, %s8961_s29  ;;  %1955 = vrot.lane.b32.xlu0 %v6188_v15, %s8935_s18 }
 0x311   : > { %v6374_v63 = vpop.permute.xlu1 %1433  ;;  %v1255_v4 = vpop.permute.xlu0 %1254 }
 0x312   : > { %9102 = vst [vmem:[#allocation37_spill] sm:$0xff] %v6374_v63  ;;  %v1277_v13 = vsel %vm1270_vm2, %v6250_v20, %v1255_v4 }
 0x313   : > { %1869 = vrot.lane.b32.xlu1 %v6188_v15, %s8960_s15  ;;  %2692 = vrot.lane.b32.xlu0 %v6104_v60, %s8896_s23  ;;  %v1324_v38 = vmul.f32 %v1290_v5, %v1277_v13  ;;  %v6401_v39 = vmul.f32 %v2784_v8, %v1277_v13 }
 0x315   : > { %v1342_v2 = vpop.permute.xlu1 %1341  ;;  %v6396_v18 = vpop.permute.xlu0 %1427  ;;  %9104 = vst [vmem:[#allocation39_spill] sm:$0xff] %v6401_v39  ;;  %v5170_v39 = vld [vmem:[%s8870_s7 + $0x85] ss:$8 sm:$0xf] }
 0x316   : > { %v1362_v37 = vsel %vm1355_vm3, %v6248_v19, %v1342_v2 }
 0x317   : > { %v1410_v40 = vmul.f32 %v1376_v9, %v1362_v37  ;;  %v6403_v41 = vmul.f32 %v2845_v12, %v1362_v37  ;;  %2041 = vrot.lane.b32.xlu1 %v6188_v15, %s8903_s17  ;;  %2213 = vrot.lane.b32.xlu0 %v6188_v15, %s8898_s20  ;;  %s9144_s20 = smov 127  }
 0x319   : > { %9105 = vst [vmem:[#allocation40_spill] sm:$0xff] %v6403_v41  ;;  %v6411_v43 = vpop.permute.xlu1 %1513  ;;  %v6413_v44 = vpop.permute.xlu0 %1599  ;;  %v3543_v17 = vpack.c.bf16 %v1410_v40, %v1324_v38  ;;  %v3325_v40 = vld [vmem:[%s8868_s5] sm:$0xff] }
 0x31a   : > { %9106 = vst [vmem:[#allocation41_spill] sm:$0xff] %v6413_v44  ;;  %v6450_v42 = vcombine.high %v3325_v40, %v3325_v40  ;;  %v2849_v40 = vrot.slane %v6369_v56, %v6372_v62  ;;  %v5171_v41 = vld [vmem:[%s8870_s7 + $0x85] ss:$8 sm:$0xf0] }
 0x31b   : > { %3687 = vmatprep.subr.bf16.mxu0 %v3543_v17  ;;  %2127 = vrot.lane.b32.xlu1 %v6188_v15, %s8901_s19  ;;  %s9162_s19 = smov 119  }
 0x31c   : > { %2299 = vrot.lane.b32.xlu0 %v6188_v15, %s9107_s12  ;;  %9113 = vst [vmem:[#allocation46_spill] sm:$0xff] %v6450_v42  ;;  %5187 = vmatprep.mubr.msk.bf16.mxu1 %vm8977_vm0, %v6450_v42  ;;  %v5135_v15 = vld [vmem:[%s8870_s7 + $0x3] ss:$8 sm:$0xf0] }
 0x31d   : > { %v6419_v5 = vpop.permute.xlu1 %1685  ;;  %v6421_v8 = vpop.permute.xlu0 %1771  ;;  %5185 = vmatprep.mubr.msk.bf16.mxu0 %vm8977_vm0, %v6450_v42  ;;  %v5169_v42 = vld [vmem:[%s8870_s7 + $0x84] ss:$8 sm:$0xf0]  ;;  %vm2620_vm0 = vcmp.lt.s32.totalorder %v6357_v47, 120 }
 0x31e   : > { %9108 = vst [vmem:[#allocation42_spill] sm:$0xff] %v6421_v8 }
 0x31f   : > { %2606 = vrot.lane.b32.xlu1 %v6104_v60, %s9109_s24  ;;  %v6499_v60 = vor.u32 %v5169_v42, %v5168_v61 }
 0x320   : > { %2690 = vrot.lane.b32.xlu0 %v6094_v57, %s8896_s23  ;;  %s9191_s23 = smov 57  }
 0x321   : > { %v6427_v9 = vpop.permute.xlu1 %1857  ;;  %v6429_v12 = vpop.permute.xlu0 %1943 }
 0x322   : > { %9110 = vst [vmem:[#allocation43_spill] sm:$0xff] %v6427_v9 }
 0x323   : > { %2604 = vrot.lane.b32.xlu1 %v6094_v57, %s9109_s24 }
 0x324   : > { %1691 = vrot.lane.b32.xlu0 %v6096_v58, %s8961_s29 }
 0x325   : > { %v6435_v17 = vpop.permute.xlu1 %2029  ;;  %v6437_v13 = vpop.permute.xlu0 %2115 }
 0x326   : > { %9111 = vst [vmem:[#allocation44_spill] sm:$0xff] %v6437_v13 }
 0x327   : > { %1605 = vrot.lane.b32.xlu1 %v6096_v58, %s8914_s30 }
 0x328   : > { %1863 = vrot.lane.b32.xlu0 %v6096_v58, %s8960_s15 }
 0x329   : > { %v6443_v37 = vpop.permute.xlu1 %2201  ;;  %v6445_v38 = vpop.permute.xlu0 %2287 }
 0x32a   : > { %9112 = vst [vmem:[#allocation45_spill] sm:$0xff] %v6445_v38 }
 0x32b   : > { %1777 = vrot.lane.b32.xlu1 %v6096_v58, %s8959_s16 }
 0x32c   : > { %1262 = vrot.lane.b32.xlu0 %v6098_v59, %s9114_s26 }
 0x32d   : > { %v6456_v16 = vpop.permute.xlu1 %2434  ;;  %v6458_v10 = vpop.permute.xlu0 %2520 }
 0x32e   : > { %9115 = vst [vmem:[#allocation47_spill] sm:$0xff] %v6456_v16  ;;  %9116 = vst [vmem:[#allocation48_spill] sm:$0xff] %v6458_v10  ;;  %v6501_v10 = vor.u32 %v5171_v41, %v5170_v39  ;;  %v5172_v39 = vld [vmem:[%s8870_s7 + $0x86] ss:$8 sm:$0xf] }
 0x32f   : > { %1949 = vrot.lane.b32.xlu1 %v6096_v58, %s8935_s18  ;;  %v5173_v41 = vld [vmem:[%s8870_s7 + $0x86] ss:$8 sm:$0xf0] }
 0x330   : > { %1435 = vrot.lane.b32.xlu0 %v6098_v59, %s9117_s21  ;;  %v6560_v63 = vor.u32 %v5173_v41, %v5172_v39  ;;  %v1294_v39 = vrot.slane %v6359_v50, %v6554_v1 }
 0x331   : > { %v6478_v52 = vpop.permute.xlu0 %1343  ;;  %v1257_v55 = vpop.permute.xlu1 %1256 }
 0x332   : > { %v1361_v57 = vsel %vm1355_vm3, %v1342_v2, %v6478_v52  ;;  %v1276_v36 = vsel %vm1270_vm2, %v1255_v4, %v1257_v55 }
 0x333   : > { %v6491_v45 = vmul.f32 %v2849_v40, %v1361_v57  ;;  %v6493_v16 = vmul.f32 %v2788_v3, %v1276_v36  ;;  %1349 = vrot.lane.b32.xlu1 %v6098_v59, %s9120_s11  ;;  %v2910_v3 = vrot.slane %v6499_v60, %v6372_v62  ;;  %v2971_v40 = vrot.slane %v6501_v10, %v6372_v62 }
 0x334   : > { %1607 = vrot.lane.b32.xlu0 %v6098_v59, %s8914_s30  ;;  %s9128_s30 = smov 9   ;;  %v1411_v26 = vmul.f32 %v1380_v34, %v1361_v57  ;;  %v1325_v20 = vmul.f32 %v1294_v39, %v1276_v36  ;;  %v6650_v36 = vor.u32 %v5135_v15, %v5134_v49  ;;  %v6652_v39 = vor.u32 %v5177_v35, %v5176_v32  ;;  %v5137_v49 = vld [vmem:[%s8870_s7 + $0x4] ss:$8 sm:$0xf0] }
 0x335   : > { %9118 = vst [vmem:[#allocation49_spill] sm:$0xff] %v6491_v45  ;;  %9119 = vst [vmem:[#allocation50_spill] sm:$0xff] %v6493_v16  ;;  %v6503_v30 = vpop.permute.xlu0 %1429  ;;  %v6505_v2 = vpop.permute.xlu1 %2436  ;;  %v5174_v16 = vld [vmem:[%s8870_s7 + $0x87] ss:$8 sm:$0xf] }
 0x336   : > { %9121 = vst [vmem:[#allocation51_spill] sm:$0xff] %v6505_v2  ;;  %v6519_v61 = vsel %vm9026_vm4, %v6396_v18, %v6503_v30  ;;  %v5175_v45 = vld [vmem:[%s8870_s7 + $0x87] ss:$8 sm:$0xf0]  ;;  %v1552_v32 = vrot.slane %v6650_v36, %v6554_v1  ;;  %v3154_v35 = vrot.slane %v6652_v39, %v6372_v62 }
 0x337   : > { %1521 = vrot.lane.b32.xlu1 %v6098_v59, %s8965_s27  ;;  %v6548_v29 = vmul.f32 %v2910_v3, %v6519_v61  ;;  %v6565_v19 = vor.u32 %v5175_v45, %v5174_v16  ;;  %v3032_v16 = vrot.slane %v6560_v63, %v6372_v62  ;;  %v1298_v45 = vrot.slane %v6359_v50, %v6563_v46  ;;  %s9177_s27 = smov 56  }
 0x338   : > { %1779 = vrot.lane.b32.xlu0 %v6098_v59, %s8959_s16 }
 0x339   : > { %v6531_v42 = vpop.permute.xlu0 %1515  ;;  %v6533_v4 = vpop.permute.xlu1 %2608  ;;  %9123 = vst [vmem:[#allocation53_spill] sm:$0xff] %v6548_v29  ;;  %9125 = vst [vmem:[#allocation55_spill] sm:$0xff] %v6565_v19  ;;  %v3093_v41 = vrot.slane %v6565_v19, %v6372_v62  ;;  %v5132_v29 = vld [vmem:[%s8870_s7 + $0x2] ss:$8 sm:$0xf] }
 0x33a   : > { %9122 = vst [vmem:[#allocation52_spill] sm:$0xff] %v6533_v4  ;;  %v6545_v28 = vsel %vm1527_vm5, %v6411_v43, %v6531_v42  ;;  %v1384_v4 = vrot.slane %v6367_v53, %v6563_v46 }
 0x33b   : > { %v6551_v27 = vmul.f32 %v2971_v40, %v6545_v28  ;;  %1693 = vrot.lane.b32.xlu1 %v6098_v59, %s8961_s29 }
 0x33c   : > { %1951 = vrot.lane.b32.xlu0 %v6098_v59, %s8935_s18  ;;  %s9133_s18 = smov 8  }
 0x33d   : > { %9124 = vst [vmem:[#allocation54_spill] sm:$0xff] %v6551_v27  ;;  %v6567_v3 = vpop.permute.xlu0 %1601  ;;  %v6569_v40 = vpop.permute.xlu1 %1258  ;;  %v5133_v27 = vld [vmem:[%s8870_s7 + $0x2] ss:$8 sm:$0xf0] }
 0x33e   : > { %9126 = vst [vmem:[#allocation56_spill] sm:$0xff] %v6569_v40  ;;  %v6603_v0 = vsel %vm1613_vm6, %v6413_v44, %v6567_v3  ;;  %v6608_v33 = vsel %vm1270_vm2, %v1257_v55, %v6569_v40  ;;  %v5178_v55 = vld [vmem:[%s8870_s7 + $0xc1] ss:$8 sm:$0xf] }
 0x33f   : > { %9127 = vst [vmem:[#allocation57_spill] sm:$0xff] %v6608_v33  ;;  %1865 = vrot.lane.b32.xlu1 %v6098_v59, %s8960_s15  ;;  %v5179_v40 = vld [vmem:[%s8870_s7 + $0xc1] ss:$8 sm:$0xf0]  ;;  %v6643_v44 = vmul.f32 %v3032_v16, %v6603_v0  ;;  %v1326_v23 = vmul.f32 %v1298_v45, %v6608_v33  ;;  %s9151_s15 = smov 121  }
 0x340   : > { %2037 = vrot.lane.b32.xlu0 %v6098_v59, %s9128_s30  ;;  %v6660_v16 = vor.u32 %v5179_v40, %v5178_v55  ;;  %v1556_v40 = vrot.slane %v6650_v36, %v6563_v46  ;;  %v5138_v55 = vld [vmem:[%s8870_s7 + $0x5] ss:$8 sm:$0xf] }
 0x341   : > { %v6620_v31 = vpop.permute.xlu0 %1687  ;;  %v6622_v2 = vpop.permute.xlu1 %1345  ;;  %9131 = vst [vmem:[#allocation60_spill] sm:$0xff] %v6643_v44  ;;  %v1583_v44 = vmul.f32 %v1552_v32, %v6545_v28 }
 0x342   : > { %9129 = vst [vmem:[#allocation58_spill] sm:$0xff] %v6622_v2  ;;  %v6634_v25 = vsel %vm1699_vm7, %v6419_v5, %v6620_v31  ;;  %v6640_v24 = vsel %vm1355_vm3, %v6478_v52, %v6622_v2  ;;  %v6658_v52 = vor.u32 %v5133_v27, %v5132_v29  ;;  %9134 = vst [vmem:[#allocation62_spill] sm:$0xff] %v6660_v16  ;;  %v5136_v27 = vld [vmem:[%s8870_s7 + $0x4] ss:$8 sm:$0xf] }
 0x343   : > { %9130 = vst [vmem:[#allocation59_spill] sm:$0xff] %v6640_v24  ;;  %v6647_v57 = vmul.f32 %v3093_v41, %v6634_v25  ;;  %v1412_v34 = vmul.f32 %v1384_v4, %v6640_v24  ;;  %2035 = vrot.lane.b32.xlu1 %v6096_v58, %s9128_s30  ;;  %v3544_v29 = vpack.c.bf16 %v1411_v26, %v1325_v20 }
 0x344   : > { %2123 = vrot.lane.b32.xlu0 %v6098_v59, %s9133_s18  ;;  %v1470_v4 = vrot.slane %v6658_v52, %v6563_v46 }
 0x345   : > { %9132 = vst [vmem:[#allocation61_spill] sm:$0xff] %v6647_v57  ;;  %v6662_v45 = vpop.permute.xlu0 %1773  ;;  %v6664_v41 = vpop.permute.xlu1 %1431  ;;  %v3545_v2 = vpack.c.bf16 %v1412_v34, %v1326_v23  ;;  %v3215_v23 = vrot.slane %v6660_v16, %v6372_v62  ;;  %v1466_v34 = vrot.slane %v6658_v52, %v6554_v1 }
 0x346   : > { %9135 = vst [vmem:[#allocation63_spill] sm:$0xff] %v6664_v41  ;;  %v6692_v20 = vsel %vm1785_vm8, %v6421_v8, %v6662_v45  ;;  %v6698_v26 = vsel %vm9026_vm4, %v6503_v30, %v6664_v41  ;;  %v6737_v8 = vor.u32 %v5137_v49, %v5136_v27  ;;  %v5141_v27 = vld [vmem:[%s8870_s7 + $0x6] ss:$8 sm:$0xf0] }
 0x347   : > { %3728 = vmatprep.subr.bf16.mxu1 %v3545_v2  ;;  %9136 = vst [vmem:[#allocation64_spill] sm:$0xff] %v6698_v26  ;;  %2121 = vrot.lane.b32.xlu1 %v6096_v58, %s9133_s18  ;;  %v5139_v2 = vld [vmem:[%s8870_s7 + $0x5] ss:$8 sm:$0xf0]  ;;  %v6730_v24 = vmul.f32 %v3154_v35, %v6692_v20  ;;  %v1498_v28 = vmul.f32 %v1470_v4, %v6698_v26 }
 0x348   : > { %2209 = vrot.lane.b32.xlu0 %v6098_v59, %s9137_s22  ;;  %3729 = vmatpush1.bf16.msra.mxu1 %v3544_v29  ;;  %v2387_v29 = vrot.slane %v6085_v54, %v6554_v1  ;;  %v5140_v35 = vld [vmem:[%s8870_s7 + $0x6] ss:$8 sm:$0xf]  ;;  %v1497_v4 = vmul.f32 %v1466_v34, %v6519_v61  ;;  %v5142_v61 = vld [vmem:[%s8870_s7 + $0x7] ss:$8 sm:$0xf] }
 0x349   : > { %v6710_v15 = vpop.permute.xlu0 %1859  ;;  %v6712_v30 = vpop.permute.xlu1 %1517  ;;  %9140 = vst [vmem:[#allocation67_spill] sm:$0xff] %v6730_v24  ;;  %v5144_v24 = vld [vmem:[%s8870_s7 + $0x40] ss:$8 sm:$0xf] }
 0x34a   : > { %9138 = vst [vmem:[#allocation65_spill] sm:$0xff] %v6712_v30  ;;  %v6719_v57 = vsel %vm1871_vm9, %v6427_v9, %v6710_v15  ;;  %v6725_v41 = vsel %vm1527_vm5, %v6531_v42, %v6712_v30  ;;  %v6739_v9 = vor.u32 %v5139_v2, %v5138_v55  ;;  %v2391_v42 = vrot.slane %v6085_v54, %v6563_v46 }
 0x34b   : > { %9139 = vst [vmem:[#allocation66_spill] sm:$0xff] %v6725_v41  ;;  %v6734_v32 = vmul.f32 %v3215_v23, %v6719_v57  ;;  %v1584_v33 = vmul.f32 %v1556_v40, %v6725_v41  ;;  %2207 = vrot.lane.b32.xlu1 %v6096_v58, %s9137_s22  ;;  %v1642_v54 = vrot.slane %v6737_v8, %v6563_v46  ;;  %v5151_v41 = vld [vmem:[%s8870_s7 + $0x43] ss:$8 sm:$0xf0] }
 0x34c   : > { %2295 = vrot.lane.b32.xlu0 %v6098_v59, %s9107_s12  ;;  %v1724_v2 = vrot.slane %v6739_v9, %v6554_v1  ;;  %v6765_v26 = vmul.f32 %v2387_v29, %v6140_v6  ;;  %v3552_v34 = vpack.c.bf16 %v1583_v44, %v1497_v4  ;;  %v1728_v55 = vrot.slane %v6739_v9, %v6563_v46  ;;  %v5145_v44 = vld [vmem:[%s8870_s7 + $0x40] ss:$8 sm:$0xf0] }
 0x34d   : > { %9141 = vst [vmem:[#allocation68_spill] sm:$0xff] %v6734_v32  ;;  %v6754_v23 = vpop.permute.xlu0 %1945  ;;  %v6756_v40 = vpop.permute.xlu1 %1603  ;;  %v3553_v49 = vpack.c.bf16 %v1584_v33, %v1498_v28  ;;  %v5143_v33 = vld [vmem:[%s8870_s7 + $0x7] ss:$8 sm:$0xf0]  ;;  %v3036_v28 = vrot.slane %v6560_v63, %v6554_v1  ;;  %v3097_v6 = vrot.slane %v6565_v19, %v6554_v1  ;;  %v6779_v29 = vor.u32 %v5141_v27, %v5140_v35 }
 0x34e   : > { %9142 = vst [vmem:[#allocation69_spill] sm:$0xff] %v6756_v40  ;;  %9143 = vst [vmem:[#allocation70_spill] sm:$0xff] %v6765_v26  ;;  %v1618_v4 = vsel %vm1613_vm6, %v6567_v3, %v6756_v40  ;;  %v6796_v35 = vmul.f32 %v2391_v42, %v6142_v7  ;;  %v5146_v3 = vld [vmem:[%s8870_s7 + $0x41] ss:$8 sm:$0xf]  ;;  %v1638_v7 = vrot.slane %v6737_v8, %v6554_v1 }
 0x34f   : > { %3730 = vmatprep.subr.bf16.mxu1 %v3553_v49  ;;  %2293 = vrot.lane.b32.xlu1 %v6096_v58, %s9107_s12  ;;  %v5147_v58 = vld [vmem:[%s8870_s7 + $0x41] ss:$8 sm:$0xf0]  ;;  %v6818_v32 = vor.u32 %v5143_v33, %v5142_v61  ;;  %v5150_v40 = vld [vmem:[%s8870_s7 + $0x43] ss:$8 sm:$0xf]  ;;  %v1755_v30 = vmul.f32 %v1724_v2, %v6634_v25  ;;  %v1670_v49 = vmul.f32 %v1642_v54, %v1618_v4 }
 0x350   : > { %2444 = vrot.lane.b32.xlu0 %v6186_v14, %s9144_s20  ;;  %9145 = vst [vmem:[#allocation71_spill] sm:$0xff] %v6796_v35  ;;  %3731 = vmatpush1.bf16.msra.mxu1 %v3552_v34  ;;  %v5180_v61 = vld [vmem:[%s8870_s7 + $0xc2] ss:$8 sm:$0xf]  ;;  %v6837_v26 = vmul.f32 %v3036_v28, %v1618_v4  ;;  %v6843_v2 = vor.u32 %v5145_v44, %v5144_v24 }
 0x351   : > { %v6812_v42 = vpop.permute.xlu0 %2031  ;;  %v6814_v27 = vpop.permute.xlu1 %1689  ;;  %9147 = vst [vmem:[#allocation73_spill] sm:$0xff] %v6818_v32  ;;  %v5181_v33 = vld [vmem:[%s8870_s7 + $0xc2] ss:$8 sm:$0xf0]  ;;  %v1814_v44 = vrot.slane %v6779_v29, %v6563_v46  ;;  %v1900_v25 = vrot.slane %v6818_v32, %v6563_v46 }
 0x352   : > { %9146 = vst [vmem:[#allocation72_spill] sm:$0xff] %v6814_v27  ;;  %v1704_v34 = vsel %vm1699_vm7, %v6620_v31, %v6814_v27  ;;  %9148 = vst [vmem:[#allocation74_spill] sm:$0xff] %v6837_v26  ;;  %v6845_v31 = vor.u32 %v5147_v58, %v5146_v3  ;;  %v5148_v27 = vld [vmem:[%s8870_s7 + $0x42] ss:$8 sm:$0xf] }
 0x353   : > { %v1756_v35 = vmul.f32 %v1728_v55, %v1704_v34  ;;  %v6839_v19 = vmul.f32 %v3097_v6, %v1704_v34  ;;  %9150 = vst [vmem:[#allocation76_spill] sm:$0xff] %v6843_v2  ;;  %v5149_v54 = vld [vmem:[%s8870_s7 + $0x42] ss:$8 sm:$0xf0]  ;;  %2442 = vrot.lane.b32.xlu1 %v6098_v59, %s9144_s20  ;;  %v6857_v55 = vor.u32 %v5151_v41, %v5150_v40 }
 0x354   : > { %2530 = vrot.lane.b32.xlu0 %v6186_v14, %s9151_s15  ;;  %v5152_v24 = vld [vmem:[%s8870_s7 + $0x44] ss:$8 sm:$0xf]  ;;  %v1669_v6 = vmul.f32 %v1638_v7, %v6603_v0  ;;  %v6874_v40 = vor.u32 %v5181_v33, %v5180_v61  ;;  %v5156_v34 = vld [vmem:[%s8870_s7 + $0x46] ss:$8 sm:$0xf]  ;;  %v1896_v7 = vrot.slane %v6818_v32, %v6554_v1  ;;  %v3158_v33 = vrot.slane %v6652_v39, %v6554_v1 }
 0x355   : > { %9149 = vst [vmem:[#allocation75_spill] sm:$0xff] %v6839_v19  ;;  %9152 = vst [vmem:[#allocation77_spill] sm:$0xff] %v6857_v55  ;;  %v5153_v28 = vld [vmem:[%s8870_s7 + $0x44] ss:$8 sm:$0xf0]  ;;  %v6868_v4 = vpop.permute.xlu0 %2117  ;;  %v6870_v3 = vpop.permute.xlu1 %1775  ;;  %v3561_v58 = vpack.c.bf16 %v1756_v35, %v1670_v49  ;;  %v3219_v41 = vrot.slane %v6660_v16, %v6554_v1  ;;  %v6902_v19 = vor.u32 %v5149_v54, %v5148_v27 }
 0x356   : > { %9153 = vst [vmem:[#allocation78_spill] sm:$0xff] %v6870_v3  ;;  %9154 = vst [vmem:[#allocation79_spill] sm:$0xff] %v6874_v40  ;;  %v5157_v0 = vld [vmem:[%s8870_s7 + $0x46] ss:$8 sm:$0xf0]  ;;  %v3560_v61 = vpack.c.bf16 %v1755_v30, %v1669_v6  ;;  %v1790_v30 = vsel %vm1785_vm8, %v6662_v45, %v6870_v3  ;;  %v6916_v26 = vor.u32 %v5153_v28, %v5152_v24 }
 0x357   : > { %v5158_v35 = vld [vmem:[%s8870_s7 + $0x47] ss:$8 sm:$0xf]  ;;  %3732 = vmatprep.subr.bf16.mxu1 %v3561_v58  ;;  %9155 = vst [vmem:[#allocation80_spill] sm:$0xff] %v6902_v19  ;;  %2528 = vrot.lane.b32.xlu1 %v6098_v59, %s9151_s15  ;;  %v1810_v27 = vrot.slane %v6779_v29, %v6554_v1  ;;  %v6924_v3 = vor.u32 %v5157_v0, %v5156_v34 }
 0x358   : > { %v5159_v49 = vld [vmem:[%s8870_s7 + $0x47] ss:$8 sm:$0xf0]  ;;  %2616 = vrot.lane.b32.xlu0 %v6186_v14, %s9109_s24  ;;  %9156 = vst [vmem:[#allocation81_spill] sm:$0xff] %v6916_v26  ;;  %3733 = vmatpush1.bf16.msra.mxu1 %v3560_v61  ;;  %v1927_v32 = vmul.f32 %v1896_v7, %v6719_v57  ;;  %v1842_v28 = vmul.f32 %v1814_v44, %v1790_v30 }
 0x359   : > { %v6920_v54 = vpop.permute.xlu0 %2203  ;;  %v6922_v45 = vpop.permute.xlu1 %1861  ;;  %9158 = vst [vmem:[#allocation83_spill] sm:$0xff] %v6924_v3  ;;  %v6926_v16 = vor.u32 %v5159_v49, %v5158_v35  ;;  %v6933_v58 = vmul.f32 %v3158_v33, %v1790_v30  ;;  %v5162_v33 = vld [vmem:[%s8870_s7 + $0x81] ss:$8 sm:$0xf]  ;;  %v1986_v0 = vrot.slane %v6843_v2, %v6563_v46  ;;  %v2072_v57 = vrot.slane %v6845_v31, %v6563_v46 }
 0x35a   : > { %9157 = vst [vmem:[#allocation82_spill] sm:$0xff] %v6922_v45  ;;  %v1876_v24 = vsel %vm1871_vm9, %v6710_v15, %v6922_v45  ;;  %v5160_v15 = vld [vmem:[%s8870_s7 + $0x80] ss:$8 sm:$0xf] }
 0x35b   : > { %9159 = vst [vmem:[#allocation84_spill] sm:$0xff] %v6926_v16  ;;  %9160 = vst [vmem:[#allocation85_spill] sm:$0xff] %v6933_v58  ;;  %v1928_v6 = vmul.f32 %v1900_v25, %v1876_v24  ;;  %v6935_v61 = vmul.f32 %v3219_v41, %v1876_v24  ;;  %2614 = vrot.lane.b32.xlu1 %v6098_v59, %s9109_s24  ;;  %v5161_v25 = vld [vmem:[%s8870_s7 + $0x80] ss:$8 sm:$0xf0]  ;;  %v1841_v41 = vmul.f32 %v1810_v27, %v6692_v20 }
 0x35c   : > { %2702 = vrot.lane.b32.xlu0 %v6186_v14, %s9162_s19  ;;  %v5163_v30 = vld [vmem:[%s8870_s7 + $0x81] ss:$8 sm:$0xf0]  ;;  %v6980_v44 = vor.u32 %v5161_v25, %v5160_v15  ;;  %v2049_v24 = vsel %vm2043_vm11, %v6435_v17, %v6812_v42  ;;  %v2240_v27 = vrot.slane %v6857_v55, %v6554_v1 }
 0x35d   : > { %9161 = vst [vmem:[#allocation86_spill] sm:$0xff] %v6935_v61  ;;  %v6958_v7 = vpop.permute.xlu0 %2289  ;;  %v6960_v35 = vpop.permute.xlu1 %1947  ;;  %v3569_v49 = vpack.c.bf16 %v1928_v6, %v1842_v28  ;;  %v2068_v6 = vrot.slane %v6845_v31, %v6554_v1  ;;  %v3568_v28 = vpack.c.bf16 %v1927_v32, %v1841_v41  ;;  %v6997_v15 = vor.u32 %v5163_v30, %v5162_v33  ;;  %v9186_v61 = vld [vmem:[#allocation19_spill] sm:$0xff]  ;;  %v9202_v45 = vld [vmem:[#allocation42_spill] sm:$0xff] }
 0x35e   : > { %9163 = vst [vmem:[#allocation87_spill] sm:$0xff] %v6960_v35  ;;  %9164 = vst [vmem:[#allocation88_spill] sm:$0xff] %v6980_v44  ;;  %v6991_v32 = vsel %vm1957_vm10, %v6754_v23, %v6960_v35  ;;  %v1982_v41 = vrot.slane %v6843_v2, %v6554_v1  ;;  %v7015_v33 = vsel %vm1957_vm10, %v6429_v12, %v6754_v23  ;;  %v9219_v2 = vld [vmem:[#allocation29_spill] sm:$0xff] }
 0x35f   : > { %3734 = vmatprep.subr.bf16.mxu1 %v3569_v49  ;;  %9165 = vst [vmem:[#allocation89_spill] sm:$0xff] %v6991_v32  ;;  %2700 = vrot.lane.b32.xlu1 %v6098_v59, %s9162_s19  ;;  %9166 = vst [vmem:[#allocation90_spill] sm:$0xff] %v6997_v15  ;;  %v2099_v34 = vmul.f32 %v2068_v6, %v2049_v24  ;;  %v2014_v40 = vmul.f32 %v1986_v0, %v6991_v32 }
 0x360   : > { %1351 = vrot.lane.b32.xlu0 %v6186_v14, %s9120_s11  ;;  %3735 = vmatpush1.bf16.msra.mxu1 %v3568_v28  ;;  %9169 = vst [vmem:[#allocation93_spill] sm:$0xff] %v7015_v33  ;;  %v2158_v28 = vrot.slane %v6902_v19, %v6563_v46  ;;  %s9170_s11 = smov 65   ;;  %v2013_v0 = vmul.f32 %v1982_v41, %v7015_v33 }
 0x361   : > { %v7007_v20 = vpop.permute.xlu0 %2522  ;;  %v7009_v59 = vpop.permute.xlu1 %2033  ;;  %v2330_v30 = vrot.slane %v6916_v26, %v6563_v46  ;;  %v2221_v41 = vsel %vm2215_vm13, %v6443_v37, %v6920_v54  ;;  %v7106_v23 = vsel %vm1527_vm5, %v6256_v21, %v6411_v43 }
 0x362   : > { %9167 = vst [vmem:[#allocation91_spill] sm:$0xff] %v7007_v20  ;;  %9168 = vst [vmem:[#allocation92_spill] sm:$0xff] %v7009_v59  ;;  %v2048_v25 = vsel %vm2043_vm11, %v6812_v42, %v7009_v59  ;;  %v2244_v42 = vrot.slane %v6857_v55, %v6563_v46  ;;  %v3576_v33 = vpack.c.bf16 %v2099_v34, %v2013_v0 }
 0x363   : > { %v2100_v49 = vmul.f32 %v2072_v57, %v2048_v25  ;;  %1264 = vrot.lane.b32.xlu1 %v6186_v14, %s9114_s26  ;;  %s9173_s26 = smov 63   ;;  %9175 = vst [vmem:[#allocation97_spill] sm:$0xff] %v7106_v23  ;;  %v2271_v0 = vmul.f32 %v2240_v27, %v2221_v41 }
 0x364   : > { %1523 = vrot.lane.b32.xlu0 %v6186_v14, %s9170_s11 }
 0x365   : > { %v7040_v24 = vpop.permute.xlu0 %2694  ;;  %v7042_v6 = vpop.permute.xlu1 %2119  ;;  %v3577_v25 = vpack.c.bf16 %v2100_v49, %v2014_v40  ;;  %v9183_v40 = vrot.slane %v6650_v36, %v6372_v62 }
 0x366   : > { %9171 = vst [vmem:[#allocation94_spill] sm:$0xff] %v7040_v24  ;;  %9172 = vst [vmem:[#allocation95_spill] sm:$0xff] %v7042_v6  ;;  %v2134_v34 = vsel %vm2129_vm12, %v6868_v4, %v7042_v6 }
 0x367   : > { %3736 = vmatprep.subr.bf16.mxu1 %v3577_v25  ;;  %1437 = vrot.lane.b32.xlu1 %v6186_v14, %s9117_s21  ;;  %v2186_v57 = vmul.f32 %v2158_v28, %v2134_v34  ;;  %s9176_s21 = smov 64   ;;  %v7125_v28 = vsel %vm9026_vm4, %v6258_v22, %v6396_v18  ;;  %v7142_v18 = vmul.f32 %v9183_v40, %v7106_v23 }
 0x368   : > { %1695 = vrot.lane.b32.xlu0 %v6186_v14, %s9173_s26  ;;  %3737 = vmatpush1.bf16.msra.mxu1 %v3576_v33  ;;  %v2135_v33 = vsel %vm2129_vm12, %v6437_v13, %v6868_v4  ;;  %9178 = vst [vmem:[#allocation98_spill] sm:$0xff] %v7125_v28  ;;  %v9188_v40 = vrot.slane %v6916_v26, %v6554_v1  ;;  %v9204_v26 = vld [vmem:[#allocation70_spill] sm:$0xff] }
 0x369   : > { %v7077_v25 = vpop.permute.xlu0 %2610  ;;  %v7079_v58 = vpop.permute.xlu1 %2205 }
 0x36a   : > { %9174 = vst [vmem:[#allocation96_spill] sm:$0xff] %v7079_v58  ;;  %v2220_v49 = vsel %vm2215_vm13, %v6920_v54, %v7079_v58  ;;  %v2307_v54 = vsel %vm8996_vm14, %v6445_v38, %v6958_v7  ;;  %v9185_v58 = vld [vmem:[#allocation41_spill] sm:$0xff] }
 0x36b   : > { %v2272_v4 = vmul.f32 %v2244_v42, %v2220_v49  ;;  %1609 = vrot.lane.b32.xlu1 %v6186_v14, %s9176_s21  ;;  %v9179_v42 = vld [vmem:[#allocation18_spill] sm:$0xff]  ;;  %v9181_v49 = vrot.slane %v6902_v19, %v6554_v1  ;;  %v2357_v35 = vmul.f32 %v9188_v40, %v2307_v54  ;;  %v9197_v40 = vld [vmem:[#allocation79_spill] sm:$0xff]  ;;  %v9203_v38 = vld [vmem:[#allocation21_spill] sm:$0xff] }
 0x36c   : > { %1867 = vrot.lane.b32.xlu0 %v6186_v14, %s9177_s27  ;;  %v7131_v41 = vsel %vm1699_vm7, %v9179_v42, %v6419_v5 }
 0x36d   : > { %9180 = vst [vmem:[#allocation18_spill] sm:$0xff] %v7131_v41  ;;  %v2185_v34 = vmul.f32 %v9181_v49, %v2135_v33  ;;  %v2697_v43 = vpop.permute.xlu0 %2696  ;;  %v7136_v59 = vpop.permute.xlu1 %2291  ;;  %v3585_v27 = vpack.c.bf16 %v2272_v4, %v2186_v57  ;;  %v9184_v33 = vld [vmem:[#allocation55_spill] sm:$0xff]  ;;  %v7156_v57 = vsel %vm1613_vm6, %v9186_v61, %v9185_v58  ;;  %v9190_v49 = vrot.slane %v6739_v9, %v6372_v62 }
 0x36e   : > { %9182 = vst [vmem:[#allocation99_spill] sm:$0xff] %v7136_v59  ;;  %v2306_v5 = vsel %vm8996_vm14, %v6958_v7, %v7136_v59  ;;  %9187 = vst [vmem:[#allocation41_spill] sm:$0xff] %v7156_v57  ;;  %v9189_v7 = vrot.slane %v6658_v52, %v6372_v62  ;;  %v9199_v58 = vrot.slane %v6737_v8, %v6372_v62  ;;  %vm2534_vm14 = vcmp.lt.s32.totalorder %v6357_v47, 121 }
 0x36f   : > { %v3584_v4 = vpack.c.bf16 %v2271_v0, %v2185_v34  ;;  %v2358_v23 = vmul.f32 %v2330_v30, %v2306_v5  ;;  %3738 = vmatprep.subr.bf16.mxu1 %v3585_v27  ;;  %v7171_v59 = vmul.f32 %v9190_v49, %v7131_v41  ;;  %1781 = vrot.lane.b32.xlu1 %v6186_v14, %s9191_s23  ;;  %v9192_v30 = vld [vmem:[#allocation43_spill] sm:$0xff]  ;;  %v9193_v0 = vld [vmem:[#allocation20_spill] sm:$0xff]  ;;  %v9198_v41 = vld [vmem:[#allocation73_spill] sm:$0xff] }
 0x370   : > { %v7165_v6 = vmul.f32 %v9189_v7, %v7125_v28  ;;  %2039 = vrot.lane.b32.xlu0 %v6186_v14, %s9128_s30  ;;  %v7184_v54 = vsel %vm1871_vm9, %v9193_v0, %v9192_v30  ;;  %v9196_v5 = vld [vmem:[#allocation71_spill] sm:$0xff]  ;;  %v7197_v32 = vmul.f32 %v9199_v58, %v7156_v57  ;;  %v9200_v30 = vld [vmem:[#allocation17_spill] sm:$0xff]  ;;  %v7211_v28 = vsel %vm1785_vm8, %v9203_v38, %v9202_v45  ;;  %s9211_s30 = smov 55  }
 0x371   : > { %9194 = vst [vmem:[#allocation19_spill] sm:$0xff] %v7184_v54  ;;  %3739 = vmatpush1.bf16.msra.mxu1 %v3584_v4  ;;  %v2439_v27 = vpop.permute.xlu1 %2438  ;;  %v7186_v34 = vpop.permute.xlu0 %1266  ;;  %v3593_v49 = vpack.c.bf16 %v9196_v5, %v2358_v23  ;;  %v3592_v58 = vpack.c.bf16 %v9204_v26, %v2357_v35  ;;  %v9205_v57 = vld [vmem:[#allocation51_spill] sm:$0xff]  ;;  %v9208_v7 = vrot.slane %v9198_v41, %v6372_v62  ;;  %v9225_v41 = vld [vmem:[#allocation57_spill] sm:$0xff] }
 0x372   : > { %9195 = vst [vmem:[#allocation43_spill] sm:$0xff] %v7186_v34  ;;  %v1278_v4 = vsel %vm1270_vm2, %v7186_v34, %v9200_v30  ;;  %v2453_v55 = vsel %vm2448_vm15, %v9205_v57, %v2439_v27  ;;  %v9206_v30 = vrot.slane %v6365_v51, %v6176_v11  ;;  %v9210_v45 = vld [vmem:[#allocation27_spill] sm:$0xff]  ;;  %v2711_v13 = vsel %vm9046_vm1, %v7040_v24, %v2697_v43 }
 0x373   : > { %3740 = vmatprep.subr.bf16.mxu1 %v3593_v49  ;;  %v7226_v23 = vmul.f32 %v9208_v7, %v7184_v54  ;;  %v2452_v26 = vsel %vm2448_vm15, %v2439_v27, %v9210_v45  ;;  %1953 = vrot.lane.b32.xlu1 %v6186_v14, %s9211_s30  ;;  %v9212_v49 = vld [vmem:[#allocation32_spill] sm:$0xff]  ;;  %v9216_v45 = vld [vmem:[#allocation30_spill] sm:$0xff] }
 0x374   : > { %v7220_v34 = vmul.f32 %v9206_v30, %v1278_v4  ;;  %2211 = vrot.lane.b32.xlu0 %v6186_v14, %s9137_s22  ;;  %v9213_v30 = vld [vmem:[#allocation56_spill] sm:$0xff]  ;;  %v2710_v57 = vsel %vm9046_vm1, %v2697_v43, %v9216_v45 }
 0x375   : > { %9209 = vst [vmem:[#allocation79_spill] sm:$0xff] %v7226_v23  ;;  %v7242_v7 = vsel %vm1270_vm2, %v9213_v30, %v9212_v49  ;;  %v9215_v54 = vld [vmem:[#allocation28_spill] sm:$0xff]  ;;  %3741 = vmatpush1.bf16.msra.mxu1 %v3592_v58  ;;  %v2525_v35 = vpop.permute.xlu1 %2524  ;;  %v7254_v19 = vpop.permute.xlu0 %1439  ;;  %v9218_v30 = vrot.slane %v6924_v3, %v6554_v1  ;;  %v9220_v58 = vrot.slane %v6924_v3, %v6563_v46 }
 0x376   : > { %9207 = vst [vmem:[#allocation71_spill] sm:$0xff] %v7220_v34  ;;  %9214 = vst [vmem:[#allocation17_spill] sm:$0xff] %v7242_v7  ;;  %v2624_v27 = vsel %vm2620_vm0, %v7077_v25, %v9215_v54  ;;  %v2538_v54 = vsel %vm2534_vm14, %v2525_v35, %v9219_v2  ;;  %v2539_v45 = vsel %vm2534_vm14, %v7007_v20, %v2525_v35 }
 0x377   : > { %9217 = vst [vmem:[#allocation42_spill] sm:$0xff] %v7254_v19  ;;  %v2504_v49 = vmul.f32 %v9218_v30, %v2453_v55  ;;  %v1449_v43 = vsel %vm9026_vm4, %v7254_v19, %v6258_v22  ;;  %v2505_v24 = vmul.f32 %v9220_v58, %v2452_v26  ;;  %v9221_v55 = vrot.slane %v6926_v16, %v6554_v1 }
 0x378   : > { %v9222_v2 = vrot.slane %v6926_v16, %v6563_v46  ;;  %v9223_v35 = vrot.slane %v6499_v60, %v6176_v11  ;;  %v9226_v22 = vrot.slane %v6365_v51, %v6554_v1  ;;  %v9227_v26 = vrot.slane %v6365_v51, %v6563_v46  ;;  %2125 = vrot.lane.b32.xlu1 %v6186_v14, %s9133_s18 }
 0x379   : > { %v2590_v30 = vmul.f32 %v9221_v55, %v2539_v45  ;;  %v9228_v58 = vrot.slane %v6997_v15, %v6563_v46  ;;  %v9230_v55 = vld [vmem:[#allocation31_spill] sm:$0xff]  ;;  %v9235_v3 = vrot.slane %v6980_v44, %v6563_v46  ;;  %v9236_v23 = vrot.slane %v6997_v15, %v6554_v1 }
 0x37a   : > { %v2591_v5 = vmul.f32 %v9222_v2, %v2538_v54  ;;  %v7281_v20 = vmul.f32 %v9223_v35, %v1449_v43  ;;  %v7287_v19 = vmul.f32 %v9226_v22, %v9225_v41  ;;  %v2824_v45 = vmul.f32 %v9227_v26, %v7242_v7  ;;  %v9229_v54 = vld [vmem:[#allocation13_spill] sm:$0xff]  ;;  %v9231_v35 = vld [vmem:[#allocation58_spill] sm:$0xff]  ;;  %v9232_v22 = vld [vmem:[#allocation52_spill] sm:$0xff]  ;;  %v7310_v7 = vpop.permute.xlu1 %1353 }
 0x37b   : > { %v2763_v2 = vmul.f32 %v9228_v58, %v2710_v57  ;;  %2446 = vrot.lane.b32.xlu0 %v9229_v54, %s9144_s20  ;;  %v7304_v41 = vsel %vm1355_vm3, %v9231_v35, %v9230_v55  ;;  %v2625_v26 = vsel %vm2620_vm0, %v9232_v22, %v7077_v25  ;;  %v3600_v51 = vpack.c.bf16 %v2590_v30, %v2504_v49  ;;  %v7312_v57 = vpop.permute.xlu0 %1611  ;;  %v9237_v55 = vld [vmem:[#allocation16_spill] sm:$0xff] }
 0x37c   : > { %9224 = vst [vmem:[#allocation21_spill] sm:$0xff] %v7281_v20  ;;  %9233 = vst [vmem:[#allocation70_spill] sm:$0xff] %v7310_v7  ;;  %v3601_v58 = vpack.c.bf16 %v2591_v5, %v2505_v24  ;;  %v2677_v16 = vmul.f32 %v9235_v3, %v2624_v27  ;;  %v2762_v35 = vmul.f32 %v9236_v23, %v2711_v13  ;;  %2297 = vrot.lane.b32.xlu1 %v6186_v14, %s9107_s12  ;;  %v9290_v20 = vld [vmem:[#allocation76_spill] sm:$0xff]  ;;  %s5322_s12 = sshll.u32 %s9492_s14, 6 }
 0x37d   : > { %9234 = vst [vmem:[#allocation56_spill] sm:$0xff] %v7312_v57  ;;  %v1363_v0 = vsel %vm1355_vm3, %v7310_v7, %v9237_v55  ;;  %v1621_v25 = vsel %vm1613_vm6, %v7312_v57, %v9186_v61  ;;  %v9238_v24 = vrot.slane %v6359_v50, %v6378_v48  ;;  %v9239_v3 = vrot.slane %v6367_v53, %v6378_v48  ;;  %v9249_v57 = vld [vmem:[#allocation65_spill] sm:$0xff]  ;;  %s356_s22 = scalar_lea.vmem %s8873_s10, %s5322_s12 }
 0x37e   : > { %v9240_v13 = vrot.slane %v6369_v56, %v6176_v11  ;;  %v9242_v27 = vrot.slane %v6560_v63, %v6176_v11  ;;  %3742 = vmatprep.subr.bf16.mxu1 %v3601_v58  ;;  %v9244_v61 = vrot.slane %v6369_v56, %v6563_v46  ;;  %v9245_v55 = vrot.slane %v6980_v44, %v6554_v1 }
 0x37f   : > { %v1323_v5 = vmul.f32 %v9238_v24, %v1278_v4  ;;  %v1409_v49 = vmul.f32 %v9239_v3, %v1363_v0  ;;  %2618 = vrot.lane.b32.xlu0 %v9229_v54, %s9109_s24  ;;  %v9246_v3 = vld [vmem:[#allocation59_spill] sm:$0xff]  ;;  %v9247_v58 = vrot.slane %v6369_v56, %v6554_v1  ;;  %3743 = vmatpush1.bf16.msra.mxu1 %v3600_v51  ;;  %v7367_v14 = vpop.permute.xlu0 %1783 }
 0x380   : > { %v7337_v23 = vmul.f32 %v9240_v13, %v1363_v0  ;;  %v7342_v30 = vmul.f32 %v9242_v27, %v1621_v25  ;;  %v2885_v4 = vmul.f32 %v9244_v61, %v7304_v41  ;;  %v2676_v24 = vmul.f32 %v9245_v55, %v2625_v26  ;;  %v9248_v27 = vld [vmem:[#allocation35_spill] sm:$0xff]  ;;  %v7365_v26 = vpop.permute.xlu1 %1525  ;;  %9251 = vst [vmem:[#allocation52_spill] sm:$0xff] %v7367_v14  ;;  %v9252_v55 = vld [vmem:[#allocation37_spill] sm:$0xff] }
 0x381   : > { %v3609_v0 = vpack.c.bf16 %v2763_v2, %v2677_v16  ;;  %v2884_v13 = vmul.f32 %v9247_v58, %v9246_v3  ;;  %v7363_v61 = vsel %vm1527_vm5, %v9249_v57, %v9248_v27  ;;  %v3542_v7 = vpack.c.bf16 %v1409_v49, %v1323_v5  ;;  %9250 = vst [vmem:[#allocation58_spill] sm:$0xff] %v7365_v26  ;;  %v3851_v16 = vld [vmem:[%s8869_s6] sm:$0x1]  ;;  %v9253_v3 = vld [vmem:[#allocation63_spill] sm:$0xff] }
 0x382   : > { %9241 = vst [vmem:[#allocation57_spill] sm:$0xff] %v7337_v23  ;;  %9243 = vst [vmem:[#allocation13_spill] sm:$0xff] %v7342_v30  ;;  %v7378_v58 = vsel %vm9026_vm4, %v9253_v3, %v9252_v55  ;;  %v3608_v57 = vpack.c.bf16 %v2762_v35, %v2676_v24  ;;  %v1535_v51 = vsel %vm1527_vm5, %v7365_v26, %v6256_v21  ;;  %2532 = vrot.lane.b32.xlu1 %v9229_v54, %s9151_s15  ;;  %v9285_v30 = vld [vmem:[#allocation73_spill] sm:$0xff]  ;;  %v9313_v26 = vld [vmem:[#allocation47_spill] sm:$0xff] }
 0x383   : > { %3744 = vmatprep.subr.bf16.mxu1 %v3609_v0  ;;  %v1793_v5 = vsel %vm1785_vm8, %v7367_v14, %v9203_v38  ;;  %v9254_v49 = vrot.slane %v6658_v52, %v6378_v48  ;;  %v9255_v3 = vrot.slane %v6650_v36, %v6378_v48  ;;  %v9256_v35 = vrot.slane %v6501_v10, %v6176_v11  ;;  %v9260_v38 = vld [vmem:[#allocation22_spill] sm:$0xff] }
 0x384   : > { %v9258_v21 = vrot.slane %v6652_v39, %v6176_v11  ;;  %3688 = vmatpush1.bf16.msra.mxu0 %v3542_v7  ;;  %3854 = vperm.xlu0 %5397, %v3851_v16   ;;  %v9262_v7 = vpack.c.bf16 %v7142_v18, %v7165_v6  ;;  %v7418_v23 = vpop.permute.xlu1 %1697  ;;  %v9265_v16 = vrot.slane %v6499_v60, %v6563_v46  ;;  %v9268_v18 = vld [vmem:[#allocation23_spill] sm:$0xff]  ;;  %vm9303_vm4 = vcmp.lt.s32.totalorder %v6357_v47, 1 }
 0x385   : > { %v1495_v2 = vmul.f32 %v9254_v49, %v1449_v43  ;;  %v1581_v34 = vmul.f32 %v9255_v3, %v1535_v51  ;;  %v7397_v24 = vmul.f32 %v9256_v35, %v1535_v51  ;;  %v2050_v43 = vsel %vm2043_vm11, %v9260_v38, %v6435_v17  ;;  %3745 = vmatpush1.bf16.msra.mxu1 %v3608_v57  ;;  %v7420_v17 = vpop.permute.xlu0 %1955 }
 0x386   : > { %v7402_v0 = vmul.f32 %v9258_v21, %v1793_v5  ;;  %v9261_v49 = vrot.slane %v6501_v10, %v6563_v46  ;;  %v3617_v51 = vpack.c.bf16 %v2885_v4, %v2824_v45  ;;  %v3616_v35 = vpack.c.bf16 %v2884_v13, %v7287_v19  ;;  %3689 = vmatprep.subr.bf16.mxu0 %v9262_v7  ;;  %v9266_v4 = vld [vmem:[#allocation66_spill] sm:$0xff] }
 0x387   : > { %9257 = vst [vmem:[#allocation16_spill] sm:$0xff] %v7397_v24  ;;  %v3550_v21 = vpack.c.bf16 %v1581_v34, %v1495_v2  ;;  %9263 = vst [vmem:[#allocation35_spill] sm:$0xff] %v7418_v23  ;;  %v2946_v45 = vmul.f32 %v9265_v16, %v7378_v58  ;;  %v9267_v19 = vrot.slane %v6501_v10, %v6554_v1  ;;  %2704 = vrot.lane.b32.xlu1 %v9229_v54, %s9162_s19 }
 0x388   : > { %9259 = vst [vmem:[#allocation59_spill] sm:$0xff] %v7402_v0  ;;  %v3007_v3 = vmul.f32 %v9261_v49, %v7363_v61  ;;  %9264 = vst [vmem:[#allocation65_spill] sm:$0xff] %v7420_v17  ;;  %3746 = vmatprep.subr.bf16.mxu1 %v3617_v51  ;;  %v1707_v6 = vsel %vm1699_vm7, %v7418_v23, %v9179_v42  ;;  %v1965_v13 = vsel %vm1957_vm10, %v7420_v17, %v9268_v18  ;;  %v9312_v23 = vld [vmem:[#allocation51_spill] sm:$0xff] }
 0x389   : > { %v3006_v34 = vmul.f32 %v9267_v19, %v9266_v4  ;;  %v9269_v2 = vrot.slane %v6737_v8, %v6378_v48  ;;  %v9270_v7 = vrot.slane %v6739_v9, %v6378_v48  ;;  %v9271_v51 = vrot.slane %v9184_v33, %v6176_v11  ;;  %3690 = vmatpush1.bf16.msra.mxu0 %v3550_v21 }
 0x38a   : > { %v9273_v42 = vrot.slane %v9197_v40, %v6176_v11  ;;  %v9275_v49 = vrot.slane %v6779_v29, %v6372_v62  ;;  %v7471_v21 = vsel %vm1957_vm10, %v9268_v18, %v6429_v12  ;;  %3747 = vmatpush1.bf16.msra.mxu1 %v3616_v35  ;;  %v9281_v12 = vld [vmem:[#allocation25_spill] sm:$0xff] }
 0x38b   : > { %v1667_v57 = vmul.f32 %v9269_v2, %v1621_v25  ;;  %v1753_v16 = vmul.f32 %v9270_v7, %v1707_v6  ;;  %v7449_v4 = vmul.f32 %v9271_v51, %v1707_v6  ;;  %v9276_v2 = vpack.c.bf16 %v7171_v59, %v7197_v32  ;;  %v9277_v51 = vld [vmem:[#allocation64_spill] sm:$0xff]  ;;  %v7479_v32 = vpop.permute.xlu0 %2692 }
 0x38c   : > { %v7454_v19 = vmul.f32 %v9273_v42, %v1965_v13  ;;  %v1840_v25 = vmul.f32 %v9275_v49, %v7211_v28  ;;  %v3625_v6 = vpack.c.bf16 %v3007_v3, %v2946_v45  ;;  %v2060_v7 = vrot.slane %v6845_v31, %v6378_v48 }
 0x38d   : > { %9272 = vst [vmem:[#allocation37_spill] sm:$0xff] %v7449_v4  ;;  %3691 = vmatprep.subr.bf16.mxu0 %v9276_v2  ;;  %v9278_v49 = vrot.slane %v6499_v60, %v6554_v1  ;;  %v3558_v54 = vpack.c.bf16 %v1753_v16, %v1667_v57  ;;  %v9280_v3 = vrot.slane %v6845_v31, %v6372_v62  ;;  %v9282_v2 = vld [vmem:[#allocation20_spill] sm:$0xff]  ;;  %v9283_v57 = vld [vmem:[#allocation79_spill] sm:$0xff]  ;;  %v9287_v4 = vld [vmem:[#allocation62_spill] sm:$0xff] }
 0x38e   : > { %9274 = vst [vmem:[#allocation63_spill] sm:$0xff] %v7454_v19  ;;  %v7477_v19 = vpop.permute.xlu1 %1869  ;;  %v2222_v18 = vsel %vm2215_vm13, %v9281_v12, %v6443_v37  ;;  %3748 = vmatprep.subr.bf16.mxu1 %v3625_v6  ;;  %v3567_v16 = vpack.c.bf16 %v9283_v57, %v1840_v25  ;;  %v9288_v37 = vrot.slane %v9287_v4, %v6176_v11  ;;  %v9294_v57 = vld [vmem:[#allocation24_spill] sm:$0xff] }
 0x38f   : > { %v2945_v42 = vmul.f32 %v9278_v49, %v9277_v51  ;;  %9279 = vst [vmem:[#allocation22_spill] sm:$0xff] %v7477_v19  ;;  %v2098_v45 = vmul.f32 %v9280_v3, %v2050_v43  ;;  %v1879_v35 = vsel %vm1871_vm9, %v7477_v19, %v9282_v2  ;;  %v9284_v49 = vrot.slane %v6779_v29, %v6378_v48  ;;  %v7527_v17 = vpop.permute.xlu0 %2213  ;;  %v9310_v19 = vld [vmem:[#allocation83_spill] sm:$0xff] }
 0x390   : > { %v9286_v43 = vrot.slane %v9285_v30, %v6378_v48  ;;  %v7504_v6 = vmul.f32 %v9288_v37, %v1879_v35  ;;  %3692 = vmatpush1.bf16.msra.mxu0 %v3558_v54  ;;  %v9291_v2 = vrot.slane %v9290_v20, %v6372_v62  ;;  %9298 = vst [vmem:[#allocation64_spill] sm:$0xff] %v7527_v17 }
 0x391   : > { %v3624_v51 = vpack.c.bf16 %v3006_v34, %v2945_v42  ;;  %v1839_v59 = vmul.f32 %v9284_v49, %v1793_v5  ;;  %v9292_v34 = vld [vmem:[#allocation80_spill] sm:$0xff]  ;;  %3693 = vmatprep.subr.bf16.mxu0 %v3567_v16 }
 0x392   : > { %v1925_v3 = vmul.f32 %v9286_v43, %v1879_v35  ;;  %9289 = vst [vmem:[#allocation66_spill] sm:$0xff] %v7504_v6  ;;  %v2012_v25 = vmul.f32 %v9291_v2, %v7471_v21  ;;  %v2150_v42 = vrot.slane %v9292_v34, %v6372_v62  ;;  %v9293_v5 = vld [vmem:[#allocation44_spill] sm:$0xff]  ;;  %v7516_v24 = vpop.permute.xlu1 %2041  ;;  %v9296_v35 = vld [vmem:[#allocation77_spill] sm:$0xff] }
 0x393   : > { %v2136_v49 = vsel %vm2129_vm12, %v9294_v57, %v9293_v5  ;;  %3749 = vmatpush1.bf16.msra.mxu1 %v3624_v51  ;;  %9295 = vst [vmem:[#allocation23_spill] sm:$0xff] %v7516_v24  ;;  %v9297_v37 = vrot.slane %v9296_v35, %v6372_v62  ;;  %v2051_v16 = vsel %vm2043_vm11, %v7516_v24, %v9260_v38  ;;  %v9301_v6 = vld [vmem:[#allocation45_spill] sm:$0xff]  ;;  %v9309_v24 = vld [vmem:[#allocation48_spill] sm:$0xff] }
 0x394   : > { %v3566_v43 = vpack.c.bf16 %v1925_v3, %v1839_v59  ;;  %v3575_v14 = vpack.c.bf16 %v2098_v45, %v2012_v25  ;;  %v9299_v59 = vld [vmem:[#allocation81_spill] sm:$0xff]  ;;  %v9300_v3 = vrot.slane %v9290_v20, %v6378_v48  ;;  %v2097_v54 = vmul.f32 %v2060_v7, %v2051_v16 }
 0x395   : > { %v2270_v2 = vmul.f32 %v9297_v37, %v2222_v18  ;;  %v2322_v51 = vrot.slane %v9299_v59, %v6372_v62  ;;  %v2184_v0 = vmul.f32 %v2150_v42, %v2136_v49  ;;  %v9302_v18 = vld [vmem:[#allocation26_spill] sm:$0xff]  ;;  %v2232_v38 = vrot.slane %v9296_v35, %v6378_v48  ;;  %v9304_v7 = vld [vmem:[#allocation5_spill] sm:$0xff] }
 0x396   : > { %v2011_v5 = vmul.f32 %v9300_v3, %v1965_v13  ;;  %3694 = vmatpush1.bf16.msra.mxu0 %v3566_v43  ;;  %v2308_v37 = vsel %vm9303_vm4, %v9302_v18, %v9301_v6  ;;  %v2146_v45 = vrot.slane %v9292_v34, %v6378_v48  ;;  %v2223_v13 = vsel %vm2215_vm13, %v7527_v17, %v9281_v12  ;;  %v7548_v49 = vpop.permute.xlu1 %2127  ;;  %v7552_v43 = vpop.permute.xlu0 %2299  ;;  %v9307_v3 = vld [vmem:[#allocation84_spill] sm:$0xff]  ;;  %v9308_v17 = vld [vmem:[#allocation91_spill] sm:$0xff] }
 0x397   : > { %3695 = vmatprep.subr.bf16.mxu0 %v3575_v14  ;;  %v2383_v42 = vrot.slane %v9304_v7, %v6372_v62  ;;  %9305 = vst [vmem:[#allocation25_spill] sm:$0xff] %v7548_v49  ;;  %v2318_v6 = vrot.slane %v9299_v59, %v6378_v48  ;;  %9306 = vst [vmem:[#allocation20_spill] sm:$0xff] %v7552_v43  ;;  %v3583_v14 = vpack.c.bf16 %v2270_v2, %v2184_v0 }
 0x398   : > { %v3574_v25 = vpack.c.bf16 %v2097_v54, %v2011_v5  ;;  %v2356_v16 = vmul.f32 %v2322_v51, %v2308_v37  ;;  %v2555_v54 = vrot.slane %v9307_v3, %v6372_v62  ;;  %v2137_v12 = vsel %vm2129_vm12, %v7548_v49, %v9294_v57 }
 0x399   : > { %v2309_v5 = vsel %vm9303_vm4, %v7552_v43, %v9302_v18  ;;  %v2540_v0 = vsel %vm2534_vm14, %v9309_v24, %v9308_v17  ;;  %v2269_v2 = vmul.f32 %v2232_v38, %v2223_v13  ;;  %v2183_v51 = vmul.f32 %v2146_v45, %v2137_v12  ;;  %v9315_v12 = vld [vmem:[#allocation34_spill] sm:$0xff] }
 0x39a   : > { %3696 = vmatpush1.bf16.msra.mxu0 %v3574_v25  ;;  %v2379_v37 = vrot.slane %v9304_v7, %v6378_v48  ;;  %v2465_v57 = vrot.slane %v9310_v19, %v6378_v48  ;;  %v2551_v49 = vrot.slane %v9307_v3, %v6378_v48  ;;  %v2469_v18 = vrot.slane %v9310_v19, %v6372_v62  ;;  %v9311_v25 = vld [vmem:[#allocation8_spill] sm:$0xff]  ;;  %v2607_v7 = vpop.permute.xlu1 %2606 }
 0x39b   : > { %3697 = vmatprep.subr.bf16.mxu0 %v3583_v14  ;;  %v2417_v43 = vmul.f32 %v2383_v42, %v9311_v25  ;;  %v2454_v17 = vsel %vm2448_vm15, %v9313_v26, %v9312_v23  ;;  %v3582_v38 = vpack.c.bf16 %v2269_v2, %v2183_v51  ;;  %v2355_v45 = vmul.f32 %v2318_v6, %v2309_v5  ;;  %v7583_v14 = vpop.permute.xlu0 %2690  ;;  %v9316_v42 = vld [vmem:[#allocation33_spill] sm:$0xff]  ;;  %v9317_v2 = vld [vmem:[#allocation7_spill] sm:$0xff] }
 0x39c   : > { %v2641_v13 = vrot.slane %v6980_v44, %v6372_v62  ;;  %9314 = vst [vmem:[#allocation79_spill] sm:$0xff] %v7583_v14  ;;  %v2455_v11 = vsel %vm2448_vm15, %v9315_v12, %v9313_v26  ;;  %v2541_v25 = vsel %vm2534_vm14, %v9316_v42, %v9309_v24  ;;  %v2589_v3 = vmul.f32 %v2555_v54, %v2540_v0  ;;  %v9318_v24 = vld [vmem:[#allocation94_spill] sm:$0xff] }
 0x39d   : > { %v3591_v23 = vpack.c.bf16 %v2417_v43, %v2356_v16  ;;  %v2416_v6 = vmul.f32 %v2379_v37, %v9317_v2  ;;  %v2626_v5 = vsel %vm2620_vm0, %v2607_v7, %v9232_v22  ;;  %v2503_v51 = vmul.f32 %v2469_v18, %v2454_v17 }
 0x39e   : > { %3698 = vmatpush1.bf16.msra.mxu0 %v3582_v38  ;;  %v2727_v19 = vrot.slane %v6997_v15, %v6372_v62  ;;  %v2637_v26 = vrot.slane %v6980_v44, %v6378_v48  ;;  %v2502_v12 = vmul.f32 %v2465_v57, %v2455_v11  ;;  %v2588_v34 = vmul.f32 %v2551_v49, %v2541_v25  ;;  %v7605_v54 = vpop.permute.xlu1 %2604  ;;  %v9343_v44 = vld [vmem:[#allocation85_spill] sm:$0xff] }
 0x39f   : > { %3699 = vmatprep.subr.bf16.mxu0 %v3591_v23  ;;  %v2712_v43 = vsel %vm9046_vm1, %v7479_v32, %v9318_v24  ;;  %v3590_v16 = vpack.c.bf16 %v2416_v6, %v2355_v45  ;;  %9319 = vst [vmem:[#allocation73_spill] sm:$0xff] %v7605_v54  ;;  %v7607_v22 = vpop.permute.xlu0 %1691  ;;  %v2675_v0 = vmul.f32 %v2641_v13, %v2626_v5  ;;  %v9320_v45 = vld [vmem:[#allocation72_spill] sm:$0xff]  ;;  %v9322_v24 = vld [vmem:[#allocation82_spill] sm:$0xff]  ;;  %vm9346_vm4 = vcmask 1043456  }
 0x3a0   : > { %v2627_v37 = vsel %vm2620_vm0, %v7605_v54, %v2607_v7  ;;  %v3599_v18 = vpack.c.bf16 %v2589_v3, %v2503_v51  ;;  %v2723_v11 = vrot.slane %v6997_v15, %v6378_v48  ;;  %v3101_v49 = vrot.slane %v9184_v33, %v6563_v46  ;;  %v9342_v15 = vld [vmem:[#allocation86_spill] sm:$0xff] }
 0x3a1   : > { %v3040_v57 = vrot.slane %v6560_v63, %v6563_v46  ;;  %v2761_v17 = vmul.f32 %v2727_v19, %v2712_v43  ;;  %v2713_v38 = vsel %vm9046_vm1, %v7583_v14, %v7479_v32  ;;  %v7626_v3 = vsel %vm1699_vm7, %v9320_v45, %v7607_v22  ;;  %v9321_v19 = vld [vmem:[#allocation69_spill] sm:$0xff]  ;;  %vm9350_vm1 = vmmov %vm9346_vm4 }
 0x3a2   : > { %3700 = vmatpush1.bf16.msra.mxu0 %v3590_v16  ;;  %v3598_v13 = vpack.c.bf16 %v2588_v34, %v2502_v12  ;;  %v2674_v7 = vmul.f32 %v2637_v26, %v2627_v37  ;;  %v7628_v25 = vpop.permute.xlu1 %1605  ;;  %v3223_v32 = vrot.slane %v9287_v4, %v6563_v46  ;;  %v2760_v5 = vmul.f32 %v2723_v11, %v2713_v38 }
 0x3a3   : > { %3701 = vmatprep.subr.bf16.mxu0 %v3599_v18  ;;  %v7630_v23 = vpop.permute.xlu0 %1863  ;;  %v7636_v2 = vsel %vm1613_vm6, %v9321_v19, %v7628_v25  ;;  %v3607_v6 = vpack.c.bf16 %v2761_v17, %v2675_v0  ;;  %v3129_v51 = vmul.f32 %v3101_v49, %v7626_v3  ;;  %v3162_v12 = vrot.slane %v6652_v39, %v6563_v46  ;;  %v9323_v49 = vld [vmem:[#allocation78_spill] sm:$0xff]  ;;  %v9325_v19 = vld [vmem:[#allocation49_spill] sm:$0xff] }
 0x3a4   : > { %v3068_v34 = vmul.f32 %v3040_v57, %v7636_v2  ;;  %v3280_v26 = vrot.slane %v9197_v40, %v6554_v1  ;;  %v7650_v43 = vsel %vm1871_vm9, %v9322_v24, %v7630_v23  ;;  %v2967_v16 = vrot.slane %v6501_v10, %v6378_v48 }
 0x3a5   : > { %v3606_v0 = vpack.c.bf16 %v2760_v5, %v2674_v7  ;;  %v2906_v57 = vrot.slane %v6499_v60, %v6378_v48  ;;  %v3251_v17 = vmul.f32 %v3223_v32, %v7650_v43  ;;  %v3284_v45 = vrot.slane %v9197_v40, %v6563_v46  ;;  %v9330_v32 = vld [vmem:[#allocation74_spill] sm:$0xff] }
 0x3a6   : > { %3702 = vmatpush1.bf16.msra.mxu0 %v3598_v13  ;;  %v7654_v37 = vpop.permute.xlu1 %1777  ;;  %v3633_v11 = vpack.c.bf16 %v3129_v51, %v3068_v34  ;;  %v9324_v13 = vld [vmem:[#allocation89_spill] sm:$0xff]  ;;  %v3089_v24 = vrot.slane %v9184_v33, %v6378_v48 }
 0x3a7   : > { %3703 = vmatprep.subr.bf16.mxu0 %v3607_v6  ;;  %v7656_v18 = vpop.permute.xlu0 %1262  ;;  %v7662_v1 = vsel %vm1785_vm8, %v9323_v49, %v7654_v37  ;;  %v3311_v7 = vmul.f32 %v3280_v26, %v9324_v13  ;;  %v9326_v6 = vld [vmem:[#allocation50_spill] sm:$0xff]  ;;  %v9328_v51 = vld [vmem:[#allocation97_spill] sm:$0xff]  ;;  %v9329_v49 = vld [vmem:[#allocation75_spill] sm:$0xff] }
 0x3a8   : > { %v3190_v38 = vmul.f32 %v3162_v12, %v7662_v1  ;;  %3750 = vmatprep.subr.bf16.mxu1 %v3633_v11  ;;  %v9327_v5 = vpack.c.bf16 %v9325_v19, %v9326_v6  ;;  %v3004_v34 = vmul.f32 %v2967_v16, %v9328_v51  ;;  %v9331_v14 = vpack.c.bf16 %v9329_v49, %v9330_v32  ;;  %v9333_v26 = vld [vmem:[#allocation87_spill] sm:$0xff]  ;;  %v9334_v13 = vld [vmem:[#allocation98_spill] sm:$0xff] }
 0x3a9   : > { %v2943_v16 = vmul.f32 %v2906_v57, %v9334_v13  ;;  %v3028_v19 = vrot.slane %v6560_v63, %v6378_v48  ;;  %v3648_v49 = vpack.c.bf16 %v3311_v7, %v3311_v7  ;;  %v3211_v57 = vrot.slane %v9287_v4, %v6378_v48 }
 0x3aa   : > { %3704 = vmatpush1.bf16.msra.mxu0 %v3606_v0  ;;  %3751 = vmatpush1.bf16.msra.mxu1 %v9331_v14  ;;  %v7680_v12 = vpop.permute.xlu1 %1949  ;;  %v3641_v46 = vpack.c.bf16 %v3251_v17, %v3190_v38  ;;  %v9336_v14 = vld [vmem:[#allocation39_spill] sm:$0xff]  ;;  %v9338_v17 = vld [vmem:[#allocation54_spill] sm:$0xff]  ;;  %v9339_v38 = vld [vmem:[#allocation53_spill] sm:$0xff]  ;;  %v3272_v7 = vrot.slane %v9197_v40, %v6378_v48 }
 0x3ab   : > { %3705 = vmatprep.subr.bf16.mxu0 %v9327_v5  ;;  %v7682_v0 = vpop.permute.xlu0 %1435  ;;  %v7688_v11 = vsel %vm1957_vm10, %v9333_v26, %v7680_v12  ;;  %v9335_v5 = vld [vmem:[#allocation40_spill] sm:$0xff]  ;;  %v9340_v32 = vpack.c.bf16 %v9338_v17, %v9339_v38  ;;  %v3622_v54 = vpack.c.bf16 %v3004_v34, %v2943_v16  ;;  %v9341_v26 = vld [vmem:[#allocation18_spill] sm:$0xff]  ;;  %v3276_v34 = vrot.slane %v9197_v40, %v6372_v62 }
 0x3ac   : > { %9332 = vst [vmem:[#allocation62_spill] sm:$0xff] %v7682_v0  ;;  %v3312_v6 = vmul.f32 %v3284_v45, %v7688_v11  ;;  %v9337_v51 = vpack.c.bf16 %v9335_v5, %v9336_v14  ;;  %3752 = vmatprep.subr.bf16.mxu1 %v3641_v46  ;;  %v3126_v42 = vmul.f32 %v3089_v24, %v9341_v26  ;;  %v9345_v46 = vld [vmem:[#allocation41_spill] sm:$0xff]  ;;  %v3670_v14 = vsel %vm9350_vm1, %v3648_v49, 0 }
 0x3ad   : > { %v9344_v45 = vpack.c.bf16 %v9342_v15, %v9343_v44  ;;  %v3065_v24 = vmul.f32 %v3028_v19, %v9345_v46  ;;  %v3150_v16 = vrot.slane %v6652_v39, %v6378_v48  ;;  %v9347_v44 = vld [vmem:[#allocation61_spill] sm:$0xff]  ;;  %v9348_v15 = vld [vmem:[#allocation60_spill] sm:$0xff]  ;;  %v9352_v19 = vld [vmem:[#allocation19_spill] sm:$0xff]  ;;  %v3309_v26 = vmul.f32 %v3272_v7, %v7471_v21 }
 0x3ae   : > { %3706 = vmatpush1.bf16.msra.mxu0 %v9337_v51  ;;  %v3649_v13 = vpack.c.bf16 %v3312_v6, %v3312_v6  ;;  %v7706_v33 = vpop.permute.xlu1 %1349  ;;  %v9349_v6 = vpack.c.bf16 %v9347_v44, %v9348_v15  ;;  %v5610_v51 = vld [vmem:[%s8868_s5] sm:$0xff]  ;;  %v3248_v38 = vmul.f32 %v3211_v57, %v9352_v19  ;;  %v9356_v46 = vld [vmem:[#allocation6_spill] sm:$0xff]  ;;  %v9357_v15 = vld [vmem:[#allocation31_spill] sm:$0xff]  ;;  %vm9366_vm1 = vcmask 719872  }
 0x3af   : > { %3707 = vmatprep.subr.bf16.mxu0 %v9340_v32  ;;  %3753 = vmatpush1.bf16.msra.mxu1 %v9344_v45  ;;  %v7708_v5 = vpop.permute.xlu0 %1607  ;;  %v7725_v17 = vcombine.low %v5610_v51, %v5610_v51  ;;  %v3630_v62 = vpack.c.bf16 %v3126_v42, %v3065_v24  ;;  %v1392_v49 = vrot.slane %v6367_v53, %v9356_v46  ;;  %v9358_v21 = vld [vmem:[#allocation68_spill] sm:$0xff]  ;;  %v9359_v7 = vld [vmem:[#allocation67_spill] sm:$0xff]  ;;  %v9365_v19 = vld [vmem:[#allocation46_spill] sm:$0xff] }
 0x3b0   : > { %5186 = vmatprep.subr.msk.bf16.mxu1 %vm9346_vm4, %v3649_v13  ;;  %v9355_v13 = vld [vmem:[#allocation93_spill] sm:$0xff]  ;;  %v3187_v44 = vmul.f32 %v3150_v16, %v7211_v28  ;;  %v7741_v42 = vsel %vm1355_vm3, %v9357_v15, %v7706_v33  ;;  %v1306_v57 = vrot.slane %v6359_v50, %v9356_v46  ;;  %v9362_v16 = vld [vmem:[#allocation32_spill] sm:$0xff] }
 0x3b1   : > { %9351 = vst [vmem:[#allocation76_spill] sm:$0xff] %v7725_v17  ;;  %v3310_v45 = vmul.f32 %v3276_v34, %v9355_v13  ;;  %v9360_v34 = vpack.c.bf16 %v9358_v21, %v9359_v7  ;;  %v3646_v13 = vpack.c.bf16 %v3309_v26, %v3309_v26  ;;  %v1478_v26 = vrot.slane %v6658_v52, %v9356_v46  ;;  %v9369_v48 = vld [vmem:[#allocation17_spill] sm:$0xff] }
 0x3b2   : > { %3708 = vmatpush1.bf16.msra.mxu0 %v3622_v54  ;;  %v7728_v32 = vpop.permute.xlu1 %1521  ;;  %v3638_v24 = vpack.c.bf16 %v3248_v38, %v3187_v44  ;;  %v1414_v38 = vmul.f32 %v1392_v49, %v7741_v42  ;;  %v1564_v44 = vrot.slane %v6650_v36, %v9356_v46 }
 0x3b3   : > { %3709 = vmatprep.subr.bf16.mxu0 %v9349_v6  ;;  %3755 = vmatpush1.bf16.msra.mxu1 %v3670_v14  ;;  %9353 = vst [vmem:[#allocation44_spill] sm:$0xff] %v7728_v32  ;;  %v7730_v54 = vpop.permute.xlu0 %1779  ;;  %v9361_v6 = vld [vmem:[#allocation4_spill] sm:$0xff]  ;;  %v7755_v14 = vsel %vm1270_vm2, %v9362_v16, %v7656_v18  ;;  %v3647_v15 = vpack.c.bf16 %v3310_v45, %v3310_v45 }
 0x3b4   : > { %9354 = vst [vmem:[#allocation24_spill] sm:$0xff] %v7730_v54  ;;  %v1388_v28 = vrot.slane %v6367_v53, %v9361_v6  ;;  %9363 = vst [vmem:[#allocation77_spill] sm:$0xff] %v7755_v14  ;;  %v1302_v21 = vrot.slane %v6359_v50, %v9361_v6  ;;  %v7772_v7 = vsel %vm1527_vm5, %v9248_v27, %v7728_v32 }
 0x3b5   : > { %v1560_v49 = vrot.slane %v6650_v36, %v9361_v6 }
 0x3b6   : > { %3710 = vmatpush1.bf16.msra.mxu0 %v3630_v62  ;;  %3761 = vmatmul.mubr.bf16.vlgmr.msra.gmra.mrb[16].mxu1 %v7725_v17  ;;  %v7757_v51 = vpop.permute.xlu1 %1693  ;;  %v1413_v45 = vmul.f32 %v1388_v28, %v7304_v41  ;;  %v3664_v41 = vsel %vm9346_vm4, %v3646_v13, 0  ;;  %v1327_v32 = vmul.f32 %v1302_v21, %v9369_v48  ;;  %v1646_v48 = vrot.slane %v6737_v8, %v9361_v6 }
 0x3b7   : > { %3711 = vmatprep.subr.bf16.mxu0 %v9360_v34  ;;  %v7759_v62 = vpop.permute.xlu0 %1951  ;;  %5191 = vmatprep.mubr.msk.bf16.mxu1 %vm9366_vm1, %v9365_v19  ;;  %v1328_v34 = vmul.f32 %v1306_v57, %v7755_v14  ;;  %vm9367_vm1 = vcmp.lt.s32.totalorder %v6357_v47, 71  ;;  %v1586_v57 = vmul.f32 %v1564_v44, %v7772_v7  ;;  %v1474_v14 = vrot.slane %v6658_v52, %v9361_v6 }
 0x3b8   : > { %9364 = vst [vmem:[#allocation45_spill] sm:$0xff] %v7759_v62  ;;  %v7785_v16 = vsel %vm9367_vm1, %v9252_v55, %v7682_v0  ;;  %v7802_v55 = vsel %vm1699_vm7, %v7607_v22, %v7757_v51  ;;  %v1650_v0 = vrot.slane %v6737_v8, %v9356_v46  ;;  %v3546_v13 = vpack.c.bf16 %v1413_v45, %v1327_v32 }
 0x3b9   : > { %v3547_v28 = vpack.c.bf16 %v1414_v38, %v1328_v34  ;;  %v1500_v44 = vmul.f32 %v1478_v26, %v7785_v16  ;;  %v1585_v38 = vmul.f32 %v1560_v49, %v7363_v61  ;;  %v7814_v21 = vsel %vm1613_vm6, %v7628_v25, %v7708_v5 }
 0x3ba   : > { %3712 = vmatpush1.bf16.msra.mxu0 %v3638_v24  ;;  %v7787_v27 = vpop.permute.xlu1 %1865  ;;  %v1499_v32 = vmul.f32 %v1474_v14, %v7378_v58  ;;  %v1732_v45 = vrot.slane %v6739_v9, %v9361_v6  ;;  %vm9372_vm1 = vcmask 719872   ;;  %v1904_v49 = vrot.slane %v9285_v30, %v9361_v6 }
 0x3bb   : > { %5184 = vmatprep.subr.msk.bf16.mxu0 %vm9346_vm4, %v3647_v15  ;;  %v7789_v24 = vpop.permute.xlu0 %2037  ;;  %v1736_v15 = vrot.slane %v6739_v9, %v9356_v46  ;;  %v3555_v61 = vpack.c.bf16 %v1586_v57, %v1500_v44  ;;  %v7829_v25 = vsel %vm1871_vm9, %v7630_v23, %v7787_v27  ;;  %v1818_v57 = vrot.slane %v6779_v29, %v9361_v6 }
 0x3bc   : > { %9368 = vst [vmem:[#allocation26_spill] sm:$0xff] %v7789_v24  ;;  %9371 = vst [vmem:[#allocation91_spill] sm:$0xff] %v7829_v25  ;;  %v1672_v58 = vmul.f32 %v1650_v0, %v7814_v21  ;;  %v1822_v14 = vrot.slane %v6779_v29, %v9356_v46  ;;  %v1671_v23 = vmul.f32 %v1646_v48, %v7636_v2  ;;  %v9375_v0 = vld [vmem:[#allocation36_spill] sm:$0xff]  ;;  %vm9381_vm4 = vcmp.lt.s32.totalorder %v6357_v47, 1 }
 0x3bd   : > { %v1758_v26 = vmul.f32 %v1736_v15, %v7802_v55  ;;  %v3554_v15 = vpack.c.bf16 %v1585_v38, %v1499_v32  ;;  %v1757_v48 = vmul.f32 %v1732_v45, %v7626_v3  ;;  %v7873_v3 = vsel %vm1957_vm10, %v7680_v12, %v7759_v62 }
 0x3be   : > { %3714 = vmatpush1.bf16.msra.mxu0 %v3664_v41  ;;  %v2036_v22 = vpop.permute.xlu1 %2035  ;;  %v1908_v41 = vrot.slane %v9285_v30, %v9356_v46 }
 0x3bf   : > { %3769 = vmatprep.subr.bf16.mxu0 %v3547_v28  ;;  %v7816_v34 = vpop.permute.xlu0 %2123  ;;  %v2080_v28 = vrot.slane %v6845_v31, %v9356_v46  ;;  %v2046_v2 = vsel %vm2043_vm11, %v2036_v22, %v7789_v24  ;;  %v3563_v38 = vpack.c.bf16 %v1758_v26, %v1672_v58  ;;  %v3562_v45 = vpack.c.bf16 %v1757_v48, %v1671_v23 }
 0x3c0   : > { %9370 = vst [vmem:[#allocation5_spill] sm:$0xff] %v7816_v34  ;;  %v1843_v58 = vmul.f32 %v1818_v57, %v7662_v1  ;;  %v2334_v23 = vrot.slane %v9299_v59, %v9361_v6  ;;  %v1929_v1 = vmul.f32 %v1904_v49, %v7650_v43  ;;  %v2248_v43 = vrot.slane %v9296_v35, %v9361_v6 }
 0x3c1   : > { %3720 = vmatmul.mubr.bf16.vlgmr.msra.gmra.mrb[4].mxu0 %v7725_v17  ;;  %v2102_v32 = vmul.f32 %v2080_v28, %v2046_v2  ;;  %v9377_v17 = vld [vmem:[#allocation92_spill] sm:$0xff]  ;;  %v2338_v2 = vrot.slane %v9299_v59, %v9356_v46 }
 0x3c2   : > { %3770 = vmatpush1.bf16.msra.mxu0 %v3546_v13  ;;  %5189 = vmatprep.mubr.msk.bf16.mxu0 %vm9372_vm1, %v9365_v19  ;;  %v7845_v19 = vsel %vm1785_vm8, %v7654_v37, %v7730_v54  ;;  %v2122_v44 = vpop.permute.xlu1 %2121  ;;  %v1990_v37 = vrot.slane %v9290_v20, %v9361_v6  ;;  %v1994_v54 = vrot.slane %v9290_v20, %v9356_v46  ;;  %vm9383_vm1 = vmmov %vm9381_vm4 }
 0x3c3   : > { %3771 = vmatprep.subr.bf16.mxu0 %v3555_v61  ;;  %9373 = vst [vmem:[#allocation48_spill] sm:$0xff] %v7845_v19  ;;  %v7849_v13 = vpop.permute.xlu0 %2209  ;;  %v1930_v61 = vmul.f32 %v1908_v41, %v7829_v25  ;;  %v1844_v26 = vmul.f32 %v1822_v14, %v7845_v19  ;;  %v2047_v14 = vsel %vm2043_vm11, %v9377_v17, %v2036_v22 }
 0x3c4   : > { %9374 = vst [vmem:[#allocation8_spill] sm:$0xff] %v7849_v13  ;;  %v2252_v19 = vrot.slane %v9296_v35, %v9356_v46  ;;  %v2016_v57 = vmul.f32 %v1994_v54, %v7873_v3  ;;  %v3570_v54 = vpack.c.bf16 %v1929_v1, %v1843_v58  ;;  %v2132_v48 = vsel %vm2129_vm12, %v2122_v44, %v7816_v34 }
 0x3c5   : > { %v3571_v12 = vpack.c.bf16 %v1930_v61, %v1844_v26  ;;  %v9378_v61 = vld [vmem:[#allocation80_spill] sm:$0xff] }
 0x3c6   : > { %3772 = vmatpush1.bf16.msra.mxu0 %v3554_v15  ;;  %v2076_v15 = vrot.slane %v6845_v31, %v9361_v6  ;;  %v2208_v41 = vpop.permute.xlu1 %2207  ;;  %v3579_v17 = vpack.c.bf16 %v2102_v32, %v2016_v57  ;;  %v9384_v57 = vld [vmem:[#allocation55_spill] sm:$0xff] }
 0x3c7   : > { %3773 = vmatprep.subr.bf16.mxu0 %v3563_v38  ;;  %v7878_v24 = vpop.permute.xlu0 %2295  ;;  %v2218_v28 = vsel %vm2215_vm13, %v2208_v41, %v7849_v13  ;;  %v2166_v38 = vrot.slane %v9378_v61, %v9356_v46  ;;  %v9380_v13 = vld [vmem:[#allocation96_spill] sm:$0xff] }
 0x3c8   : > { %9376 = vst [vmem:[#allocation51_spill] sm:$0xff] %v7878_v24  ;;  %v2101_v49 = vmul.f32 %v2076_v15, %v2047_v14  ;;  %v2219_v22 = vsel %vm2215_vm13, %v9380_v13, %v2208_v41  ;;  %v2274_v59 = vmul.f32 %v2252_v19, %v2218_v28  ;;  %v2015_v15 = vmul.f32 %v1990_v37, %v7688_v11  ;;  %v9385_v41 = vld [vmem:[#allocation95_spill] sm:$0xff]  ;;  %v9386_v37 = vld [vmem:[#allocation9_spill] sm:$0xff] }
 0x3c9   : > { %v2162_v14 = vrot.slane %v9378_v61, %v9361_v6  ;;  %v2133_v28 = vsel %vm2129_vm12, %v9385_v41, %v2122_v44  ;;  %v2273_v11 = vmul.f32 %v2248_v43, %v2219_v22  ;;  %v9390_v22 = vld [vmem:[#allocation84_spill] sm:$0xff] }
 0x3ca   : > { %3774 = vmatpush1.bf16.msra.mxu0 %v3562_v45  ;;  %v2294_v26 = vpop.permute.xlu1 %2293  ;;  %v2567_v43 = vrot.slane %v9390_v22, %v9361_v6 }
 0x3cb   : > { %3775 = vmatprep.subr.bf16.mxu0 %v3571_v12  ;;  %v7905_v45 = vpop.permute.xlu0 %2444  ;;  %v2304_v62 = vsel %vm9381_vm4, %v2294_v26, %v7878_v24  ;;  %v9382_v12 = vld [vmem:[#allocation99_spill] sm:$0xff]  ;;  %v2188_v24 = vmul.f32 %v2166_v38, %v2132_v48  ;;  %v9391_v48 = vld [vmem:[#allocation88_spill] sm:$0xff]  ;;  %vm9398_vm4 = vcmp.lt.s32.totalorder %v6357_v47, 119 }
 0x3cc   : > { %9379 = vst [vmem:[#allocation47_spill] sm:$0xff] %v7905_v45  ;;  %v2305_v58 = vsel %vm9383_vm1, %v9382_v12, %v2294_v26  ;;  %v2360_v32 = vmul.f32 %v2338_v2, %v2304_v62  ;;  %v3578_v26 = vpack.c.bf16 %v2101_v49, %v2015_v15  ;;  %v9388_v62 = vld [vmem:[#allocation10_spill] sm:$0xff]  ;;  %v2571_v49 = vrot.slane %v9390_v22, %v9356_v46  ;;  %vm9400_vm1 = vmmov %vm9398_vm4 }
 0x3cd   : > { %v2359_v1 = vmul.f32 %v2334_v23, %v2305_v58  ;;  %v9389_v58 = vld [vmem:[#allocation83_spill] sm:$0xff]  ;;  %v3587_v38 = vpack.c.bf16 %v2274_v59, %v2188_v24  ;;  %v2653_v15 = vrot.slane %v9391_v48, %v9361_v6  ;;  %v9392_v59 = vld [vmem:[#allocation90_spill] sm:$0xff] }
 0x3ce   : > { %3776 = vmatpush1.bf16.msra.mxu0 %v3570_v54  ;;  %v2443_v34 = vpop.permute.xlu1 %2442  ;;  %v3595_v2 = vpack.c.bf16 %v9388_v62, %v2360_v32  ;;  %v2481_v19 = vrot.slane %v9389_v58, %v9361_v6  ;;  %v2485_v44 = vrot.slane %v9389_v58, %v9356_v46  ;;  %v2657_v32 = vrot.slane %v9391_v48, %v9356_v46  ;;  %v9394_v54 = vld [vmem:[#allocation12_spill] sm:$0xff]  ;;  %v9395_v48 = vld [vmem:[#allocation29_spill] sm:$0xff] }
 0x3cf   : > { %3777 = vmatprep.subr.bf16.mxu0 %v3579_v17  ;;  %v3594_v12 = vpack.c.bf16 %v9386_v37, %v2359_v1  ;;  %v7927_v23 = vpop.permute.xlu0 %2530  ;;  %v2187_v17 = vmul.f32 %v2162_v14, %v2133_v28  ;;  %v2450_v1 = vsel %vm2448_vm15, %v2443_v34, %v7905_v45  ;;  %v2739_v24 = vrot.slane %v9392_v59, %v9361_v6  ;;  %v9393_v37 = vld [vmem:[#allocation11_spill] sm:$0xff] }
 0x3d0   : > { %9387 = vst [vmem:[#allocation7_spill] sm:$0xff] %v7927_v23  ;;  %v2743_v14 = vrot.slane %v9392_v59, %v9356_v46  ;;  %v1396_v62 = vrot.slane %v6367_v53, %v9393_v37  ;;  %v1400_v13 = vrot.slane %v6367_v53, %v9394_v54  ;;  %v1314_v59 = vrot.slane %v6359_v50, %v9394_v54 }
 0x3d1   : > { %v3586_v41 = vpack.c.bf16 %v2273_v11, %v2187_v17  ;;  %v1310_v17 = vrot.slane %v6359_v50, %v9393_v37  ;;  %v2507_v22 = vmul.f32 %v2485_v44, %v2450_v1  ;;  %v2804_v53 = vrot.slane %v9375_v0, %v9356_v46 }
 0x3d2   : > { %3778 = vmatpush1.bf16.msra.mxu0 %v3578_v26  ;;  %v2529_v28 = vpop.permute.xlu1 %2528  ;;  %v2987_v50 = vrot.slane %v6501_v10, %v9356_v46 }
 0x3d3   : > { %3779 = vmatprep.subr.bf16.mxu0 %v3587_v38  ;;  %v7951_v26 = vpop.permute.xlu0 %2616  ;;  %v2536_v45 = vsel %vm2534_vm14, %v2529_v28, %v7927_v23  ;;  %v2537_v11 = vsel %vm2534_vm14, %v9395_v48, %v2529_v28  ;;  %v9396_v23 = vld [vmem:[#allocation27_spill] sm:$0xff] }
 0x3d4   : > { %v2593_v58 = vmul.f32 %v2571_v49, %v2536_v45  ;;  %v2451_v25 = vsel %vm2448_vm15, %v9396_v23, %v2443_v34  ;;  %v1482_v45 = vrot.slane %v6658_v52, %v9393_v37  ;;  %v2592_v44 = vmul.f32 %v2567_v43, %v2537_v11  ;;  %v9401_v34 = vld [vmem:[#allocation70_spill] sm:$0xff] }
 0x3d5   : > { %v2506_v11 = vmul.f32 %v2481_v19, %v2451_v25 }
 0x3d6   : > { %3780 = vmatpush1.bf16.msra.mxu0 %v3586_v41  ;;  %v2615_v49 = vpop.permute.xlu1 %2614  ;;  %v3603_v41 = vpack.c.bf16 %v2593_v58, %v2507_v22  ;;  %v9397_v22 = vld [vmem:[#allocation28_spill] sm:$0xff] }
 0x3d7   : > { %3781 = vmatprep.subr.bf16.mxu0 %v3595_v2  ;;  %v7982_v1 = vpop.permute.xlu0 %2702  ;;  %v2622_v58 = vsel %vm2620_vm0, %v2615_v49, %v7951_v26  ;;  %v2623_v28 = vsel %vm2620_vm0, %v9397_v22, %v2615_v49  ;;  %v3602_v48 = vpack.c.bf16 %v2592_v44, %v2506_v11  ;;  %v3170_v22 = vrot.slane %v6652_v39, %v9356_v46  ;;  %v9399_v2 = vld [vmem:[#allocation30_spill] sm:$0xff] }
 0x3d8   : > { %v2678_v23 = vmul.f32 %v2653_v15, %v2623_v28  ;;  %v2679_v43 = vmul.f32 %v2657_v32, %v2622_v58  ;;  %v9403_v28 = vld [vmem:[#allocation43_spill] sm:$0xff] }
 0x3da   : > { %3782 = vmatpush1.bf16.msra.mxu0 %v3594_v12  ;;  %v2701_v38 = vpop.permute.xlu1 %2700 }
 0x3db   : > { %3783 = vmatprep.subr.bf16.mxu0 %v3603_v41  ;;  %v1352_v49 = vpop.permute.xlu0 %1351  ;;  %v1830_v41 = vrot.slane %v6779_v29, %v9394_v54  ;;  %v2708_v25 = vsel %vm9398_vm4, %v2701_v38, %v7982_v1  ;;  %v2709_v44 = vsel %vm9400_vm1, %v9399_v2, %v2701_v38  ;;  %v9402_v38 = vrot.slane %v6369_v56, %v9361_v6 }
 0x3dc   : > { %v2764_v11 = vmul.f32 %v2739_v24, %v2709_v44  ;;  %v2765_v19 = vmul.f32 %v2743_v14, %v2708_v25  ;;  %v8027_v12 = vsel %vm1355_vm3, %v1352_v49, %v9401_v34  ;;  %v1357_v15 = vsel %vm1355_vm3, %v7706_v33, %v1352_v49 }
 0x3dd   : > { %v2886_v34 = vmul.f32 %v9402_v38, %v7741_v42  ;;  %v3292_v25 = vrot.slane %v9197_v40, %v9356_v46  ;;  %v1415_v49 = vmul.f32 %v1396_v62, %v1357_v15  ;;  %v1416_v44 = vmul.f32 %v1400_v13, %v8027_v12  ;;  %v9405_v62 = vld [vmem:[#allocation77_spill] sm:$0xff] }
 0x3de   : > { %3784 = vmatpush1.bf16.msra.mxu0 %v3602_v48  ;;  %v3610_v2 = vpack.c.bf16 %v2764_v11, %v2678_v23  ;;  %v1265_v33 = vpop.permute.xlu1 %1264  ;;  %v3611_v58 = vpack.c.bf16 %v2765_v19, %v2679_v43  ;;  %v9404_v42 = vrot.slane %v6369_v56, %v9356_v46  ;;  %v9406_v13 = vrot.slane %v9375_v0, %v9361_v6 }
 0x3df   : > { %v1524_v48 = vpop.permute.xlu0 %1523  ;;  %v8050_v32 = vsel %vm1270_vm2, %v1265_v33, %v9403_v28  ;;  %v1272_v14 = vsel %vm1270_vm2, %v7656_v18, %v1265_v33  ;;  %v9407_v28 = vrot.slane %v6501_v10, %v9361_v6  ;;  %v9408_v18 = vld [vmem:[#allocation44_spill] sm:$0xff]  ;;  %vm9411_vm2 = vcmp.lt.s32.totalorder %v6357_v47, 71 }
 0x3e0   : > { %v2887_v23 = vmul.f32 %v9404_v42, %v1357_v15  ;;  %v1329_v43 = vmul.f32 %v1310_v17, %v1272_v14  ;;  %v1330_v19 = vmul.f32 %v1314_v59, %v8050_v32  ;;  %v2826_v11 = vmul.f32 %v2804_v53, %v1272_v14  ;;  %3785 = vmatprep.subr.bf16.mxu0 %v3611_v58  ;;  %vm9413_vm3 = vmmov %vm9411_vm2 }
 0x3e1   : > { %v2825_v38 = vmul.f32 %v9406_v13, %v9405_v62  ;;  %v3008_v24 = vmul.f32 %v9407_v28, %v7772_v7  ;;  %v1529_v33 = vsel %vm1527_vm5, %v9408_v18, %v1524_v48  ;;  %v2260_v59 = vrot.slane %v9296_v35, %v9394_v54  ;;  %v9410_v28 = vld [vmem:[#allocation42_spill] sm:$0xff] }
 0x3e2   : > { %3786 = vmatpush1.bf16.msra.mxu0 %v3610_v2  ;;  %v3548_v17 = vpack.c.bf16 %v1415_v49, %v1329_v43  ;;  %v1438_v53 = vpop.permute.xlu1 %1437  ;;  %v3619_v14 = vpack.c.bf16 %v2887_v23, %v2826_v11  ;;  %v3549_v58 = vpack.c.bf16 %v1416_v44, %v1330_v19  ;;  %v2170_v42 = vrot.slane %v9378_v61, %v9393_v37  ;;  %v9412_v18 = vld [vmem:[#allocation62_spill] sm:$0xff] }
 0x3e3   : > { %v1696_v15 = vpop.permute.xlu0 %1695  ;;  %v9409_v7 = vrot.slane %v6499_v60, %v9361_v6  ;;  %v3618_v13 = vpack.c.bf16 %v2886_v34, %v2825_v38  ;;  %v8081_v2 = vsel %vm9411_vm2, %v1438_v53, %v9410_v28  ;;  %v1443_v49 = vsel %vm9413_vm3, %v9412_v18, %v1438_v53  ;;  %v9414_v23 = vld [vmem:[#allocation58_spill] sm:$0xff] }
 0x3e4   : > { %v8089_v44 = vsel %vm1527_vm5, %v1524_v48, %v9414_v23  ;;  %v3009_v43 = vmul.f32 %v2987_v50, %v1529_v33  ;;  %v9415_v34 = vrot.slane %v6499_v60, %v9356_v46  ;;  %3787 = vmatprep.subr.bf16.mxu0 %v3619_v14  ;;  %v9416_v11 = vrot.slane %v6560_v63, %v9361_v6  ;;  %v9423_v23 = vld [vmem:[#allocation35_spill] sm:$0xff] }
 0x3e5   : > { %v2947_v62 = vmul.f32 %v9409_v7, %v7785_v16  ;;  %v1501_v16 = vmul.f32 %v1482_v45, %v1443_v49  ;;  %v9417_v53 = vrot.slane %v9384_v57, %v9361_v6  ;;  %v1701_v45 = vsel %vm1699_vm7, %v7757_v51, %v1696_v15  ;;  %3810 = vmatprep.subr.bf16.mxu1 %v3549_v58 }
 0x3e6   : > { %v2948_v19 = vmul.f32 %v9415_v34, %v1443_v49  ;;  %v3069_v38 = vmul.f32 %v9416_v11, %v7814_v21  ;;  %v9418_v7 = vrot.slane %v6650_v36, %v9393_v37  ;;  %v9419_v28 = vrot.slane %v6658_v52, %v9394_v54  ;;  %3788 = vmatpush1.bf16.msra.mxu0 %v3618_v13  ;;  %v9422_v49 = vld [vmem:[#allocation56_spill] sm:$0xff] }
 0x3e7   : > { %v3626_v48 = vpack.c.bf16 %v3008_v24, %v2947_v62  ;;  %v3130_v50 = vmul.f32 %v9417_v53, %v7802_v55  ;;  %3811 = vmatpush1.bf16.msra.mxu1 %v3548_v17  ;;  %v1610_v24 = vpop.permute.xlu1 %1609  ;;  %v1868_v62 = vpop.permute.xlu0 %1867  ;;  %v9420_v55 = vrot.slane %v9197_v40, %v9361_v6  ;;  %v9425_v34 = vrot.slane %v6560_v63, %v9356_v46 }
 0x3e8   : > { %v1587_v14 = vmul.f32 %v9418_v7, %v1529_v33  ;;  %v1502_v21 = vmul.f32 %v9419_v28, %v8081_v2  ;;  %v3627_v18 = vpack.c.bf16 %v3009_v43, %v2948_v19  ;;  %v9421_v33 = vrot.slane %v6650_v36, %v9394_v54 }
 0x3e9   : > { %v8122_v51 = vmul.f32 %v9420_v55, %v7873_v3  ;;  %v8131_v52 = vsel %vm1613_vm6, %v1610_v24, %v9422_v49  ;;  %v1615_v17 = vsel %vm1613_vm6, %v7708_v5, %v1610_v24  ;;  %v8139_v3 = vsel %vm1699_vm7, %v1696_v15, %v9423_v23  ;;  %v9428_v15 = vld [vmem:[#allocation22_spill] sm:$0xff]  ;;  %v9429_v24 = vld [vmem:[#allocation91_spill] sm:$0xff] }
 0x3ea   : > { %v1588_v58 = vmul.f32 %v9421_v33, %v8089_v44  ;;  %v3556_v13 = vpack.c.bf16 %v1587_v14, %v1501_v16  ;;  %v9424_v43 = vrot.slane %v9384_v57, %v9356_v46  ;;  %v3070_v19 = vmul.f32 %v9425_v34, %v1615_v17  ;;  %3789 = vmatprep.subr.bf16.mxu0 %v3627_v18 }
 0x3eb   : > { %v9426_v11 = vrot.slane %v6737_v8, %v9393_v37  ;;  %v9427_v5 = vrot.slane %v6737_v8, %v9394_v54  ;;  %v8157_v7 = vsel %vm1871_vm9, %v1868_v62, %v9428_v15  ;;  %v1873_v14 = vsel %vm1871_vm9, %v7787_v27, %v1868_v62  ;;  %3790 = vmatpush1.bf16.msra.mxu0 %v3626_v48  ;;  %v1782_v49 = vpop.permute.xlu1 %1781  ;;  %v2040_v8 = vpop.permute.xlu0 %2039  ;;  %v9434_v62 = vld [vmem:[#allocation24_spill] sm:$0xff]  ;;  %vm9472_vm9 = vmmov %vm9400_vm1 }
 0x3ec   : > { %v3131_v36 = vmul.f32 %v9424_v43, %v1701_v45  ;;  %v3634_v28 = vpack.c.bf16 %v3130_v50, %v3069_v38  ;;  %v9430_v18 = vrot.slane %v9287_v4, %v9361_v6  ;;  %v3557_v33 = vpack.c.bf16 %v1588_v58, %v1502_v21  ;;  %v9433_v38 = vld [vmem:[#allocation52_spill] sm:$0xff] }
 0x3ed   : > { %v1673_v53 = vmul.f32 %v9426_v11, %v1615_v17  ;;  %v1674_v16 = vmul.f32 %v9427_v5, %v8131_v52  ;;  %v9431_v23 = vrot.slane %v6739_v9, %v9393_v37  ;;  %v9432_v34 = vrot.slane %v6739_v9, %v9394_v54 }
 0x3ee   : > { %v3252_v55 = vmul.f32 %v9430_v18, %v9429_v24  ;;  %v3635_v17 = vpack.c.bf16 %v3131_v36, %v3070_v19  ;;  %v8176_v50 = vsel %vm1785_vm8, %v1782_v49, %v9433_v38  ;;  %v1787_v48 = vsel %vm1785_vm8, %v9434_v62, %v1782_v49  ;;  %3812 = vmatprep.subr.bf16.mxu1 %v3557_v33  ;;  %v9438_v18 = vld [vmem:[#allocation48_spill] sm:$0xff] }
 0x3ef   : > { %v1759_v43 = vmul.f32 %v9431_v23, %v1701_v45  ;;  %v1760_v27 = vmul.f32 %v9432_v34, %v8139_v3  ;;  %v9435_v21 = vrot.slane %v9285_v30, %v9394_v54  ;;  %v9436_v45 = vrot.slane %v9287_v4, %v9356_v46  ;;  %3813 = vmatpush1.bf16.msra.mxu1 %v3556_v13  ;;  %v1954_v23 = vpop.permute.xlu1 %1953 }
 0x3f0   : > { %v1846_v9 = vmul.f32 %v1830_v41, %v8176_v50  ;;  %v3192_v19 = vmul.f32 %v3170_v22, %v1787_v48  ;;  %v9437_v5 = vrot.slane %v6779_v29, %v9393_v37  ;;  %3791 = vmatprep.subr.bf16.mxu0 %v3635_v17  ;;  %v9439_v33 = vrot.slane %v6652_v39, %v9361_v6  ;;  %v2212_v41 = vpop.permute.xlu0 %2211 }
 0x3f1   : > { %v1932_v58 = vmul.f32 %v9435_v21, %v8157_v7  ;;  %v3253_v36 = vmul.f32 %v9436_v45, %v1873_v14  ;;  %v3564_v11 = vpack.c.bf16 %v1759_v43, %v1673_v53  ;;  %v3565_v24 = vpack.c.bf16 %v1760_v27, %v1674_v16  ;;  %3792 = vmatpush1.bf16.msra.mxu0 %v3634_v28  ;;  %v9441_v16 = vld [vmem:[#allocation65_spill] sm:$0xff]  ;;  %v9443_v27 = vld [vmem:[#allocation23_spill] sm:$0xff] }
 0x3f2   : > { %v1845_v15 = vmul.f32 %v9437_v5, %v1787_v48  ;;  %v3191_v49 = vmul.f32 %v9439_v33, %v9438_v18  ;;  %v2174_v22 = vrot.slane %v9378_v61, %v9394_v54  ;;  %v3650_v13 = vpack.c.bf16 %v8122_v51, %v8122_v51  ;;  %v9442_v28 = vld [vmem:[#allocation45_spill] sm:$0xff]  ;;  %v9444_v51 = vld [vmem:[#allocation26_spill] sm:$0xff] }
 0x3f3   : > { %v3643_v34 = vpack.c.bf16 %v3253_v36, %v3192_v19  ;;  %v3573_v38 = vpack.c.bf16 %v1932_v58, %v1846_v9  ;;  %v9440_v29 = vrot.slane %v9285_v30, %v9393_v37  ;;  %3814 = vmatprep.subr.bf16.mxu1 %v3565_v24  ;;  %v8212_v6 = vsel %vm1957_vm10, %v1954_v23, %v9441_v16  ;;  %v9447_v36 = vld [vmem:[#allocation64_spill] sm:$0xff]  ;;  %v9448_v19 = vld [vmem:[#allocation81_spill] sm:$0xff] }
 0x3f4   : > { %v1959_v17 = vsel %vm1957_vm10, %v9442_v28, %v1954_v23  ;;  %v3642_v43 = vpack.c.bf16 %v3252_v55, %v3191_v49  ;;  %v2044_v62 = vsel %vm2043_vm11, %v2040_v8, %v9443_v27  ;;  %v2045_v30 = vsel %vm2043_vm11, %v9444_v51, %v2040_v8  ;;  %3815 = vmatpush1.bf16.msra.mxu1 %v3564_v11  ;;  %v9451_v18 = vld [vmem:[#allocation25_spill] sm:$0xff]  ;;  %v2447_v16 = vpop.permute.xlu0 %2446  ;;  %v9456_v51 = vld [vmem:[#allocation20_spill] sm:$0xff]  ;;  %vm9474_vm10 = vmmov %vm9400_vm1 }
 0x3f5   : > { %v1931_v53 = vmul.f32 %v9440_v29, %v1873_v14  ;;  %v3314_v14 = vmul.f32 %v3292_v25, %v1959_v17  ;;  %3793 = vmatprep.subr.bf16.mxu0 %v3643_v34  ;;  %v9445_v21 = vrot.slane %v9290_v20, %v9393_v37  ;;  %v9446_v55 = vrot.slane %v9290_v20, %v9394_v54  ;;  %v2126_v25 = vpop.permute.xlu1 %2125  ;;  %v9452_v49 = vld [vmem:[#allocation5_spill] sm:$0xff]  ;;  %v9453_v34 = vld [vmem:[#allocation8_spill] sm:$0xff] }
 0x3f6   : > { %v2216_v8 = vsel %vm2215_vm13, %v2212_v41, %v9447_v36  ;;  %v2256_v46 = vrot.slane %v9296_v35, %v9393_v37  ;;  %3816 = vmatprep.subr.bf16.mxu1 %v3573_v38  ;;  %3794 = vmatpush1.bf16.msra.mxu0 %v3642_v43  ;;  %v2342_v11 = vrot.slane %v9448_v19, %v9393_v37  ;;  %vm9454_vm5 = vcmask 1043456   ;;  %v5404_v28 = vld [vmem:[%s8872_s9 + $0x104] ss:$8 sps:$4 sm:$0xff]   ;;  %v5402_v27 = vld [vmem:[%s8872_s9 + $0x100] ss:$8 sps:$4 sm:$0xff]  }
 0x3f7   : > { %v3572_v48 = vpack.c.bf16 %v1931_v53, %v1845_v15  ;;  %v2017_v58 = vmul.f32 %v9445_v21, %v1959_v17  ;;  %v2018_v45 = vmul.f32 %v9446_v55, %v8212_v6  ;;  %v3651_v9 = vpack.c.bf16 %v3314_v14, %v3314_v14  ;;  %vm9455_vm6 = vmmov %vm9454_vm5  ;;  %v9458_v14 = vld [vmem:[#allocation51_spill] sm:$0xff]  ;;  %v9461_v55 = vld [vmem:[#allocation84_spill] sm:$0xff] }
 0x3f8   : > { %v9449_v5 = vrot.slane %v6845_v31, %v9393_v37  ;;  %v9450_v20 = vrot.slane %v6845_v31, %v9394_v54  ;;  %v2130_v33 = vsel %vm2129_vm12, %v2126_v25, %v9451_v18  ;;  %v2131_v23 = vsel %vm2129_vm12, %v9452_v49, %v2126_v25  ;;  %v5405_v18 = vld [vmem:[%s8872_s9 + $0x110] ss:$8 sps:$4 sm:$0xff]   ;;  %v9466_v49 = vld [vmem:[#allocation88_spill] sm:$0xff] }
 0x3f9   : > { %v2217_v38 = vsel %vm2215_vm13, %v9453_v34, %v2212_v41  ;;  %v2276_v29 = vmul.f32 %v2260_v59, %v2216_v8  ;;  %v2190_v53 = vmul.f32 %v2174_v22, %v2130_v33  ;;  %5188 = vmatprep.subr.msk.bf16.mxu0 %vm9454_vm5, %v3651_v9  ;;  %v2346_v31 = vrot.slane %v9448_v19, %v9394_v54  ;;  %v2298_v59 = vpop.permute.xlu1 %2297  ;;  %v9462_v8 = vld [vmem:[#allocation34_spill] sm:$0xff]  ;;  %v9467_v34 = vld [vmem:[#allocation7_spill] sm:$0xff] }
 0x3fa   : > { %v2103_v15 = vmul.f32 %v9449_v5, %v2045_v30  ;;  %v2104_v24 = vmul.f32 %v9450_v20, %v2044_v62  ;;  %3817 = vmatpush1.bf16.msra.mxu1 %v3572_v48  ;;  %v2189_v41 = vmul.f32 %v2170_v42, %v2131_v23  ;;  %v3676_v35 = vsel %vm9455_vm6, %v3650_v13, 0  ;;  %v5407_v42 = vld [vmem:[%s8872_s9 + $0x114] ss:$8 sps:$4 sm:$0xff]  }
 0x3fb   : > { %3796 = vmatpush1.bf16.msra.mxu0 %v3676_v35  ;;  %v3589_v22 = vpack.c.bf16 %v2276_v29, %v2190_v53  ;;  %v2275_v62 = vmul.f32 %v2256_v46, %v2217_v38  ;;  %vm9457_vm7 = vcmp.lt.s32.totalorder %v6357_v47, 1  ;;  %v9460_v13 = vld [vmem:[#allocation83_spill] sm:$0xff]  ;;  %v2456_v9 = vsel %vm2448_vm15, %v2447_v16, %v9462_v8  ;;  %v9463_v46 = vld [vmem:[#allocation76_spill] sm:$0xff]  ;;  %v9464_v19 = vld [vmem:[#allocation14_spill] sm:$0xff] }
 0x3fc   : > { %v3580_v17 = vpack.c.bf16 %v2103_v15, %v2017_v58  ;;  %v3581_v43 = vpack.c.bf16 %v2104_v24, %v2018_v45  ;;  %v2302_v30 = vsel %vm9457_vm7, %v2298_v59, %v9456_v51  ;;  %vm9459_vm8 = vmmov %vm9457_vm7  ;;  %v2493_v48 = vrot.slane %v9460_v13, %v9394_v54  ;;  %4806 = vmatprep.subr.bf16.mxu0 %v5404_v28  ;;  %v2619_v15 = vpop.permute.xlu0 %2618  ;;  %v9465_v20 = vld [vmem:[#allocation15_spill] sm:$0xff]  ;;  %v9468_v29 = vld [vmem:[#allocation33_spill] sm:$0xff] }
 0x3fd   : > { %v2303_v61 = vsel %vm9459_vm8, %v9458_v14, %v2298_v59  ;;  %v2362_v58 = vmul.f32 %v2346_v31, %v2302_v30  ;;  %v2579_v45 = vrot.slane %v9461_v55, %v9394_v54  ;;  %v3588_v36 = vpack.c.bf16 %v2275_v62, %v2189_v41  ;;  %v5410_v31 = vld [vmem:[%s8872_s9 + $0x124] ss:$8 sps:$4 sm:$0xff]   ;;  %v9469_v28 = vld [vmem:[#allocation47_spill] sm:$0xff]  ;;  %v9470_v35 = vld [vmem:[#allocation90_spill] sm:$0xff] }
 0x3fe   : > { %3818 = vmatprep.subr.bf16.mxu1 %v3581_v43  ;;  %v2361_v21 = vmul.f32 %v2342_v11, %v2303_v61  ;;  %3802 = vmatmul.mubr.bf16.vlgmr.msra.gmra.mrb[8].mxu0 %v9463_v46  ;;  %v2575_v25 = vrot.slane %v9461_v55, %v9393_v37  ;;  %v2533_v11 = vpop.permute.xlu1 %2532  ;;  %v2489_v33 = vrot.slane %v9460_v13, %v9393_v37  ;;  %v9473_v13 = vld [vmem:[#allocation79_spill] sm:$0xff]  ;;  %v5422_v47 = vld [vmem:[%s8872_s9 + $0x144] ss:$8 sps:$4 sm:$0xff]  }
 0x3ff   : > { %3819 = vmatpush1.bf16.msra.mxu1 %v3580_v17  ;;  %v3597_v24 = vpack.c.bf16 %v9465_v20, %v2362_v58  ;;  %4807 = vmatpush1.bf16.msra.mxu0 %v5402_v27  ;;  %v2665_v23 = vrot.slane %v9466_v49, %v9394_v54  ;;  %v2535_v38 = vsel %vm2534_vm14, %v9467_v34, %v2533_v11  ;;  %v5428_v20 = vld [vmem:[%s8872_s9 + $0x154] ss:$8 sps:$4 sm:$0xff]  }
 0x400   : > { %v3596_v5 = vpack.c.bf16 %v9464_v19, %v2361_v21  ;;  %3820 = vmatprep.subr.bf16.mxu1 %v3589_v22  ;;  %v2542_v53 = vsel %vm2534_vm14, %v2533_v11, %v9468_v29  ;;  %4808 = vmatprep.subr.bf16.mxu0 %v5407_v42  ;;  %v2449_v17 = vsel %vm2448_vm15, %v9469_v28, %v2447_v16  ;;  %v9471_v22 = vld [vmem:[#allocation73_spill] sm:$0xff]  ;;  %v5416_v21 = vld [vmem:[%s8872_s9 + $0x134] ss:$8 sps:$4 sm:$0xff]   ;;  %v9478_v29 = vld [vmem:[#allocation16_spill] sm:$0xff] }
 0x401   : > { %v2509_v41 = vmul.f32 %v2493_v48, %v2456_v9  ;;  %v2595_v43 = vmul.f32 %v2579_v45, %v2542_v53  ;;  %v2751_v59 = vrot.slane %v9470_v35, %v9394_v54  ;;  %v2628_v27 = vsel %vm2620_vm0, %v2619_v15, %v9471_v22  ;;  %v5408_v16 = vld [vmem:[%s8872_s9 + $0x120] ss:$8 sps:$4 sm:$0xff]   ;;  %v5414_v9 = vld [vmem:[%s8872_s9 + $0x130] ss:$8 sps:$4 sm:$0xff]  }
 0x402   : > { %v2594_v62 = vmul.f32 %v2575_v25, %v2535_v38  ;;  %v2747_v51 = vrot.slane %v9470_v35, %v9393_v37  ;;  %v2705_v30 = vpop.permute.xlu1 %2704  ;;  %v2508_v61 = vmul.f32 %v2489_v33, %v2449_v17  ;;  %v2661_v54 = vrot.slane %v9466_v49, %v9393_v37  ;;  %v9476_v33 = vld [vmem:[#allocation71_spill] sm:$0xff]  ;;  %v9479_v53 = vld [vmem:[#allocation21_spill] sm:$0xff] }
 0x403   : > { %3821 = vmatpush1.bf16.msra.mxu1 %v3588_v36  ;;  %v3605_v14 = vpack.c.bf16 %v2595_v43, %v2509_v41  ;;  %4809 = vmatpush1.bf16.msra.mxu0 %v5405_v18  ;;  %v2707_v42 = vsel %vm9472_vm9, %v7982_v1, %v2705_v30  ;;  %v2714_v48 = vsel %vm9474_vm10, %v2705_v30, %v9473_v13  ;;  %v9475_v18 = vld [vmem:[#allocation57_spill] sm:$0xff] }
 0x404   : > { %3822 = vmatprep.subr.bf16.mxu1 %v3597_v24  ;;  %4810 = vmatprep.subr.bf16.mxu0 %v5410_v31  ;;  %v2621_v58 = vsel %vm2620_vm0, %v7951_v26, %v2619_v15  ;;  %v2681_v55 = vmul.f32 %v2665_v23, %v2628_v27  ;;  %v2767_v45 = vmul.f32 %v2751_v59, %v2714_v48  ;;  %v5420_v15 = vld [vmem:[%s8872_s9 + $0x140] ss:$8 sps:$4 sm:$0xff]   ;;  %vm9488_vm0 = vmmov %vm9454_vm5 }
 0x405   : > { %v3604_v36 = vpack.c.bf16 %v2594_v62, %v2508_v61  ;;  %v2766_v8 = vmul.f32 %v2747_v51, %v2707_v42  ;;  %v2808_v25 = vrot.slane %v9375_v0, %v9393_v37  ;;  %v2680_v19 = vmul.f32 %v2661_v54, %v2621_v58  ;;  %v9481_v35 = vld [vmem:[#allocation37_spill] sm:$0xff]  ;;  %v9485_v62 = vld [vmem:[#allocation59_spill] sm:$0xff]  ;;  %vm9489_vm11 = vmmov %vm9488_vm0 }
 0x406   : > { %v3613_v1 = vpack.c.bf16 %v2767_v45, %v2681_v55  ;;  %v2869_v26 = vrot.slane %v6369_v56, %v9393_v37  ;;  %v2930_v0 = vrot.slane %v6499_v60, %v9393_v37  ;;  %v2991_v24 = vrot.slane %v6501_v10, %v9393_v37  ;;  %v5426_v60 = vld [vmem:[%s8872_s9 + $0x150] ss:$8 sps:$4 sm:$0xff]   ;;  %v5434_v10 = vld [vmem:[%s8872_s9 + $0x164] ss:$8 sps:$4 sm:$0xff]   ;;  %v5444_v30 = vld [vmem:[%s8872_s9 + $0x180] ss:$8 sps:$4 sm:$0xff]  }
 0x407   : > { %3823 = vmatpush1.bf16.msra.mxu1 %v3596_v5  ;;  %4811 = vmatpush1.bf16.msra.mxu0 %v5408_v16  ;;  %v3612_v5 = vpack.c.bf16 %v2766_v8, %v2680_v19  ;;  %v2827_v11 = vmul.f32 %v2808_v25, %v8050_v32  ;;  %v9477_v49 = vpack.c.bf16 %v9475_v18, %v9476_v33  ;;  %v9482_v59 = vld [vmem:[#allocation13_spill] sm:$0xff]  ;;  %v9487_v16 = vld [vmem:[#allocation63_spill] sm:$0xff] }
 0x408   : > { %3824 = vmatprep.subr.bf16.mxu1 %v3605_v14  ;;  %4812 = vmatprep.subr.bf16.mxu0 %v5416_v21  ;;  %v2888_v56 = vmul.f32 %v2869_v26, %v8027_v12  ;;  %v2949_v23 = vmul.f32 %v2930_v0, %v8081_v2  ;;  %v3052_v34 = vrot.slane %v6560_v63, %v9393_v37  ;;  %v5432_v63 = vld [vmem:[%s8872_s9 + $0x160] ss:$8 sps:$4 sm:$0xff]   ;;  %v5452_v14 = vld [vmem:[%s8872_s9 + $0x194] ss:$8 sps:$4 sm:$0xff]   ;;  %v5413_v61 = vld [vmem:[%s8872_s9 + $0x4] ss:$8 sps:$4 sm:$0xff]  }
 0x409   : > { %v3010_v12 = vmul.f32 %v2991_v24, %v8089_v44  ;;  %v3113_v38 = vrot.slane %v9384_v57, %v9393_v37  ;;  %v9480_v31 = vpack.c.bf16 %v9478_v29, %v9479_v53  ;;  %v3174_v17 = vrot.slane %v6652_v39, %v9393_v37  ;;  %v5440_v57 = vld [vmem:[%s8872_s9 + $0x174] ss:$8 sps:$4 sm:$0xff]   ;;  %v5438_v39 = vld [vmem:[%s8872_s9 + $0x170] ss:$8 sps:$4 sm:$0xff]   ;;  %v5458_v42 = vld [vmem:[%s8872_s9 + $0x1a4] ss:$8 sps:$4 sm:$0xff]  }
 0x40a   : > { %v3620_v32 = vpack.c.bf16 %v2888_v56, %v2827_v11  ;;  %v3071_v28 = vmul.f32 %v3052_v34, %v8131_v52  ;;  %v3296_v44 = vrot.slane %v9197_v40, %v9393_v37  ;;  %v3235_v43 = vrot.slane %v9287_v4, %v9393_v37  ;;  %v5446_v40 = vld [vmem:[%s8872_s9 + $0x184] ss:$8 sps:$4 sm:$0xff]   ;;  %v5450_v54 = vld [vmem:[%s8872_s9 + $0x190] ss:$8 sps:$4 sm:$0xff]   ;;  %v5411_v48 = vld [vmem:[%s8872_s9] ss:$8 sps:$4 sm:$0xff]  }
 0x40b   : > { %3825 = vmatpush1.bf16.msra.mxu1 %v3604_v36  ;;  %4813 = vmatpush1.bf16.msra.mxu0 %v5414_v9  ;;  %v3628_v2 = vpack.c.bf16 %v3010_v12, %v2949_v23  ;;  %v3132_v41 = vmul.f32 %v3113_v38, %v8139_v3  ;;  %v9483_v52 = vpack.c.bf16 %v9481_v35, %v9482_v59  ;;  %v9484_v3 = vld [vmem:[#allocation66_spill] sm:$0xff]  ;;  %v5456_v58 = vld [vmem:[%s8872_s9 + $0x1a0] ss:$8 sps:$4 sm:$0xff]   ;;  %v5425_v36 = vld [vmem:[%s8872_s9 + $0x24] ss:$8 sps:$4 sm:$0xff]   ;;  %v8553_v59 = vpop.permute.xlu0 %3854 }
 0x40c   : > { %3826 = vmatprep.subr.bf16.mxu1 %v3613_v1  ;;  %4814 = vmatprep.subr.bf16.mxu0 %v5422_v47  ;;  %v3193_v27 = vmul.f32 %v3174_v17, %v8176_v50  ;;  %v3315_v4 = vmul.f32 %v3296_v44, %v8212_v6  ;;  %v3254_v37 = vmul.f32 %v3235_v43, %v8157_v7  ;;  %v5419_v21 = vld [vmem:[%s8872_s9 + $0x14] ss:$8 sps:$4 sm:$0xff]   ;;  %v5417_v45 = vld [vmem:[%s8872_s9 + $0x10] ss:$8 sps:$4 sm:$0xff]   ;;  %v5423_v1 = vld [vmem:[%s8872_s9 + $0x20] ss:$8 sps:$4 sm:$0xff]  }
 0x40d   : > { %v3636_v22 = vpack.c.bf16 %v3132_v41, %v3071_v28  ;;  %v9486_v51 = vpack.c.bf16 %v9484_v3, %v9485_v62  ;;  %v3653_v6 = vpack.c.bf16 %v9487_v16, %v9487_v16  ;;  %v5464_v55 = vld [vmem:[%s8872_s9 + $0x1b4] ss:$8 sps:$4 sm:$0xff]   ;;  %v5462_v8 = vld [vmem:[%s8872_s9 + $0x1b0] ss:$8 sps:$4 sm:$0xff]   ;;  %v5468_v25 = vld [vmem:[%s8872_s9 + $0x1c0] ss:$8 sps:$4 sm:$0xff]  }
 0x40e   : > { %v3644_v50 = vpack.c.bf16 %v3254_v37, %v3193_v27  ;;  %v3652_v7 = vpack.c.bf16 %v3315_v4, %v3315_v4  ;;  %v5431_v9 = vld [vmem:[%s8872_s9 + $0x34] ss:$8 sps:$4 sm:$0xff]   ;;  %v5429_v47 = vld [vmem:[%s8872_s9 + $0x30] ss:$8 sps:$4 sm:$0xff]   ;;  %v5437_v26 = vld [vmem:[%s8872_s9 + $0x44] ss:$8 sps:$4 sm:$0xff]  }
 0x40f   : > { %3827 = vmatpush1.bf16.msra.mxu1 %v3612_v5  ;;  %4815 = vmatpush1.bf16.msra.mxu0 %v5420_v15  ;;  %v5476_v19 = vld [vmem:[%s8872_s9 + $0x1d4] ss:$8 sps:$4 sm:$0xff]   ;;  %v5474_v5 = vld [vmem:[%s8872_s9 + $0x1d0] ss:$8 sps:$4 sm:$0xff]   ;;  %v5482_v15 = vld [vmem:[%s8872_s9 + $0x1e4] ss:$8 sps:$4 sm:$0xff]  }
 0x410   : > { %3828 = vmatprep.subr.bf16.mxu1 %v9477_v49  ;;  %4816 = vmatprep.subr.bf16.mxu0 %v5428_v20  ;;  %v3682_v13 = vsel %vm9489_vm11, %v3652_v7, 0  ;;  %v5435_v11 = vld [vmem:[%s8872_s9 + $0x40] ss:$8 sps:$4 sm:$0xff]   ;;  %v5443_v0 = vld [vmem:[%s8872_s9 + $0x54] ss:$8 sps:$4 sm:$0xff]  }
 0x411   : > { %v5480_v20 = vld [vmem:[%s8872_s9 + $0x1e0] ss:$8 sps:$4 sm:$0xff]   ;;  %v5488_v56 = vld [vmem:[%s8872_s9 + $0x1f4] ss:$8 sps:$4 sm:$0xff]   ;;  %v5441_v24 = vld [vmem:[%s8872_s9 + $0x50] ss:$8 sps:$4 sm:$0xff]  }
 0x412   : > { %v5449_v18 = vld [vmem:[%s8872_s9 + $0x64] ss:$8 sps:$4 sm:$0xff]   ;;  %v5486_v33 = vld [vmem:[%s8872_s9 + $0x1f0] ss:$8 sps:$4 sm:$0xff]   ;;  %v5467_v12 = vld [vmem:[%s8872_s9 + $0x94] ss:$8 sps:$4 sm:$0xff]  }
 0x413   : > { %3829 = vmatpush1.bf16.msra.mxu1 %v3620_v32  ;;  %4817 = vmatpush1.bf16.msra.mxu0 %v5426_v60  ;;  %v5497_v49 = vld [vmem:[%s8872_s9 + $0x204] ss:$8 sps:$4 sm:$0xff]   ;;  %v5447_v60 = vld [vmem:[%s8872_s9 + $0x60] ss:$8 sps:$4 sm:$0xff]   ;;  %v5455_v32 = vld [vmem:[%s8872_s9 + $0x74] ss:$8 sps:$4 sm:$0xff]  }
 0x414   : > { %3830 = vmatprep.subr.bf16.mxu1 %v9480_v31  ;;  %4818 = vmatprep.subr.bf16.mxu0 %v5434_v10  ;;  %v5453_v23 = vld [vmem:[%s8872_s9 + $0x70] ss:$8 sps:$4 sm:$0xff]   ;;  %v5461_v34 = vld [vmem:[%s8872_s9 + $0x84] ss:$8 sps:$4 sm:$0xff]   ;;  %v5459_v10 = vld [vmem:[%s8872_s9 + $0x80] ss:$8 sps:$4 sm:$0xff]  }
 0x415   : > { %v5465_v38 = vld [vmem:[%s8872_s9 + $0x90] ss:$8 sps:$4 sm:$0xff]   ;;  %v5473_v29 = vld [vmem:[%s8872_s9 + $0xa4] ss:$8 sps:$4 sm:$0xff]   ;;  %v5471_v53 = vld [vmem:[%s8872_s9 + $0xa0] ss:$8 sps:$4 sm:$0xff]  }
 0x416   : > { %v5479_v31 = vld [vmem:[%s8872_s9 + $0xb4] ss:$8 sps:$4 sm:$0xff]   ;;  %v5483_v28 = vld [vmem:[%s8872_s9 + $0xc0] ss:$8 sps:$4 sm:$0xff]   ;;  %v5494_v44 = vld [vmem:[%s8872_s9 + $0xe4] ss:$8 sps:$4 sm:$0xff]  }
 0x417   : > { %3831 = vmatpush1.bf16.msra.mxu1 %v3628_v2  ;;  %4819 = vmatpush1.bf16.msra.mxu0 %v5432_v63  ;;  %v5477_v63 = vld [vmem:[%s8872_s9 + $0xb0] ss:$8 sps:$4 sm:$0xff]   ;;  %v5485_v2 = vld [vmem:[%s8872_s9 + $0xc4] ss:$8 sps:$4 sm:$0xff]   ;;  %v5491_v17 = vld [vmem:[%s8872_s9 + $0xd4] ss:$8 sps:$4 sm:$0xff]  }
 0x418   : > { %3832 = vmatprep.subr.bf16.mxu1 %v9483_v52  ;;  %4820 = vmatprep.subr.bf16.mxu0 %v5440_v57  ;;  %v5489_v57 = vld [vmem:[%s8872_s9 + $0xd0] ss:$8 sps:$4 sm:$0xff]   ;;  %v5492_v41 = vld [vmem:[%s8872_s9 + $0xe0] ss:$8 sps:$4 sm:$0xff]   ;;  %v5500_v43 = vld [vmem:[%s8872_s9 + $0xf4] ss:$8 sps:$4 sm:$0xff]  }
 0x419   : > { %v5498_v35 = vld [vmem:[%s8872_s9 + $0xf0] ss:$8 sps:$4 sm:$0xff]  }
 0x41a   : > { %v3908_v16 = vld [vmem:[%s8871_s8 + $0x18] sm:$0xff]  ;;  %v3915_v7 = vld [vmem:[%s8871_s8 + $0x50] sm:$0xff] }
 0x41b   : > { %3833 = vmatpush1.bf16.msra.mxu1 %v3636_v22  ;;  %4821 = vmatpush1.bf16.msra.mxu0 %v5438_v39 }
 0x41c   : > { %3834 = vmatprep.subr.bf16.mxu1 %v9486_v51  ;;  %4822 = vmatprep.subr.bf16.mxu0 %v5446_v40 }
 0x41f   : > { %3835 = vmatpush1.bf16.msra.mxu1 %v3644_v50  ;;  %4823 = vmatpush1.bf16.msra.mxu0 %v5444_v30 }
 0x420   : > { %5190 = vmatprep.subr.msk.bf16.mxu1 %vm9488_vm0, %v3653_v6  ;;  %4824 = vmatprep.subr.bf16.mxu0 %v5452_v14  ;;  %v3907_v6 = vld [vmem:[%s8871_s8 + $0x10] sm:$0xff] }
 0x423   : > { %3837 = vmatpush1.bf16.msra.mxu1 %v3682_v13  ;;  %4825 = vmatpush1.bf16.msra.mxu0 %v5450_v54  ;;  %v9490_v54 = vld [vmem:[#allocation38_spill] sm:$0xff]  ;;  %v3916_v13 = vld [vmem:[%s8871_s8 + $0x58] sm:$0xff] }
 0x424   : > { %4753 = vmatprep.subr.bf16.mxu1 %v5413_v61  ;;  %4826 = vmatprep.subr.bf16.mxu0 %v5458_v42 }
 0x426   : > { %3843 = vmatmul.mubr.bf16.vlgmr.msra.gmra.mrb[20].mxu1 %v9463_v46  ;;  %v5470_v46 = vld [vmem:[%s8872_s9 + $0x1c4] ss:$8 sps:$4 sm:$0xff]  }
 0x427   : > { %4754 = vmatpush1.bf16.msra.mxu1 %v5411_v48  ;;  %4827 = vmatpush1.bf16.msra.mxu0 %v5456_v58  ;;  %v3924_v48 = vld [vmem:[%s8871_s8 + $0x98] sm:$0xff] }
 0x428   : > { %4755 = vmatprep.subr.bf16.mxu1 %v5419_v21  ;;  %4828 = vmatprep.subr.bf16.mxu0 %v5464_v55  ;;  %v3932_v21 = vld [vmem:[%s8871_s8 + $0xd8] sm:$0xff] }
 0x42b   : > { %4756 = vmatpush1.bf16.msra.mxu1 %v5417_v45  ;;  %4829 = vmatpush1.bf16.msra.mxu0 %v5462_v8 }
 0x42c   : > { %4757 = vmatprep.subr.bf16.mxu1 %v5425_v36  ;;  %4830 = vmatprep.subr.bf16.mxu0 %v5470_v46 }
 0x42f   : > { %4758 = vmatpush1.bf16.msra.mxu1 %v5423_v1  ;;  %4831 = vmatpush1.bf16.msra.mxu0 %v5468_v25  ;;  %v5495_v25 = vld [vmem:[%s8872_s9 + $0x200] ss:$8 sps:$4 sm:$0xff]  }
 0x430   : > { %4759 = vmatprep.subr.bf16.mxu1 %v5431_v9  ;;  %4832 = vmatprep.subr.bf16.mxu0 %v5476_v19 }
 0x433   : > { %4760 = vmatpush1.bf16.msra.mxu1 %v5429_v47  ;;  %4833 = vmatpush1.bf16.msra.mxu0 %v5474_v5  ;;  %v5503_v47 = vld [vmem:[%s8872_s9 + $0x214] ss:$8 sps:$4 sm:$0xff]  }
 0x434   : > { %4761 = vmatprep.subr.bf16.mxu1 %v5437_v26  ;;  %4834 = vmatprep.subr.bf16.mxu0 %v5482_v15  ;;  %v3923_v5 = vld [vmem:[%s8871_s8 + $0x90] sm:$0xff] }
 0x435   : > { %v3931_v15 = vld [vmem:[%s8871_s8 + $0xd0] sm:$0xff] }
 0x437   : > { %4762 = vmatpush1.bf16.msra.mxu1 %v5435_v11  ;;  %4835 = vmatpush1.bf16.msra.mxu0 %v5480_v20  ;;  %v5501_v11 = vld [vmem:[%s8872_s9 + $0x210] ss:$8 sps:$4 sm:$0xff]  }
 0x438   : > { %4763 = vmatprep.subr.bf16.mxu1 %v5443_v0  ;;  %4836 = vmatprep.subr.bf16.mxu0 %v5488_v56  ;;  %v3905_v0 = vld [vmem:[%s8871_s8] sm:$0xff]  ;;  %v3906_v56 = vld [vmem:[%s8871_s8 + $0x8] sm:$0xff] }
 0x43b   : > { %4764 = vmatpush1.bf16.msra.mxu1 %v5441_v24  ;;  %4837 = vmatpush1.bf16.msra.mxu0 %v5486_v33  ;;  %v3914_v24 = vld [vmem:[%s8871_s8 + $0x48] sm:$0xff] }
 0x43c   : > { %4765 = vmatprep.subr.bf16.mxu1 %v5449_v18  ;;  %4859 = vmatprep.subr.bf16.mxu0 %v5497_v49  ;;  %v3913_v18 = vld [vmem:[%s8871_s8 + $0x40] sm:$0xff] }
 0x43f   : > { %4766 = vmatpush1.bf16.msra.mxu1 %v5447_v60 }
 0x440   : > { %4767 = vmatprep.subr.bf16.mxu1 %v5455_v32 }
 0x443   : > { %4768 = vmatpush1.bf16.msra.mxu1 %v5453_v23  ;;  %v5506_v23 = vld [vmem:[%s8872_s9 + $0x224] ss:$8 sps:$4 sm:$0xff]  }
 0x444   : > { %4769 = vmatprep.subr.bf16.mxu1 %v5461_v34  ;;  %v3922_v34 = vld [vmem:[%s8871_s8 + $0x88] sm:$0xff] }
 0x447   : > { %4770 = vmatpush1.bf16.msra.mxu1 %v5459_v10  ;;  %v3930_v10 = vld [vmem:[%s8871_s8 + $0xc8] sm:$0xff] }
 0x448   : > { %4771 = vmatprep.subr.bf16.mxu1 %v5467_v12 }
 0x44b   : > { %4772 = vmatpush1.bf16.msra.mxu1 %v5465_v38 }
 0x44c   : > { %4773 = vmatprep.subr.bf16.mxu1 %v5473_v29 }
 0x44f   : > { %4774 = vmatpush1.bf16.msra.mxu1 %v5471_v53 }
 0x450   : > { %4775 = vmatprep.subr.bf16.mxu1 %v5479_v31 }
 0x453   : > { %4776 = vmatpush1.bf16.msra.mxu1 %v5477_v63  ;;  %v5504_v63 = vld [vmem:[%s8872_s9 + $0x220] ss:$8 sps:$4 sm:$0xff]  }
 0x454   : > { %4777 = vmatprep.subr.bf16.mxu1 %v5485_v2 }
 0x457   : > { %4778 = vmatpush1.bf16.msra.mxu1 %v5483_v28 }
 0x458   : > { %4779 = vmatprep.subr.bf16.mxu1 %v5491_v17 }
 0x45b   : > { %4780 = vmatpush1.bf16.msra.mxu1 %v5489_v57  ;;  %v5509_v57 = vld [vmem:[%s8872_s9 + $0x234] ss:$8 sps:$4 sm:$0xff]  }
 0x45c   : > { %4781 = vmatprep.subr.bf16.mxu1 %v5494_v44 }
 0x45f   : > { %4782 = vmatpush1.bf16.msra.mxu1 %v5492_v41 }
 0x460   : > { %4783 = vmatprep.subr.bf16.mxu1 %v5500_v43 }
 0x463   : > { %4784 = vmatpush1.bf16.msra.mxu1 %v5498_v35  ;;  %v5507_v35 = vld [vmem:[%s8872_s9 + $0x230] ss:$8 sps:$4 sm:$0xff]  }
 0x489   : > { %v3762_v52 = vpop.f32.mrb[16].mxu1 }
 0x48a   : > { %v3859_v39 = vadd.f32 %v8553_v59, %v3762_v52  ;;  %v3764_v22 = vpop.f32.mrb[17].mxu1  ;;  %v3921_v52 = vld [vmem:[%s8871_s8 + $0x80] sm:$0xff] }
 0x48b   : > { %v3860_v27 = vadd.f32 %v8553_v59, %v3764_v22  ;;  %v3766_v40 = vpop.f32.mrb[18].mxu1  ;;  %v5512_v22 = vld [vmem:[%s8872_s9 + $0x244] ss:$8 sps:$4 sm:$0xff]  }
 0x48c   : > { %5594 = vtanh.f32 %v3859_v39  ;;  %v3767_v4 = vpop.f32.mrb[19].mxu1  ;;  %v3929_v39 = vld [vmem:[%s8871_s8 + $0xc0] sm:$0xff] }
 0x48d   : > { %5596 = vtanh.f32 %v3860_v27  ;;  %v5510_v4 = vld [vmem:[%s8872_s9 + $0x240] ss:$8 sps:$4 sm:$0xff]  }
 0x494   : > { %v3721_v37 = vpop.f32.mrb[4].mxu0 }
 0x495   : > { %v3857_v3 = vadd.f32 %v8553_v59, %v3721_v37  ;;  %v3723_v62 = vpop.f32.mrb[5].mxu0  ;;  %v5515_v37 = vld [vmem:[%s8872_s9 + $0x254] ss:$8 sps:$4 sm:$0xff]  }
 0x496   : > { %v3858_v51 = vadd.f32 %v8553_v59, %v3723_v62  ;;  %v3725_v30 = vpop.f32.mrb[6].mxu0  ;;  %v5595_v50 = vpop.eup %5594  ;;  %v5513_v62 = vld [vmem:[%s8872_s9 + $0x250] ss:$8 sps:$4 sm:$0xff]  }
 0x497   : > { %5598 = vtanh.f32 %v3857_v3  ;;  %v3726_v14 = vpop.f32.mrb[7].mxu0  ;;  %v5597_v61 = vpop.eup %5596  ;;  %v3884_v42 = vrot.slane %v5595_v50, %v9490_v54  ;;  %v5516_v30 = vld [vmem:[%s8872_s9 + $0x260] ss:$8 sps:$4 sm:$0xff]   ;;  %v5521_v50 = vld [vmem:[%s8872_s9 + $0x274] ss:$8 sps:$4 sm:$0xff]  }
 0x498   : > { %5600 = vtanh.f32 %v3858_v51  ;;  %v3888_v58 = vrot.slane %v5597_v61, %v9490_v54  ;;  %v5518_v51 = vld [vmem:[%s8872_s9 + $0x264] ss:$8 sps:$4 sm:$0xff]   ;;  %v5519_v14 = vld [vmem:[%s8872_s9 + $0x270] ss:$8 sps:$4 sm:$0xff]  }
 0x499   : > { %v3939_v55 = vmul.f32 %v3907_v6, %v3884_v42  ;;  %v3947_v45 = vmul.f32 %v3915_v7, %v3884_v42  ;;  %v3955_v60 = vmul.f32 %v3923_v5, %v3884_v42  ;;  %v3963_v32 = vmul.f32 %v3931_v15, %v3884_v42  ;;  %v5522_v6 = vld [vmem:[%s8872_s9 + $0x280] ss:$8 sps:$4 sm:$0xff]   ;;  %v5527_v7 = vld [vmem:[%s8872_s9 + $0x294] ss:$8 sps:$4 sm:$0xff]   ;;  %v5525_v61 = vld [vmem:[%s8872_s9 + $0x290] ss:$8 sps:$4 sm:$0xff]  }
 0x49a   : > { %v3940_v36 = vmul.f32 %v3908_v16, %v3888_v58  ;;  %v3948_v8 = vmul.f32 %v3916_v13, %v3888_v58  ;;  %v3956_v46 = vmul.f32 %v3924_v48, %v3888_v58  ;;  %v3964_v1 = vmul.f32 %v3932_v21, %v3888_v58  ;;  %v5524_v16 = vld [vmem:[%s8872_s9 + $0x284] ss:$8 sps:$4 sm:$0xff]   ;;  %v5528_v13 = vld [vmem:[%s8872_s9 + $0x2a0] ss:$8 sps:$4 sm:$0xff]   ;;  %v5533_v48 = vld [vmem:[%s8872_s9 + $0x2b4] ss:$8 sps:$4 sm:$0xff]  }
 0x49b   : > { %v3971_v19 = vpack.c.bf16 %v3947_v45, %v3939_v55  ;;  %v3979_v17 = vpack.c.bf16 %v3963_v32, %v3955_v60  ;;  %v5530_v42 = vld [vmem:[%s8872_s9 + $0x2a4] ss:$8 sps:$4 sm:$0xff]   ;;  %v5531_v21 = vld [vmem:[%s8872_s9 + $0x2b0] ss:$8 sps:$4 sm:$0xff]   ;;  %v5534_v55 = vld [vmem:[%s8872_s9 + $0x2c0] ss:$8 sps:$4 sm:$0xff]  }
 0x49c   : > { %v3972_v9 = vpack.c.bf16 %v3948_v8, %v3940_v36  ;;  %v3980_v26 = vpack.c.bf16 %v3964_v1, %v3956_v46  ;;  %v5536_v58 = vld [vmem:[%s8872_s9 + $0x2c4] ss:$8 sps:$4 sm:$0xff]   ;;  %v5539_v36 = vld [vmem:[%s8872_s9 + $0x2d4] ss:$8 sps:$4 sm:$0xff]   ;;  %v5543_v15 = vld [vmem:[%s8872_s9 + $0x2f0] ss:$8 sps:$4 sm:$0xff]  }
 0x49d   : > { %v5545_v5 = vld [vmem:[%s8872_s9 + $0x2f4] ss:$8 sps:$4 sm:$0xff]   ;;  %v3926_v60 = vld [vmem:[%s8871_s8 + $0xa8] sm:$0xff] }
 0x49e   : > { %4838 = vmatprep.mubr.bf16.mxu0 %v3972_v9  ;;  %v3934_v32 = vld [vmem:[%s8871_s8 + $0xe8] sm:$0xff] }
 0x49f   : > { %4839 = vmatmul.mubr.bf16.vlgmr.msra.gmra.mrb[12].mxu0 %v3971_v19  ;;  %v5537_v19 = vld [vmem:[%s8872_s9 + $0x2d0] ss:$8 sps:$4 sm:$0xff]  }
 0x4a0   : > { %4848 = vmatprep.mubr.bf16.mxu0 %v3980_v26  ;;  %4860 = vmatpush1.bf16.msra.mxu0 %v5495_v25  ;;  %v5540_v26 = vld [vmem:[%s8872_s9 + $0x2e0] ss:$8 sps:$4 sm:$0xff]  }
 0x4a1   : > { %v5599_v20 = vpop.eup %5598  ;;  %4861 = vmatprep.subr.bf16.mxu0 %v5503_v47  ;;  %v5542_v47 = vld [vmem:[%s8872_s9 + $0x2e4] ss:$8 sps:$4 sm:$0xff]  }
 0x4a2   : > { %v5601_v33 = vpop.eup %5600  ;;  %v3876_v49 = vrot.slane %v5599_v20, %v9490_v54  ;;  %v3910_v20 = vld [vmem:[%s8871_s8 + $0x28] sm:$0xff] }
 0x4a3   : > { %v3880_v12 = vrot.slane %v5601_v33, %v9490_v54 }
 0x4a4   : > { %v3937_v38 = vmul.f32 %v3905_v0, %v3876_v49  ;;  %v3945_v29 = vmul.f32 %v3913_v18, %v3876_v49  ;;  %4862 = vmatpush1.bf16.msra.mxu0 %v5501_v11  ;;  %v3953_v27 = vmul.f32 %v3921_v52, %v3876_v49  ;;  %v3961_v40 = vmul.f32 %v3929_v39, %v3876_v49  ;;  %v5548_v11 = vld [vmem:[%s8872_s9 + $0x304] ss:$8 sps:$4 sm:$0xff]   ;;  %v5552_v39 = vld [vmem:[%s8872_s9 + $0x320] ss:$8 sps:$4 sm:$0xff]  }
 0x4a5   : > { %v3938_v53 = vmul.f32 %v3906_v56, %v3880_v12  ;;  %v3946_v31 = vmul.f32 %v3914_v24, %v3880_v12  ;;  %v3954_v2 = vmul.f32 %v3922_v34, %v3880_v12  ;;  %v3962_v28 = vmul.f32 %v3930_v10, %v3880_v12  ;;  %4863 = vmatprep.subr.bf16.mxu0 %v5506_v23  ;;  %v3909_v56 = vld [vmem:[%s8871_s8 + $0x20] sm:$0xff]  ;;  %v3918_v49 = vld [vmem:[%s8871_s8 + $0x68] sm:$0xff] }
 0x4a6   : > { %v3969_v41 = vpack.c.bf16 %v3945_v29, %v3937_v38  ;;  %v3977_v3 = vpack.c.bf16 %v3961_v40, %v3953_v27  ;;  %v3917_v24 = vld [vmem:[%s8871_s8 + $0x60] sm:$0xff]  ;;  %v5557_v27 = vld [vmem:[%s8872_s9 + $0x334] ss:$8 sps:$4 sm:$0xff]   ;;  %v5555_v40 = vld [vmem:[%s8872_s9 + $0x330] ss:$8 sps:$4 sm:$0xff]  }
 0x4a7   : > { %v3970_v44 = vpack.c.bf16 %v3946_v31, %v3938_v53  ;;  %4849 = vmatmul.mubr.bf16.gmra.mrb[16].mxu0 %v3979_v17  ;;  %v3978_v43 = vpack.c.bf16 %v3962_v28, %v3954_v2  ;;  %v5551_v28 = vld [vmem:[%s8872_s9 + $0x314] ss:$8 sps:$4 sm:$0xff]  }
 0x4a8   : > { %4864 = vmatpush1.bf16.msra.mxu0 %v5504_v63  ;;  %v5546_v63 = vld [vmem:[%s8872_s9 + $0x300] ss:$8 sps:$4 sm:$0xff]  }
 0x4a9   : > { %4785 = vmatprep.mubr.bf16.mxu1 %v3970_v44  ;;  %4865 = vmatprep.subr.bf16.mxu0 %v5509_v57  ;;  %v3925_v57 = vld [vmem:[%s8871_s8 + $0xa0] sm:$0xff] }
 0x4aa   : > { %4786 = vmatmul.mubr.bf16.vlgmr.msra.gmra.mrb[24].mxu1 %v3969_v41  ;;  %v3933_v44 = vld [vmem:[%s8871_s8 + $0xe0] sm:$0xff]  ;;  %v5549_v41 = vld [vmem:[%s8872_s9 + $0x310] ss:$8 sps:$4 sm:$0xff]  }
 0x4ab   : > { %4795 = vmatprep.mubr.bf16.mxu1 %v3978_v43  ;;  %v5554_v43 = vld [vmem:[%s8872_s9 + $0x324] ss:$8 sps:$4 sm:$0xff]  }
 0x4ac   : > { %4866 = vmatpush1.bf16.msra.mxu0 %v5507_v35 }
 0x4ad   : > { %4867 = vmatprep.subr.bf16.mxu0 %v5512_v22 }
 0x4b0   : > { %4868 = vmatpush1.bf16.msra.mxu0 %v5510_v4  ;;  %v5560_v4 = vld [vmem:[%s8872_s9 + $0x344] ss:$8 sps:$4 sm:$0xff]  }
 0x4b1   : > { %4869 = vmatprep.subr.bf16.mxu0 %v5515_v37  ;;  %v5558_v37 = vld [vmem:[%s8872_s9 + $0x340] ss:$8 sps:$4 sm:$0xff]  }
 0x4b2   : > { %4796 = vmatmul.mubr.bf16.gmra.mrb[28].mxu1 %v3977_v3  ;;  %v5563_v3 = vld [vmem:[%s8872_s9 + $0x354] ss:$8 sps:$4 sm:$0xff]  }
 0x4b4   : > { %4870 = vmatpush1.bf16.msra.mxu0 %v5513_v62 }
 0x4b5   : > { %4871 = vmatprep.subr.bf16.mxu0 %v5518_v51  ;;  %v5561_v51 = vld [vmem:[%s8872_s9 + $0x350] ss:$8 sps:$4 sm:$0xff]  }
 0x4b8   : > { %4872 = vmatpush1.bf16.msra.mxu0 %v5516_v30 }
 0x4b9   : > { %4873 = vmatprep.subr.bf16.mxu0 %v5521_v50  ;;  %v5566_v50 = vld [vmem:[%s8872_s9 + $0x364] ss:$8 sps:$4 sm:$0xff]  }
 0x4bc   : > { %4874 = vmatpush1.bf16.msra.mxu0 %v5519_v14 }
 0x4bd   : > { %4875 = vmatprep.subr.bf16.mxu0 %v5524_v16 }
 0x4c0   : > { %4876 = vmatpush1.bf16.msra.mxu0 %v5522_v6 }
 0x4c1   : > { %4877 = vmatprep.subr.bf16.mxu0 %v5527_v7  ;;  %v5564_v7 = vld [vmem:[%s8872_s9 + $0x360] ss:$8 sps:$4 sm:$0xff]  }
 0x4c4   : > { %4878 = vmatpush1.bf16.msra.mxu0 %v5525_v61  ;;  %v5569_v61 = vld [vmem:[%s8872_s9 + $0x374] ss:$8 sps:$4 sm:$0xff]  }
 0x4c5   : > { %4879 = vmatprep.subr.bf16.mxu0 %v5530_v42  ;;  %v5567_v42 = vld [vmem:[%s8872_s9 + $0x370] ss:$8 sps:$4 sm:$0xff]  }
 0x4c8   : > { %4880 = vmatpush1.bf16.msra.mxu0 %v5528_v13  ;;  %v5572_v13 = vld [vmem:[%s8872_s9 + $0x384] ss:$8 sps:$4 sm:$0xff]  }
 0x4c9   : > { %4881 = vmatprep.subr.bf16.mxu0 %v5533_v48  ;;  %v5570_v48 = vld [vmem:[%s8872_s9 + $0x380] ss:$8 sps:$4 sm:$0xff]  }
 0x4cc   : > { %4882 = vmatpush1.bf16.msra.mxu0 %v5531_v21  ;;  %v5575_v21 = vld [vmem:[%s8872_s9 + $0x394] ss:$8 sps:$4 sm:$0xff]  }
 0x4cd   : > { %4883 = vmatprep.subr.bf16.mxu0 %v5536_v58 }
 0x4d0   : > { %4884 = vmatpush1.bf16.msra.mxu0 %v5534_v55  ;;  %v3912_v55 = vld [vmem:[%s8871_s8 + $0x38] sm:$0xff] }
 0x4d1   : > { %v3803_v45 = vpop.f32.mrb[8].mxu0  ;;  %4885 = vmatprep.subr.bf16.mxu0 %v5539_v36 }
 0x4d2   : > { %v3861_v8 = vadd.f32 %v8553_v59, %v3803_v45  ;;  %v3805_v46 = vpop.f32.mrb[9].mxu0  ;;  %v3920_v45 = vld [vmem:[%s8871_s8 + $0x78] sm:$0xff] }
 0x4d3   : > { %v3862_v1 = vadd.f32 %v8553_v59, %v3805_v46  ;;  %v3807_v9 = vpop.f32.mrb[10].mxu0 }
 0x4d4   : > { %5602 = vtanh.f32 %v3861_v8  ;;  %v3808_v25 = vpop.f32.mrb[11].mxu0  ;;  %4886 = vmatpush1.bf16.msra.mxu0 %v5537_v19  ;;  %v5573_v8 = vld [vmem:[%s8872_s9 + $0x390] ss:$8 sps:$4 sm:$0xff]   ;;  %v5578_v9 = vld [vmem:[%s8872_s9 + $0x3a4] ss:$8 sps:$4 sm:$0xff]  }
 0x4d5   : > { %5604 = vtanh.f32 %v3862_v1  ;;  %4887 = vmatprep.subr.bf16.mxu0 %v5542_v47  ;;  %v5576_v47 = vld [vmem:[%s8872_s9 + $0x3a0] ss:$8 sps:$4 sm:$0xff]  }
 0x4d8   : > { %4888 = vmatpush1.bf16.msra.mxu0 %v5540_v26  ;;  %v5581_v26 = vld [vmem:[%s8872_s9 + $0x3b4] ss:$8 sps:$4 sm:$0xff]  }
 0x4d9   : > { %4889 = vmatprep.subr.bf16.mxu0 %v5545_v5  ;;  %v5579_v5 = vld [vmem:[%s8872_s9 + $0x3b0] ss:$8 sps:$4 sm:$0xff]  }
 0x4dc   : > { %4890 = vmatpush1.bf16.msra.mxu0 %v5543_v15  ;;  %v5582_v15 = vld [vmem:[%s8872_s9 + $0x3c0] ss:$8 sps:$4 sm:$0xff]  }
 0x4dd   : > { %4912 = vmatprep.subr.bf16.mxu0 %v5548_v11  ;;  %v5587_v11 = vld [vmem:[%s8872_s9 + $0x3d4] ss:$8 sps:$4 sm:$0xff]  }
 0x4de   : > { %v5603_v0 = vpop.eup %5602 }
 0x4df   : > { %v5605_v18 = vpop.eup %5604  ;;  %v3892_v33 = vrot.slane %v5603_v0, %v9490_v54  ;;  %v5585_v0 = vld [vmem:[%s8872_s9 + $0x3d0] ss:$8 sps:$4 sm:$0xff]  }
 0x4e0   : > { %v3896_v23 = vrot.slane %v5605_v18, %v9490_v54 }
 0x4e1   : > { %v3941_v34 = vmul.f32 %v3909_v56, %v3892_v33  ;;  %v3949_v10 = vmul.f32 %v3917_v24, %v3892_v33  ;;  %v3957_v35 = vmul.f32 %v3925_v57, %v3892_v33  ;;  %v3965_v52 = vmul.f32 %v3933_v44, %v3892_v33  ;;  %v5588_v24 = vld [vmem:[%s8872_s9 + $0x3e0] ss:$8 sps:$4 sm:$0xff]   ;;  %v5593_v33 = vld [vmem:[%s8872_s9 + $0x3f4] ss:$8 sps:$4 sm:$0xff]  }
 0x4e2   : > { %v3942_v12 = vmul.f32 %v3910_v20, %v3896_v23  ;;  %v3950_v38 = vmul.f32 %v3918_v49, %v3896_v23  ;;  %v3958_v29 = vmul.f32 %v3926_v60, %v3896_v23  ;;  %v3966_v53 = vmul.f32 %v3934_v32, %v3896_v23  ;;  %v5590_v20 = vld [vmem:[%s8872_s9 + $0x3e4] ss:$8 sps:$4 sm:$0xff]   ;;  %v3911_v49 = vld [vmem:[%s8871_s8 + $0x30] sm:$0xff]  ;;  %v3928_v32 = vld [vmem:[%s8871_s8 + $0xb8] sm:$0xff] }
 0x4e3   : > { %v3973_v2 = vpack.c.bf16 %v3949_v10, %v3941_v34  ;;  %v3981_v22 = vpack.c.bf16 %v3965_v52, %v3957_v35  ;;  %v3919_v60 = vld [vmem:[%s8871_s8 + $0x70] sm:$0xff] }
 0x4e4   : > { %v3974_v31 = vpack.c.bf16 %v3950_v38, %v3942_v12  ;;  %v3982_v17 = vpack.c.bf16 %v3966_v53, %v3958_v29  ;;  %v5591_v23 = vld [vmem:[%s8872_s9 + $0x3f0] ss:$8 sps:$4 sm:$0xff]  }
 0x4e6   : > { %4891 = vmatprep.mubr.bf16.mxu0 %v3974_v31  ;;  %v3927_v31 = vld [vmem:[%s8871_s8 + $0xb0] sm:$0xff] }
 0x4e7   : > { %4892 = vmatmul.mubr.bf16.vlgmr.msra.gmra.mrb[12].mxu0 %v3973_v2 }
 0x4e8   : > { %4913 = vmatpush1.bf16.msra.mxu0 %v5546_v63  ;;  %4901 = vmatprep.mubr.bf16.mxu0 %v3982_v17  ;;  %v3935_v63 = vld [vmem:[%s8871_s8 + $0xf0] sm:$0xff] }
 0x4e9   : > { %4914 = vmatprep.subr.bf16.mxu0 %v5551_v28 }
 0x4ec   : > { %4915 = vmatpush1.bf16.msra.mxu0 %v5549_v41 }
 0x4ed   : > { %4916 = vmatprep.subr.bf16.mxu0 %v5554_v43 }
 0x4ef   : > { %4902 = vmatmul.mubr.bf16.gmra.mrb[16].mxu0 %v3981_v22 }
 0x4f0   : > { %4917 = vmatpush1.bf16.msra.mxu0 %v5552_v39 }
 0x4f1   : > { %4918 = vmatprep.subr.bf16.mxu0 %v5557_v27 }
 0x4f4   : > { %4919 = vmatpush1.bf16.msra.mxu0 %v5555_v40 }
 0x4f5   : > { %4920 = vmatprep.subr.bf16.mxu0 %v5560_v4 }
 0x4f8   : > { %4921 = vmatpush1.bf16.msra.mxu0 %v5558_v37 }
 0x4f9   : > { %v3844_v62 = vpop.f32.mrb[20].mxu1  ;;  %4922 = vmatprep.subr.bf16.mxu0 %v5563_v3 }
 0x4fa   : > { %v3846_v30 = vpop.f32.mrb[21].mxu1  ;;  %v3863_v19 = vadd.f32 %v8553_v59, %v3844_v62 }
 0x4fb   : > { %v3864_v14 = vadd.f32 %v8553_v59, %v3846_v30  ;;  %v3848_v16 = vpop.f32.mrb[22].mxu1  ;;  %v5584_v59 = vld [vmem:[%s8872_s9 + $0x3c4] ss:$8 sps:$4 sm:$0xff]  }
 0x4fc   : > { %v3849_v6 = vpop.f32.mrb[23].mxu1  ;;  %4923 = vmatpush1.bf16.msra.mxu0 %v5561_v51 }
 0x4fd   : > { %5606 = vtanh.f32 %v3864_v14  ;;  %4924 = vmatprep.subr.bf16.mxu0 %v5566_v50 }
 0x4fe   : > { %5608 = vtanh.f32 %v3863_v19 }
 0x500   : > { %4925 = vmatpush1.bf16.msra.mxu0 %v5564_v7 }
 0x501   : > { %4926 = vmatprep.subr.bf16.mxu0 %v5569_v61 }
 0x504   : > { %4927 = vmatpush1.bf16.msra.mxu0 %v5567_v42 }
 0x505   : > { %4928 = vmatprep.subr.bf16.mxu0 %v5572_v13 }
 0x507   : > { %v5607_v58 = vpop.eup %5606 }
 0x508   : > { %v3904_v36 = vrot.slane %v5607_v58, %v9490_v54  ;;  %4929 = vmatpush1.bf16.msra.mxu0 %v5570_v48  ;;  %v5609_v56 = vpop.eup %5608 }
 0x509   : > { %4930 = vmatprep.subr.bf16.mxu0 %v5575_v21  ;;  %v3900_v18 = vrot.slane %v5609_v56, %v9490_v54  ;;  %v3936_v54 = vld [vmem:[%s8871_s8 + $0xf8] sm:$0xff] }
 0x50a   : > { %v3944_v46 = vmul.f32 %v3912_v55, %v3904_v36  ;;  %v3952_v1 = vmul.f32 %v3920_v45, %v3904_v36  ;;  %v3960_v12 = vmul.f32 %v3928_v32, %v3904_v36  ;;  %v3968_v38 = vmul.f32 %v3936_v54, %v3904_v36 }
 0x50b   : > { %v3943_v34 = vmul.f32 %v3911_v49, %v3900_v18  ;;  %v3951_v10 = vmul.f32 %v3919_v60, %v3900_v18  ;;  %v3959_v2 = vmul.f32 %v3927_v31, %v3900_v18  ;;  %v3967_v28 = vmul.f32 %v3935_v63, %v3900_v18 }
 0x50c   : > { %v3976_v25 = vpack.c.bf16 %v3952_v1, %v3944_v46  ;;  %4931 = vmatpush1.bf16.msra.mxu0 %v5573_v8  ;;  %v3984_v53 = vpack.c.bf16 %v3968_v38, %v3960_v12 }
 0x50d   : > { %4932 = vmatprep.subr.bf16.mxu0 %v5578_v9  ;;  %v3975_v29 = vpack.c.bf16 %v3951_v10, %v3943_v34  ;;  %v3983_v17 = vpack.c.bf16 %v3967_v28, %v3959_v2 }
 0x50e   : > { %4944 = vmatprep.mubr.bf16.mxu0 %v3976_v25 }
 0x510   : > { %4933 = vmatpush1.bf16.msra.mxu0 %v5576_v47 }
 0x511   : > { %4934 = vmatprep.subr.bf16.mxu0 %v5581_v26 }
 0x514   : > { %4935 = vmatpush1.bf16.msra.mxu0 %v5579_v5 }
 0x515   : > { %4936 = vmatprep.subr.bf16.mxu0 %v5584_v59 }
 0x518   : > { %4937 = vmatpush1.bf16.msra.mxu0 %v5582_v15 }
 0x519   : > { %4938 = vmatprep.subr.bf16.mxu0 %v5587_v11 }
 0x51c   : > { %4939 = vmatpush1.bf16.msra.mxu0 %v5585_v0 }
 0x51d   : > { %4940 = vmatprep.subr.bf16.mxu0 %v5590_v20 }
 0x520   : > { %4941 = vmatpush1.bf16.msra.mxu0 %v5588_v24 }
 0x521   : > { %4942 = vmatprep.subr.bf16.mxu0 %v5593_v33 }
 0x524   : > { %4943 = vmatpush1.bf16.msra.mxu0 %v5591_v23 }
 0x527   : > { %4945 = vmatmul.mubr.bf16.vlgmr.msra.gmra.mrb[12].mxu0 %v3975_v29 }
 0x528   : > { %4954 = vmatprep.mubr.bf16.mxu0 %v3984_v53 }
 0x52f   : > { %4955 = vmatmul.mubr.bf16.gmra.mrb[16].mxu0 %v3983_v17 }
 0x57d   : > { %v4787_v57 = vpop.f32.mrb[24].mxu1 }
 0x57e   : > { %v4789_v44 = vpop.f32.mrb[25].mxu1 }
 0x57f   : > { %v4791_v41 = vpop.f32.mrb[26].mxu1 }
 0x580   : > { %v4793_v43 = vpop.f32.mrb[27].mxu1 }
 0x585   : > { %v4797_v35 = vpop.f32.mrb[28].mxu1 }
 0x586   : > { %v4799_v52 = vpop.f32.mrb[29].mxu1 }
 0x587   : > { %v4801_v39 = vpop.f32.mrb[30].mxu1 }
 0x588   : > { %v4803_v22 = vpop.f32.mrb[31].mxu1 }
 0x5fa   : > { %v4946_v27 = vpop.f32.mrb[12].mxu0 }
 0x5fb   : > { %v5323_v40 = vadd.f32 %v4946_v27, %v4787_v57  ;;  %v4948_v4 = vpop.f32.mrb[13].mxu0 }
 0x5fc   : > { %v5324_v37 = vadd.f32 %v4948_v4, %v4789_v44  ;;  %v4950_v3 = vpop.f32.mrb[14].mxu0 }
 0x5fd   : > { %4965 = vst [vmem:[%s356_s22] sm:$0xff] %v5323_v40  ;;  %v5325_v62 = vadd.f32 %v4950_v3, %v4791_v41  ;;  %v4952_v51 = vpop.f32.mrb[15].mxu0 }
 0x5fe   : > { %4966 = vst [vmem:[%s356_s22 + $0x8] sm:$0xff] %v5324_v37  ;;  %v5326_v30 = vadd.f32 %v4952_v51, %v4793_v43 }
 0x5ff   : > { %4967 = vst [vmem:[%s356_s22 + $0x10] sm:$0xff] %v5325_v62 }
 0x600   : > { %4968 = vst [vmem:[%s356_s22 + $0x18] sm:$0xff] %v5326_v30 }
 0x602   : > { %v4956_v50 = vpop.f32.mrb[16].mxu0 }
 0x603   : > { %v5327_v14 = vadd.f32 %v4956_v50, %v4797_v35  ;;  %v4958_v16 = vpop.f32.mrb[17].mxu0 }
 0x604   : > { %v5328_v6 = vadd.f32 %v4958_v16, %v4799_v52  ;;  %v4960_v7 = vpop.f32.mrb[18].mxu0 }
 0x605   : > { %4969 = vst [vmem:[%s356_s22 + $0x20] sm:$0xff] %v5327_v14  ;;  %v5329_v61 = vadd.f32 %v4960_v7, %v4801_v39  ;;  %v4962_v42 = vpop.f32.mrb[19].mxu0 }
 0x606   : > { %4970 = vst [vmem:[%s356_s22 + $0x28] sm:$0xff] %v5328_v6  ;;  %v5330_v13 = vadd.f32 %v4962_v42, %v4803_v22 }
 0x607   : > { %4971 = vst [vmem:[%s356_s22 + $0x30] sm:$0xff] %v5329_v61 }
 0x608   : > { %4972 = vst [vmem:[%s356_s22 + $0x38] sm:$0xff] %v5330_v13 }
 0x609 PF: > { %s20_s13 = sadd.s32 1, %s5617_s13  }
 0x60a   : > { %p17_p4 = scmp.ge.s32.totalorder %s20_s13, 4  }
 0x60c   :  { %19 = sbr.rel (!%p17_p4) target bundleno = 1 (0x1), region = 116 }

</bundles_post_ra>
